<compile_context>
chip_gen: v6e
topology: v6e:2x2x1
jax: 0.10.0
libtpu: 0.0.40
codegen_flags: <defaults>
</compile_context>

<pallas_src>
import jax
import jax.numpy as jnp
from jax.experimental import pallas as pl
from jax.experimental.pallas import tpu as pltpu


def _disc_kernel(a_sum_ref, node_ref,
                 w1_ref, b1_ref, w2_ref, b2_ref,
                 wagg_h_ref, wagg_n_ref, bagg_ref,
                 wf_ref, bf_ref,
                 feat_ref):
    tb, n, _ = a_sum_ref.shape
    m = node_ref.shape[-1]
    aux = wagg_h_ref.shape[-1] // 2

    a_sum = a_sum_ref[...].astype(jnp.float32)    # [TB, N, N] (bf16 in HBM -> f32 once)
    node3 = node_ref[...]                         # [TB, N, M]
    node2 = node3.reshape(tb * n, m)              # fold batch into matmul rows

    def adj_apply(h):
        # out[b,i,k] = sum_j a_sum[b,i,j] * h[b,j,k].
        # N is tiny and static, so this is an unrolled VPU multiply-accumulate
        # (lane-broadcast of an A column x sublane-broadcast of an H row) instead of
        # TB depth-8 MXU pushes; working set stays [TB, N, D].
        acc = a_sum[:, :, 0:1] * h[:, 0:1, :]
        for j in range(1, n):
            acc = acc + a_sum[:, :, j:j + 1] * h[:, j:j + 1, :]
        return acc

    # ---- GraphConvolution, layer 1 ----
    # torch: stack([linear1(x)]*E, 1); einsum('bijk,bikl->bijl'); sum over edge types.
    # The stacked copies are identical, so sum_e(adj[e] @ h1) == (sum_e adj[e]) @ h1,
    # and sum_e adj[e] was pre-reduced in the wrapper.
    h1 = jnp.dot(node2, w1_ref[...], preferred_element_type=jnp.float32) + b1_ref[...]
    h1 = h1.reshape(tb, n, -1)
    h = adj_apply(h1) + h1
    # (activation=None, dropout=identity)

    # ---- GraphConvolution, layer 2 ----
    h2 = jnp.dot(h.reshape(tb * n, -1), w2_ref[...],
                 preferred_element_type=jnp.float32) + b2_ref[...]
    h2 = h2.reshape(tb, n, -1)
    h = adj_apply(h2) + h2

    # ---- GraphAggregation (hidden is None -> annotations = cat(h, node)) ----
    # Lane-axis concat of the input removed (W split by rows in the wrapper) AND the
    # sigmoid/tanh branches share their LHS, so their weights are merged along the
    # output axis: 2 MXU pushes total, then a static lane slice.
    h2d = h.reshape(tb * n, -1)
    pre = (jnp.dot(h2d, wagg_h_ref[...], preferred_element_type=jnp.float32)
           + jnp.dot(node2, wagg_n_ref[...], preferred_element_type=jnp.float32)
           + bagg_ref[...])                               # [TB*N, 2*aux]
    ij = jax.nn.sigmoid(pre[:, :aux]) * jnp.tanh(pre[:, aux:])
    ij = ij.reshape(tb, n, aux)
    agg = jnp.tanh(jnp.sum(ij, axis=1))                   # [TB, aux]

    # ---- linear_layer: (Linear, Dropout) x 2 folded into one matmul in the wrapper ----
    feat_ref[...] = (jnp.dot(agg, wf_ref[...], preferred_element_type=jnp.float32)
                     + bf_ref[...])                       # [TB, linear_dim[-1]]


def _round_up(x, m):
    return ((x + m - 1) // m) * m


def _per_graph_vmem_bytes(n, m, d1, d2, aux, l_last):
    """Rough per-graph VMEM footprint, accounting for (8,128) lane/sublane padding."""
    lane = lambda d: _round_up(max(d, 1), 128)
    sub = lambda d: _round_up(max(d, 1), 8)
    tiles = 2 * sub(n) * (lane(n) * 2 + lane(m) * 4)        # double-buffered inputs (a_sum bf16 + node f32)
    tiles += 2 * lane(l_last) * 4                           # output block (amortized)
    inter = sub(n) * 4 * (3 * lane(d1) + 3 * lane(d2) + 2 * lane(2 * aux))  # live f32 intermediates
    return tiles + inter


def _pick_tb(B, target, per_graph_bytes, vmem_budget_bytes=40 * 1024 * 1024):
    """Pick a batch tile: multiple of 8, fits the VMEM budget, and (preferably)
    divides B exactly (no jnp.pad HBM copy) with an even grid for v7x's 2 TCs."""
    cap = max(8, (vmem_budget_bytes // max(per_graph_bytes, 1)) // 8 * 8)
    target = max(8, min(int(target), cap))
    divisors = [c for c in range(8, min(target, B) + 1, 8) if B % c == 0]
    if divisors:
        even = [c for c in divisors if (B // c) % 2 == 0]
        return (max(even) if even else max(divisors)), False
    # Ragged/small batch: fall back to a padded grid (one extra tile at most).
    return min(_round_up(target, 8), _round_up(B, 8)), True


def discriminator_forward(adj, node, params, *, tb=256):
    """adj: [B, N, N, Y] float32, node: [B, N, M] float32 -> (out [B,1], feat [B,l_last])."""
    B, N, _, Y = adj.shape
    M = node.shape[-1]

    # Glue (in XLA): slice off the "no bond" channel and pre-reduce the edge axis.
    # Cuts adjacency HBM->VMEM traffic by E and avoids a transposed [B,E,N,N] temp.
    # bf16 halves the only O(B*N^2) HBM stream; for one-hot adjacency a_sum is
    # integer-valued so the cast is exact.
    a_sum = jnp.sum(adj[..., 1:].astype(jnp.float32), axis=-1).astype(jnp.bfloat16)
    node_f = node.astype(jnp.float32)

    (w1, b1, w2, b2, ws, bs, wt, bt, wl0, bl0, wl1, bl1, wo, bo) = params
    d1 = w1.shape[1]
    d2 = w2.shape[1]
    aux = ws.shape[1]
    l_last = wl1.shape[1]

    # GraphAggregation: split by input rows (h vs node) AND merge sigmoid/tanh along
    # the output axis -> 2 matmuls instead of 4, no lane-axis concat of activations.
    wagg_h = jnp.concatenate([ws[:d2], wt[:d2]], axis=1)    # [d2, 2*aux]
    wagg_n = jnp.concatenate([ws[d2:], wt[d2:]], axis=1)    # [M,  2*aux]
    bagg = jnp.concatenate([bs, bt], axis=1)                # [1,  2*aux]

    # linear_layer has no nonlinearity between its two Linears -> fold exactly.
    wf = wl0 @ wl1                                          # [aux, l_last]
    bf = bl0 @ wl1 + bl1                                    # [1, l_last]

    weights = (w1, b1, w2, b2, wagg_h, wagg_n, bagg, wf, bf)

    # Batch tiling with explicit VMEM budgeting: the N=8 / M=4 trailing dims pad to
    # (8,128) vreg tiles, so each graph costs ~tens of KiB of VMEM, not its raw size.
    per_graph = _per_graph_vmem_bytes(N, M, d1, d2, aux, l_last)
    tb, _ = _pick_tb(B, tb, per_graph)
    grid_b = pl.cdiv(B, tb)
    b_pad = grid_b * tb
    if b_pad != B:
        # Only reached for ragged/small batches where no multiple-of-8 divisor exists.
        a_sum = jnp.pad(a_sum, ((0, b_pad - B), (0, 0), (0, 0)))
        node_f = jnp.pad(node_f, ((0, b_pad - B), (0, 0), (0, 0)))

    vmem_limit = int(min(max(per_graph * tb + (16 << 20), 32 << 20), 56 << 20))

    # Grid-invariant weights: constant index maps (full-array blocks).
    def const_spec(x):
        nd = x.ndim
        return pl.BlockSpec(x.shape, lambda i, _nd=nd: (0,) * _nd)

    in_specs = [
        pl.BlockSpec((tb, N, N), lambda i: (i, 0, 0)),
        pl.BlockSpec((tb, N, M), lambda i: (i, 0, 0)),
    ] + [const_spec(w) for w in weights]

    feat = pl.pallas_call(
        _disc_kernel,
        grid=(grid_b,),
        in_specs=in_specs,
        out_specs=pl.BlockSpec((tb, l_last), lambda i: (i, 0)),
        out_shape=jax.ShapeDtypeStruct((b_pad, l_last), jnp.float32),
        compiler_params=pltpu.CompilerParams(
            # Parallel batch axis: _pick_tb prefers an even grid so v7x's two
            # TensorCores both get work; harmless on single-TC v5e/v6e.
            dimension_semantics=("parallel",),
            vmem_limit_bytes=vmem_limit,
        ),
    )(a_sum, node_f, *weights)

    feat = feat[:B]
    # Final 1-wide projection stays in XLA: a (B, l_last) @ (l_last, 1) matmul instead
    # of a masked 1-lane store inside every grid step.
    out = jnp.dot(feat, wo) + bo
    return out, feat


def init_params(key, m_dim, graph_conv_dim, aux_dim, linear_dim):
    d1, d2 = graph_conv_dim
    shapes = [
        (m_dim, d1), (d1,),                 # gcn linear1
        (d1, d2), (d2,),                    # gcn linear2
        (d2 + m_dim, aux_dim), (aux_dim,),  # agg sigmoid_linear
        (d2 + m_dim, aux_dim), (aux_dim,),  # agg tanh_linear
    ]
    for cin, cout in zip([aux_dim] + linear_dim[:-1], linear_dim):
        shapes += [(cin, cout), (cout,)]    # linear_layer
    shapes += [(linear_dim[-1], 1), (1,)]   # output_layer

    params = []
    keys = jax.random.split(key, len(shapes))
    for k, s in zip(keys, shapes):
        if len(s) == 1:                     # bias -> stored as [1, out]
            params.append(0.05 * jax.random.normal(k, (1, s[0]), jnp.float32))
        else:                               # weight, stored [in, out]
            params.append(0.2 * jax.random.normal(k, s, jnp.float32))
    return tuple(params)


def reference_forward(adj, node, params):
    """Pure-JAX mirror of the PyTorch forward (hidden=None, eval mode)."""
    (w1, b1, w2, b2, ws, bs, wt, bt, wl0, bl0, wl1, bl1, wo, bo) = params
    adj_t = jnp.transpose(adj[:, :, :, 1:], (0, 3, 1, 2))
    h1 = node @ w1 + b1
    hid = jnp.einsum('beij,bjk->beik', adj_t, h1).sum(1) + h1
    h2 = hid @ w2 + b2
    h = jnp.einsum('beij,bjk->beik', adj_t, h2).sum(1) + h2
    ann = jnp.concatenate([h, node], axis=-1)
    i = jax.nn.sigmoid(ann @ ws + bs)
    j = jnp.tanh(ann @ wt + bt)
    agg = jnp.tanh((i * j).sum(1))
    hf = agg @ wl0 + bl0
    hf = hf @ wl1 + bl1
    out = hf @ wo + bo
    return out, hf


if __name__ == "__main__":
    key = jax.random.PRNGKey(0)
    B, N = 32, 8        # B chosen so the batch-blocked grid has 2 parallel steps
    b_dim = 4           # bond/edge types (incl. "no bond" channel, which is sliced off)
    m_dim = 4           # node feature dim (== b_dim, consistent with MolGAN config)
    graph_conv_dim = [32, 16]
    aux_dim = 32
    linear_dim = [32, 16]

    k_adj, k_node, k_par = jax.random.split(key, 3)
    # One-hot (MolGAN-style) adjacency: a_sum is integer-valued, so bf16 is exact.
    cat = jax.random.randint(k_adj, (B, N, N), 0, b_dim)
    cat = jnp.triu(cat) + jnp.transpose(jnp.triu(cat, 1), (0, 2, 1))   # symmetric bonds
    adj = jax.nn.one_hot(cat, b_dim, dtype=jnp.float32)
    node_cat = jax.random.randint(k_node, (B, N), 0, m_dim)
    node = jax.nn.one_hot(node_cat, m_dim, dtype=jnp.float32)

    params = init_params(k_par, m_dim, graph_conv_dim, aux_dim, linear_dim)

    out, feat = discriminator_forward(adj, node, params, tb=256)
    jax.block_until_ready((out, feat))

    ref_out, ref_feat = reference_forward(adj, node, params)
    assert out.shape == (B, 1) and feat.shape == (B, linear_dim[-1])
    assert jnp.allclose(out, ref_out, rtol=1e-4, atol=1e-4)
    assert jnp.allclose(feat, ref_feat, rtol=1e-4, atol=1e-4)
    print("KERNEL_OK")
</pallas_src>

<mosaic_0001>
module attributes {stable_mosaic.version = 11 : i64} {
  func.func @_disc_kernel(%arg0: i32, %arg1: memref<16x8x8xbf16, #tpu.memory_space<vmem>>, %arg2: memref<16x8x4xf32, #tpu.memory_space<vmem>>, %arg3: memref<4x32xf32, #tpu.memory_space<vmem>>, %arg4: memref<1x32xf32, #tpu.memory_space<vmem>>, %arg5: memref<32x16xf32, #tpu.memory_space<vmem>>, %arg6: memref<1x16xf32, #tpu.memory_space<vmem>>, %arg7: memref<16x64xf32, #tpu.memory_space<vmem>>, %arg8: memref<4x64xf32, #tpu.memory_space<vmem>>, %arg9: memref<1x64xf32, #tpu.memory_space<vmem>>, %arg10: memref<32x16xf32, #tpu.memory_space<vmem>>, %arg11: memref<1x16xf32, #tpu.memory_space<vmem>>, %arg12: memref<16x16xf32, #tpu.memory_space<vmem>>) attributes {dimension_semantics = [#tpu.dimension_semantics<parallel>], iteration_bounds = array<i64: 2>, scalar_prefetch = 0 : i64, scratch_operands = 0 : i64, tpu.core_type = #tpu.core_type<tc>, window_params = [{transform_indices = @transform_0, window_bounds = array<i64: 16, 8, 8>}, {transform_indices = @transform_1, window_bounds = array<i64: 16, 8, 4>}, {pipeline_mode = #tpu.pipeline_mode<synchronous>, transform_indices = @transform_2, window_bounds = array<i64: 4, 32>}, {pipeline_mode = #tpu.pipeline_mode<synchronous>, transform_indices = @transform_3, window_bounds = array<i64: 1, 32>}, {pipeline_mode = #tpu.pipeline_mode<synchronous>, transform_indices = @transform_4, window_bounds = array<i64: 32, 16>}, {pipeline_mode = #tpu.pipeline_mode<synchronous>, transform_indices = @transform_5, window_bounds = array<i64: 1, 16>}, {pipeline_mode = #tpu.pipeline_mode<synchronous>, transform_indices = @transform_6, window_bounds = array<i64: 16, 64>}, {pipeline_mode = #tpu.pipeline_mode<synchronous>, transform_indices = @transform_7, window_bounds = array<i64: 4, 64>}, {pipeline_mode = #tpu.pipeline_mode<synchronous>, transform_indices = @transform_8, window_bounds = array<i64: 1, 64>}, {pipeline_mode = #tpu.pipeline_mode<synchronous>, transform_indices = @transform_9, window_bounds = array<i64: 32, 16>}, {pipeline_mode = #tpu.pipeline_mode<synchronous>, transform_indices = @transform_10, window_bounds = array<i64: 1, 16>}, {transform_indices = @transform_11, window_bounds = array<i64: 16, 16>}]} {
    %c0 = arith.constant 0 : index
    %c0_0 = arith.constant 0 : index
    %c0_1 = arith.constant 0 : index
    %0 = vector.load %arg1[%c0, %c0_0, %c0_1] : memref<16x8x8xbf16, #tpu.memory_space<vmem>>, vector<16x8x8xbf16>
    %1 = arith.extf %0 : vector<16x8x8xbf16> to vector<16x8x8xf32>
    %c0_2 = arith.constant 0 : index
    %c0_3 = arith.constant 0 : index
    %c0_4 = arith.constant 0 : index
    %2 = vector.load %arg2[%c0_2, %c0_3, %c0_4] : memref<16x8x4xf32, #tpu.memory_space<vmem>>, vector<16x8x4xf32>
    %3 = vector.shape_cast %2 : vector<16x8x4xf32> to vector<128x4xf32>
    %c0_5 = arith.constant 0 : index
    %c0_6 = arith.constant 0 : index
    %4 = vector.load %arg3[%c0_5, %c0_6] : memref<4x32xf32, #tpu.memory_space<vmem>>, vector<4x32xf32>
    %cst = arith.constant dense<0.000000e+00> : vector<128x32xf32>
    %5 = tpu.matmul %3, %4, %cst {dimension_numbers = #tpu.dot_dimension_numbers<[1], [0], [0], [1], [0, 0, 1, 1], [], []>} : vector<128x4xf32>, vector<4x32xf32>, vector<128x32xf32> -> vector<128x32xf32>
    %c0_7 = arith.constant 0 : index
    %c0_8 = arith.constant 0 : index
    %6 = vector.load %arg4[%c0_7, %c0_8] : memref<1x32xf32, #tpu.memory_space<vmem>>, vector<1x32xf32>
    %7 = vector.broadcast %6 : vector<1x32xf32> to vector<128x32xf32>
    %8 = arith.addf %5, %7 : vector<128x32xf32>
    %9 = vector.shape_cast %8 : vector<128x32xf32> to vector<16x8x32xf32>
    %10 = vector.extract_strided_slice %1 {offsets = [0, 0, 0], sizes = [16, 8, 1], strides = [1, 1, 1]} : vector<16x8x8xf32> to vector<16x8x1xf32>
    %11 = vector.extract_strided_slice %9 {offsets = [0, 0, 0], sizes = [16, 1, 32], strides = [1, 1, 1]} : vector<16x8x32xf32> to vector<16x1x32xf32>
    %12 = vector.broadcast %10 : vector<16x8x1xf32> to vector<16x8x32xf32>
    %13 = vector.broadcast %11 : vector<16x1x32xf32> to vector<16x8x32xf32>
    %14 = arith.mulf %12, %13 : vector<16x8x32xf32>
    %15 = vector.extract_strided_slice %1 {offsets = [0, 0, 1], sizes = [16, 8, 1], strides = [1, 1, 1]} : vector<16x8x8xf32> to vector<16x8x1xf32>
    %16 = vector.extract_strided_slice %9 {offsets = [0, 1, 0], sizes = [16, 1, 32], strides = [1, 1, 1]} : vector<16x8x32xf32> to vector<16x1x32xf32>
    %17 = vector.broadcast %15 : vector<16x8x1xf32> to vector<16x8x32xf32>
    %18 = vector.broadcast %16 : vector<16x1x32xf32> to vector<16x8x32xf32>
    %19 = arith.mulf %17, %18 : vector<16x8x32xf32>
    %20 = arith.addf %14, %19 : vector<16x8x32xf32>
    %21 = vector.extract_strided_slice %1 {offsets = [0, 0, 2], sizes = [16, 8, 1], strides = [1, 1, 1]} : vector<16x8x8xf32> to vector<16x8x1xf32>
    %22 = vector.extract_strided_slice %9 {offsets = [0, 2, 0], sizes = [16, 1, 32], strides = [1, 1, 1]} : vector<16x8x32xf32> to vector<16x1x32xf32>
    %23 = vector.broadcast %21 : vector<16x8x1xf32> to vector<16x8x32xf32>
    %24 = vector.broadcast %22 : vector<16x1x32xf32> to vector<16x8x32xf32>
    %25 = arith.mulf %23, %24 : vector<16x8x32xf32>
    %26 = arith.addf %20, %25 : vector<16x8x32xf32>
    %27 = vector.extract_strided_slice %1 {offsets = [0, 0, 3], sizes = [16, 8, 1], strides = [1, 1, 1]} : vector<16x8x8xf32> to vector<16x8x1xf32>
    %28 = vector.extract_strided_slice %9 {offsets = [0, 3, 0], sizes = [16, 1, 32], strides = [1, 1, 1]} : vector<16x8x32xf32> to vector<16x1x32xf32>
    %29 = vector.broadcast %27 : vector<16x8x1xf32> to vector<16x8x32xf32>
    %30 = vector.broadcast %28 : vector<16x1x32xf32> to vector<16x8x32xf32>
    %31 = arith.mulf %29, %30 : vector<16x8x32xf32>
    %32 = arith.addf %26, %31 : vector<16x8x32xf32>
    %33 = vector.extract_strided_slice %1 {offsets = [0, 0, 4], sizes = [16, 8, 1], strides = [1, 1, 1]} : vector<16x8x8xf32> to vector<16x8x1xf32>
    %34 = vector.extract_strided_slice %9 {offsets = [0, 4, 0], sizes = [16, 1, 32], strides = [1, 1, 1]} : vector<16x8x32xf32> to vector<16x1x32xf32>
    %35 = vector.broadcast %33 : vector<16x8x1xf32> to vector<16x8x32xf32>
    %36 = vector.broadcast %34 : vector<16x1x32xf32> to vector<16x8x32xf32>
    %37 = arith.mulf %35, %36 : vector<16x8x32xf32>
    %38 = arith.addf %32, %37 : vector<16x8x32xf32>
    %39 = vector.extract_strided_slice %1 {offsets = [0, 0, 5], sizes = [16, 8, 1], strides = [1, 1, 1]} : vector<16x8x8xf32> to vector<16x8x1xf32>
    %40 = vector.extract_strided_slice %9 {offsets = [0, 5, 0], sizes = [16, 1, 32], strides = [1, 1, 1]} : vector<16x8x32xf32> to vector<16x1x32xf32>
    %41 = vector.broadcast %39 : vector<16x8x1xf32> to vector<16x8x32xf32>
    %42 = vector.broadcast %40 : vector<16x1x32xf32> to vector<16x8x32xf32>
    %43 = arith.mulf %41, %42 : vector<16x8x32xf32>
    %44 = arith.addf %38, %43 : vector<16x8x32xf32>
    %45 = vector.extract_strided_slice %1 {offsets = [0, 0, 6], sizes = [16, 8, 1], strides = [1, 1, 1]} : vector<16x8x8xf32> to vector<16x8x1xf32>
    %46 = vector.extract_strided_slice %9 {offsets = [0, 6, 0], sizes = [16, 1, 32], strides = [1, 1, 1]} : vector<16x8x32xf32> to vector<16x1x32xf32>
    %47 = vector.broadcast %45 : vector<16x8x1xf32> to vector<16x8x32xf32>
    %48 = vector.broadcast %46 : vector<16x1x32xf32> to vector<16x8x32xf32>
    %49 = arith.mulf %47, %48 : vector<16x8x32xf32>
    %50 = arith.addf %44, %49 : vector<16x8x32xf32>
    %51 = vector.extract_strided_slice %1 {offsets = [0, 0, 7], sizes = [16, 8, 1], strides = [1, 1, 1]} : vector<16x8x8xf32> to vector<16x8x1xf32>
    %52 = vector.extract_strided_slice %9 {offsets = [0, 7, 0], sizes = [16, 1, 32], strides = [1, 1, 1]} : vector<16x8x32xf32> to vector<16x1x32xf32>
    %53 = vector.broadcast %51 : vector<16x8x1xf32> to vector<16x8x32xf32>
    %54 = vector.broadcast %52 : vector<16x1x32xf32> to vector<16x8x32xf32>
    %55 = arith.mulf %53, %54 : vector<16x8x32xf32>
    %56 = arith.addf %50, %55 : vector<16x8x32xf32>
    %57 = arith.addf %56, %9 : vector<16x8x32xf32>
    %58 = vector.shape_cast %57 : vector<16x8x32xf32> to vector<128x32xf32>
    %c0_9 = arith.constant 0 : index
    %c0_10 = arith.constant 0 : index
    %59 = vector.load %arg5[%c0_9, %c0_10] : memref<32x16xf32, #tpu.memory_space<vmem>>, vector<32x16xf32>
    %cst_11 = arith.constant dense<0.000000e+00> : vector<128x16xf32>
    %60 = tpu.matmul %58, %59, %cst_11 {dimension_numbers = #tpu.dot_dimension_numbers<[1], [0], [0], [1], [0, 0, 1, 1], [], []>} : vector<128x32xf32>, vector<32x16xf32>, vector<128x16xf32> -> vector<128x16xf32>
    %c0_12 = arith.constant 0 : index
    %c0_13 = arith.constant 0 : index
    %61 = vector.load %arg6[%c0_12, %c0_13] : memref<1x16xf32, #tpu.memory_space<vmem>>, vector<1x16xf32>
    %62 = vector.broadcast %61 : vector<1x16xf32> to vector<128x16xf32>
    %63 = arith.addf %60, %62 : vector<128x16xf32>
    %64 = vector.shape_cast %63 : vector<128x16xf32> to vector<16x8x16xf32>
    %65 = vector.extract_strided_slice %1 {offsets = [0, 0, 0], sizes = [16, 8, 1], strides = [1, 1, 1]} : vector<16x8x8xf32> to vector<16x8x1xf32>
    %66 = vector.extract_strided_slice %64 {offsets = [0, 0, 0], sizes = [16, 1, 16], strides = [1, 1, 1]} : vector<16x8x16xf32> to vector<16x1x16xf32>
    %67 = vector.broadcast %65 : vector<16x8x1xf32> to vector<16x8x16xf32>
    %68 = vector.broadcast %66 : vector<16x1x16xf32> to vector<16x8x16xf32>
    %69 = arith.mulf %67, %68 : vector<16x8x16xf32>
    %70 = vector.extract_strided_slice %1 {offsets = [0, 0, 1], sizes = [16, 8, 1], strides = [1, 1, 1]} : vector<16x8x8xf32> to vector<16x8x1xf32>
    %71 = vector.extract_strided_slice %64 {offsets = [0, 1, 0], sizes = [16, 1, 16], strides = [1, 1, 1]} : vector<16x8x16xf32> to vector<16x1x16xf32>
    %72 = vector.broadcast %70 : vector<16x8x1xf32> to vector<16x8x16xf32>
    %73 = vector.broadcast %71 : vector<16x1x16xf32> to vector<16x8x16xf32>
    %74 = arith.mulf %72, %73 : vector<16x8x16xf32>
    %75 = arith.addf %69, %74 : vector<16x8x16xf32>
    %76 = vector.extract_strided_slice %1 {offsets = [0, 0, 2], sizes = [16, 8, 1], strides = [1, 1, 1]} : vector<16x8x8xf32> to vector<16x8x1xf32>
    %77 = vector.extract_strided_slice %64 {offsets = [0, 2, 0], sizes = [16, 1, 16], strides = [1, 1, 1]} : vector<16x8x16xf32> to vector<16x1x16xf32>
    %78 = vector.broadcast %76 : vector<16x8x1xf32> to vector<16x8x16xf32>
    %79 = vector.broadcast %77 : vector<16x1x16xf32> to vector<16x8x16xf32>
    %80 = arith.mulf %78, %79 : vector<16x8x16xf32>
    %81 = arith.addf %75, %80 : vector<16x8x16xf32>
    %82 = vector.extract_strided_slice %1 {offsets = [0, 0, 3], sizes = [16, 8, 1], strides = [1, 1, 1]} : vector<16x8x8xf32> to vector<16x8x1xf32>
    %83 = vector.extract_strided_slice %64 {offsets = [0, 3, 0], sizes = [16, 1, 16], strides = [1, 1, 1]} : vector<16x8x16xf32> to vector<16x1x16xf32>
    %84 = vector.broadcast %82 : vector<16x8x1xf32> to vector<16x8x16xf32>
    %85 = vector.broadcast %83 : vector<16x1x16xf32> to vector<16x8x16xf32>
    %86 = arith.mulf %84, %85 : vector<16x8x16xf32>
    %87 = arith.addf %81, %86 : vector<16x8x16xf32>
    %88 = vector.extract_strided_slice %1 {offsets = [0, 0, 4], sizes = [16, 8, 1], strides = [1, 1, 1]} : vector<16x8x8xf32> to vector<16x8x1xf32>
    %89 = vector.extract_strided_slice %64 {offsets = [0, 4, 0], sizes = [16, 1, 16], strides = [1, 1, 1]} : vector<16x8x16xf32> to vector<16x1x16xf32>
    %90 = vector.broadcast %88 : vector<16x8x1xf32> to vector<16x8x16xf32>
    %91 = vector.broadcast %89 : vector<16x1x16xf32> to vector<16x8x16xf32>
    %92 = arith.mulf %90, %91 : vector<16x8x16xf32>
    %93 = arith.addf %87, %92 : vector<16x8x16xf32>
    %94 = vector.extract_strided_slice %1 {offsets = [0, 0, 5], sizes = [16, 8, 1], strides = [1, 1, 1]} : vector<16x8x8xf32> to vector<16x8x1xf32>
    %95 = vector.extract_strided_slice %64 {offsets = [0, 5, 0], sizes = [16, 1, 16], strides = [1, 1, 1]} : vector<16x8x16xf32> to vector<16x1x16xf32>
    %96 = vector.broadcast %94 : vector<16x8x1xf32> to vector<16x8x16xf32>
    %97 = vector.broadcast %95 : vector<16x1x16xf32> to vector<16x8x16xf32>
    %98 = arith.mulf %96, %97 : vector<16x8x16xf32>
    %99 = arith.addf %93, %98 : vector<16x8x16xf32>
    %100 = vector.extract_strided_slice %1 {offsets = [0, 0, 6], sizes = [16, 8, 1], strides = [1, 1, 1]} : vector<16x8x8xf32> to vector<16x8x1xf32>
    %101 = vector.extract_strided_slice %64 {offsets = [0, 6, 0], sizes = [16, 1, 16], strides = [1, 1, 1]} : vector<16x8x16xf32> to vector<16x1x16xf32>
    %102 = vector.broadcast %100 : vector<16x8x1xf32> to vector<16x8x16xf32>
    %103 = vector.broadcast %101 : vector<16x1x16xf32> to vector<16x8x16xf32>
    %104 = arith.mulf %102, %103 : vector<16x8x16xf32>
    %105 = arith.addf %99, %104 : vector<16x8x16xf32>
    %106 = vector.extract_strided_slice %1 {offsets = [0, 0, 7], sizes = [16, 8, 1], strides = [1, 1, 1]} : vector<16x8x8xf32> to vector<16x8x1xf32>
    %107 = vector.extract_strided_slice %64 {offsets = [0, 7, 0], sizes = [16, 1, 16], strides = [1, 1, 1]} : vector<16x8x16xf32> to vector<16x1x16xf32>
    %108 = vector.broadcast %106 : vector<16x8x1xf32> to vector<16x8x16xf32>
    %109 = vector.broadcast %107 : vector<16x1x16xf32> to vector<16x8x16xf32>
    %110 = arith.mulf %108, %109 : vector<16x8x16xf32>
    %111 = arith.addf %105, %110 : vector<16x8x16xf32>
    %112 = arith.addf %111, %64 : vector<16x8x16xf32>
    %113 = vector.shape_cast %112 : vector<16x8x16xf32> to vector<128x16xf32>
    %c0_14 = arith.constant 0 : index
    %c0_15 = arith.constant 0 : index
    %114 = vector.load %arg7[%c0_14, %c0_15] : memref<16x64xf32, #tpu.memory_space<vmem>>, vector<16x64xf32>
    %cst_16 = arith.constant dense<0.000000e+00> : vector<128x64xf32>
    %115 = tpu.matmul %113, %114, %cst_16 {dimension_numbers = #tpu.dot_dimension_numbers<[1], [0], [0], [1], [0, 0, 1, 1], [], []>} : vector<128x16xf32>, vector<16x64xf32>, vector<128x64xf32> -> vector<128x64xf32>
    %c0_17 = arith.constant 0 : index
    %c0_18 = arith.constant 0 : index
    %116 = vector.load %arg8[%c0_17, %c0_18] : memref<4x64xf32, #tpu.memory_space<vmem>>, vector<4x64xf32>
    %cst_19 = arith.constant dense<0.000000e+00> : vector<128x64xf32>
    %117 = tpu.matmul %3, %116, %cst_19 {dimension_numbers = #tpu.dot_dimension_numbers<[1], [0], [0], [1], [0, 0, 1, 1], [], []>} : vector<128x4xf32>, vector<4x64xf32>, vector<128x64xf32> -> vector<128x64xf32>
    %118 = arith.addf %115, %117 : vector<128x64xf32>
    %c0_20 = arith.constant 0 : index
    %c0_21 = arith.constant 0 : index
    %119 = vector.load %arg9[%c0_20, %c0_21] : memref<1x64xf32, #tpu.memory_space<vmem>>, vector<1x64xf32>
    %120 = vector.broadcast %119 : vector<1x64xf32> to vector<128x64xf32>
    %121 = arith.addf %118, %120 : vector<128x64xf32>
    %122 = vector.extract_strided_slice %121 {offsets = [0, 0], sizes = [128, 32], strides = [1, 1]} : vector<128x64xf32> to vector<128x32xf32>
    %123 = arith.negf %122 : vector<128x32xf32>
    %124 = math.exp %123 : vector<128x32xf32>
    %cst_22 = arith.constant 1.000000e+00 : f32
    %125 = vector.broadcast %cst_22 : f32 to vector<128x32xf32>
    %126 = arith.addf %125, %124 : vector<128x32xf32>
    %127 = arith.divf %125, %126 : vector<128x32xf32>
    %128 = vector.extract_strided_slice %121 {offsets = [0, 32], sizes = [128, 32], strides = [1, 1]} : vector<128x64xf32> to vector<128x32xf32>
    %129 = math.tanh %128 : vector<128x32xf32>
    %130 = arith.mulf %127, %129 : vector<128x32xf32>
    %131 = vector.shape_cast %130 : vector<128x32xf32> to vector<16x8x32xf32>
    %cst_23 = arith.constant dense<0.000000e+00> : vector<16x32xf32>
    %132 = vector.multi_reduction <add>, %131, %cst_23 [1] : vector<16x8x32xf32> to vector<16x32xf32>
    %133 = math.tanh %132 : vector<16x32xf32>
    %c0_24 = arith.constant 0 : index
    %c0_25 = arith.constant 0 : index
    %134 = vector.load %arg10[%c0_24, %c0_25] : memref<32x16xf32, #tpu.memory_space<vmem>>, vector<32x16xf32>
    %cst_26 = arith.constant dense<0.000000e+00> : vector<16x16xf32>
    %135 = tpu.matmul %133, %134, %cst_26 {dimension_numbers = #tpu.dot_dimension_numbers<[1], [0], [0], [1], [0, 0, 1, 1], [], []>} : vector<16x32xf32>, vector<32x16xf32>, vector<16x16xf32> -> vector<16x16xf32>
    %c0_27 = arith.constant 0 : index
    %c0_28 = arith.constant 0 : index
    %136 = vector.load %arg11[%c0_27, %c0_28] : memref<1x16xf32, #tpu.memory_space<vmem>>, vector<1x16xf32>
    %137 = vector.broadcast %136 : vector<1x16xf32> to vector<16x16xf32>
    %138 = arith.addf %135, %137 : vector<16x16xf32>
    %c0_29 = arith.constant 0 : index
    %c0_30 = arith.constant 0 : index
    %139 = vector.load %arg12[%c0_29, %c0_30] : memref<16x16xf32, #tpu.memory_space<vmem>>, vector<16x16xf32>
    tpu.vector_store %arg12[%c0_29, %c0_30], %138 {strides = array<i32>} : memref<16x16xf32, #tpu.memory_space<vmem>>, vector<16x16xf32>,
    return
  }
  func.func @transform_0(%arg0: i32) -> (i32, i32, i32) {
    %c0_i32 = arith.constant 0 : i32
    %c0_i32_0 = arith.constant 0 : i32
    %c0_i32_1 = arith.constant 0 : i32
    return %arg0, %c0_i32, %c0_i32_0 : i32, i32, i32
  }
  func.func @transform_1(%arg0: i32) -> (i32, i32, i32) {
    %c0_i32 = arith.constant 0 : i32
    %c0_i32_0 = arith.constant 0 : i32
    %c0_i32_1 = arith.constant 0 : i32
    return %arg0, %c0_i32, %c0_i32_0 : i32, i32, i32
  }
  func.func @transform_2(%arg0: i32) -> (i32, i32) {
    %c0_i32 = arith.constant 0 : i32
    %c0_i32_0 = arith.constant 0 : i32
    %c0_i32_1 = arith.constant 0 : i32
    return %c0_i32, %c0_i32_0 : i32, i32
  }
  func.func @transform_3(%arg0: i32) -> (i32, i32) {
    %c0_i32 = arith.constant 0 : i32
    %c0_i32_0 = arith.constant 0 : i32
    %c0_i32_1 = arith.constant 0 : i32
    return %c0_i32, %c0_i32_0 : i32, i32
  }
  func.func @transform_4(%arg0: i32) -> (i32, i32) {
    %c0_i32 = arith.constant 0 : i32
    %c0_i32_0 = arith.constant 0 : i32
    %c0_i32_1 = arith.constant 0 : i32
    return %c0_i32, %c0_i32_0 : i32, i32
  }
  func.func @transform_5(%arg0: i32) -> (i32, i32) {
    %c0_i32 = arith.constant 0 : i32
    %c0_i32_0 = arith.constant 0 : i32
    %c0_i32_1 = arith.constant 0 : i32
    return %c0_i32, %c0_i32_0 : i32, i32
  }
  func.func @transform_6(%arg0: i32) -> (i32, i32) {
    %c0_i32 = arith.constant 0 : i32
    %c0_i32_0 = arith.constant 0 : i32
    %c0_i32_1 = arith.constant 0 : i32
    return %c0_i32, %c0_i32_0 : i32, i32
  }
  func.func @transform_7(%arg0: i32) -> (i32, i32) {
    %c0_i32 = arith.constant 0 : i32
    %c0_i32_0 = arith.constant 0 : i32
    %c0_i32_1 = arith.constant 0 : i32
    return %c0_i32, %c0_i32_0 : i32, i32
  }
  func.func @transform_8(%arg0: i32) -> (i32, i32) {
    %c0_i32 = arith.constant 0 : i32
    %c0_i32_0 = arith.constant 0 : i32
    %c0_i32_1 = arith.constant 0 : i32
    return %c0_i32, %c0_i32_0 : i32, i32
  }
  func.func @transform_9(%arg0: i32) -> (i32, i32) {
    %c0_i32 = arith.constant 0 : i32
    %c0_i32_0 = arith.constant 0 : i32
    %c0_i32_1 = arith.constant 0 : i32
    return %c0_i32, %c0_i32_0 : i32, i32
  }
  func.func @transform_10(%arg0: i32) -> (i32, i32) {
    %c0_i32 = arith.constant 0 : i32
    %c0_i32_0 = arith.constant 0 : i32
    %c0_i32_1 = arith.constant 0 : i32
    return %c0_i32, %c0_i32_0 : i32, i32
  }
  func.func @transform_11(%arg0: i32) -> (i32, i32) {
    %c0_i32 = arith.constant 0 : i32
    %c0_i32_0 = arith.constant 0 : i32
    return %arg0, %c0_i32 : i32, i32
  }
}

</mosaic_0001>

<bundles_post_ra>
// kernel: tpu_custom_call.1
= control target key start
LH: loop header
LB: loop body
LE: loop exit
PB: predicated region body
PF: predicated region fallthrough
CT: control target
= control target key end

     0   :  { %s4770_s17 = smov 0   ;;  %s6665_s0 = inlined_call_operand.vmem [shape: bf16[32,8,8], index: 0, kind: input, shape index: {}]   ;;  %s6666_s1 = inlined_call_operand.vmem [shape: f32[32,8,4], index: 1, kind: input, shape index: {}]   ;;  %s6667_s2 = inlined_call_operand.vmem [shape: f32[4,32], index: 2, kind: input, shape index: {}]   ;;  %s6668_s3 = inlined_call_operand.vmem [shape: f32[1,32], index: 3, kind: input, shape index: {}]   ;;  %s6669_s4 = inlined_call_operand.vmem [shape: f32[32,16], index: 4, kind: input, shape index: {}]   ;;  %s6670_s5 = inlined_call_operand.vmem [shape: f32[1,16], index: 5, kind: input, shape index: {}]   ;;  %s6671_s6 = inlined_call_operand.vmem [shape: f32[16,64], index: 6, kind: input, shape index: {}]   ;;  %s6672_s7 = inlined_call_operand.vmem [shape: f32[4,64], index: 7, kind: input, shape index: {}]   ;;  %s6673_s8 = inlined_call_operand.vmem [shape: f32[1,64], index: 8, kind: input, shape index: {}]   ;;  %s6674_s9 = inlined_call_operand.vmem [shape: f32[32,16], index: 9, kind: input, shape index: {}]   ;;  %s6675_s10 = inlined_call_operand.vmem [shape: f32[1,16], index: 10, kind: input, shape index: {}]   ;;  %s6676_s11 = inlined_call_operand.vmem [shape: f32[32,16], index: 11, kind: output, shape index: {}]  }
   0x1 LB: > { %s3820_s18 = sadd.s32 4294967295, %s4699_s17   ;;  %p3824_p0 = scmp.ge.s32.totalorder %s4699_s17, 1  ;;  %s4699_s17 = sphi %s4770_s17, %s21_s17  }
   0x2   : > { %p349_p1 = scmp.lt.s32.totalorder %s4699_s17, 3 }
   0x4   : > { %p350_p2 = pnand %p3824_p0, %p349_p1 }
   0x6   : > { %353 = sbr.rel (%p350_p2) target bundleno = 1152 (0x480), region = 64 }
   0xb   : > { %v460_v0 = vld [vmem:[%s6667_s2] sm:$0xf]  ;;  %vm517_vm0 = vcmask 1043456   ;;  %s3825_s21 = sshll.u32 %s3820_s18, 4  ;;  %v4701_v1 = vmov 2   ;;  %v4702_v2 = vmov 5  }
   0xc   : > { %4038 = vmatprep.subr.msk.mxu0 %vm517_vm0, %v460_v0  ;;  %p395_p3 = scmp.lt.s32.totalorder %s3825_s21, 31  ;;  %4178 = vset.pattern.permute.xlu1 %v4701_v1  ;;  %vm468_vm1 = vcmask 31744   ;;  %v4703_v22 = vmov 0   ;;  %v4704_v30 = vmov 1   ;;  %v4705_v43 = vmov 4   ;;  %v1965_v57 = vld [vmem:[%s6669_s4 + $0x18] sm:$0xff] }
   0xd   : > { %4039 = vmatpush3.msk.msra.mxu0 %vm517_vm0, %v460_v0  ;;  %4220 = vset.pattern.permute.xlu0 %v4702_v2  ;;  %v4706_v44 = vmov 7   ;;  %v4707_v47 = vmov 6   ;;  %v4708_v48 = vmov 3   ;;  %v1964_v58 = vld [vmem:[%s6669_s4 + $0x10] sm:$0xff]  ;;  %v1963_v59 = vld [vmem:[%s6669_s4 + $0x8] sm:$0xff]  ;;  %v1962_v60 = vld [vmem:[%s6669_s4] sm:$0xff] }
   0xe   : > { %s7132_s21 = smov (!%p395_p3, %s3825_s21), 31  ;;  %4064 = vmatprep.subr.mxu1 %v1965_v57  ;;  %vm1973_vm2 = vcmask 261120   ;;  %vm3086_vm3 = vcmask 130048   ;;  %s4709_s14 = smov 96   ;;  %vm3650_vm4 = vcmask 1041409   ;;  %vm3652_vm5 = vcmask 1042434  }
   0xf   : > { %s3828_s22 = sshll.u32 %s7132_s21, 3  ;;  %s3826_s23 = sshll.u32 %s7132_s21, 2  ;;  %4065 = vmatpush3.msra.mxu1 %v1965_v57  ;;  %vm3654_vm6 = vcmask 1043459   ;;  %vm3656_vm7 = vcmask 1044484   ;;  %vm3658_vm8 = vcmask 1045509   ;;  %vm3660_vm9 = vcmask 1046534  }
  0x10   : > { %s4790_s26 = scalar_lea.vmem %s6666_s1, %s3828_s22  ;;  %s4795_s29 = scalar_lea.vmem %s6665_s0, %s3826_s23  ;;  %4066 = vmatprep.subr.mxu1 %v1964_v58  ;;  %vm3662_vm10 = vcmask 1047559  }
  0x11   : > { %v4798_v3 = vld [vmem:[%s4790_s26] sm:$0xff]  ;;  %v445_v4 = vld [vmem:[%s4790_s26 + $0x8] sm:$0xff]  ;;  %v446_v5 = vld [vmem:[%s4790_s26 + $0x10] sm:$0xff]  ;;  %4067 = vmatpush3.msra.mxu1 %v1964_v58  ;;  %s3829_s25 = sshll.u32 %s3820_s18, 1 }
  0x12   : > { %4040 = vmatprep.mubr.msk.f32.mxu0 %vm468_vm1, %v4798_v3  ;;  %v3922_v6 = vld [vmem:[%s4795_s29] sm:$0xff]   ;;  %v3953_v9 = vld [vmem:[%s4795_s29 + $0x8] sm:$0xff]   ;;  %v447_v10 = vld [vmem:[%s4790_s26 + $0x18] sm:$0xff]  ;;  %4068 = vmatprep.subr.mxu1 %v1963_v59  ;;  %p407_p4 = scmp.lt.s32.totalorder %s3829_s25, 3 }
  0x13   : > { %4041 = vmatmul.mubr.msk.f32.vlgmr.msra.gmra.mxu0 %vm468_vm1, %v445_v4  ;;  %v3923_v7 = vunpack.c.l.bf16 %v3922_v6  ;;  %v3924_v8 = vunpack.c.h.bf16 %v3922_v6  ;;  %v3927_v11 = vunpack.c.l.bf16 %v3953_v9  ;;  %v3928_v12 = vunpack.c.h.bf16 %v3953_v9  ;;  %v448_v14 = vld [vmem:[%s4790_s26 + $0x20] sm:$0xff]  ;;  %v3954_v15 = vld [vmem:[%s4795_s29 + $0x10] sm:$0xff]   ;;  %v449_v18 = vld [vmem:[%s4790_s26 + $0x28] sm:$0xff]  ;;  %4069 = vmatpush3.msra.mxu1 %v1963_v59 }
  0x14   : > { %4043 = vmatprep.mubr.msk.f32.mxu0 %vm468_vm1, %v446_v5  ;;  %v3931_v16 = vunpack.c.l.bf16 %v3954_v15  ;;  %v3932_v17 = vunpack.c.h.bf16 %v3954_v15  ;;  %v450_v20 = vld [vmem:[%s4790_s26 + $0x30] sm:$0xff]  ;;  %v3957_v23 = vld [vmem:[%s4795_s29 + $0x28] sm:$0xff]   ;;  %v451_v24 = vld [vmem:[%s4790_s26 + $0x38] sm:$0xff]  ;;  %4070 = vmatprep.subr.mxu1 %v1962_v60  ;;  %s7134_s25 = smov (!%p407_p4, %s3829_s25), 3 }
  0x15   : > { %v4809_v13 = vpack.i.bf16 %v3924_v8, %v3923_v7  ;;  %v4817_v19 = vpack.i.bf16 %v3928_v12, %v3927_v11  ;;  %v452_v25 = vld [vmem:[%s4790_s26 + $0x40] sm:$0xff]  ;;  %v3955_v26 = vld [vmem:[%s4795_s29 + $0x18] sm:$0xff]   ;;  %v3943_v27 = vunpack.c.l.bf16 %v3957_v23  ;;  %v3944_v28 = vunpack.c.h.bf16 %v3957_v23  ;;  %v453_v31 = vld [vmem:[%s4790_s26 + $0x48] sm:$0xff]  ;;  %4071 = vmatpush3.msra.mxu1 %v1962_v60  ;;  %s3830_s27 = sshll.u32 %s7134_s25, 3 }
  0x16   : > { %v4821_v21 = vpack.i.bf16 %v3932_v17, %v3931_v16  ;;  %v3956_v29 = vld [vmem:[%s4795_s29 + $0x20] sm:$0xff]   ;;  %v3935_v32 = vunpack.c.l.bf16 %v3955_v26  ;;  %v3936_v33 = vunpack.c.h.bf16 %v3955_v26  ;;  %v454_v34 = vld [vmem:[%s4790_s26 + $0x50] sm:$0xff]  ;;  %v455_v40 = vld [vmem:[%s4790_s26 + $0x58] sm:$0xff] }
  0x17   : > { %4180 = vperm.xlu1 %4178, %v4809_v13   ;;  %4044 = vmatmul.mubr.msk.f32.gmra.mxu0 %vm468_vm1, %v447_v10  ;;  %v3939_v35 = vunpack.c.l.bf16 %v3956_v29  ;;  %v3940_v36 = vunpack.c.h.bf16 %v3956_v29  ;;  %v4840_v37 = vpack.i.bf16 %v3944_v28, %v3943_v27  ;;  %v456_v41 = vld [vmem:[%s4790_s26 + $0x60] sm:$0xff]  ;;  %v457_v42 = vld [vmem:[%s4790_s26 + $0x68] sm:$0xff]  ;;  %v458_v45 = vld [vmem:[%s4790_s26 + $0x70] sm:$0xff] }
  0x18   : > { %4046 = vmatprep.mubr.msk.f32.mxu0 %vm468_vm1, %v448_v14  ;;  %4222 = vperm.xlu0 %4220, %v4809_v13   ;;  %v4843_v38 = vpack.i.bf16 %v3936_v33, %v3935_v32  ;;  %v459_v46 = vld [vmem:[%s4790_s26 + $0x78] sm:$0xff]  ;;  %v3958_v49 = vld [vmem:[%s4795_s29 + $0x30] sm:$0xff]  }
  0x19   : > { %v4846_v39 = vpack.i.bf16 %v3940_v36, %v3939_v35  ;;  %v3947_v50 = vunpack.c.l.bf16 %v3958_v49  ;;  %v3948_v51 = vunpack.c.h.bf16 %v3958_v49  ;;  %v3959_v53 = vld [vmem:[%s4795_s29 + $0x38] sm:$0xff]   ;;  %v5050_v36 = vld [vmem:[%s6668_s3] ss:$0 sm:$0xff] }
  0x1a   : > { %v3951_v54 = vunpack.c.l.bf16 %v3959_v53  ;;  %v3952_v55 = vunpack.c.h.bf16 %v3959_v53 }
  0x1b   : > { %4184 = vset.pattern.permute.xlu1 %v4703_v22  ;;  %4047 = vmatmul.mubr.msk.f32.gmra.mxu0 %vm468_vm1, %v449_v18  ;;  %v4888_v52 = vpack.i.bf16 %v3948_v51, %v3947_v50 }
  0x1c   : > { %4186 = vperm.xlu1 %4184, %v4817_v19   ;;  %4049 = vmatprep.mubr.msk.f32.mxu0 %vm468_vm1, %v450_v20  ;;  %v4903_v56 = vpack.i.bf16 %v3952_v55, %v3951_v54 }
  0x1d   : > { %4287 = vperm.xlu0 %4220, %v4821_v21  }
  0x1f   : > { %4050 = vmatmul.mubr.msk.f32.gmra.mxu0 %vm468_vm1, %v451_v24 }
  0x20   : > { %4190 = vset.pattern.permute.xlu1 %v4704_v30  ;;  %4052 = vmatprep.mubr.msk.f32.mxu0 %vm468_vm1, %v452_v25 }
  0x21   : > { %4192 = vperm.xlu1 %4190, %v4817_v19   ;;  %4291 = vset.pattern.permute.xlu0 %v4704_v30 }
  0x22   : > { %4293 = vperm.xlu0 %4291, %v4809_v13  }
  0x23   : > { %4053 = vmatmul.mubr.msk.f32.gmra.mxu0 %vm468_vm1, %v453_v31 }
  0x24   : > { %4055 = vmatprep.mubr.msk.f32.mxu0 %vm468_vm1, %v454_v34 }
  0x25   : > { %4196 = vset.pattern.permute.xlu1 %v4701_v1 }
  0x26   : > { %4198 = vperm.xlu1 %4196, %v4817_v19   ;;  %4322 = vperm.xlu0 %4291, %v4840_v37  }
  0x27   : > { %4056 = vmatmul.mubr.msk.f32.gmra.mxu0 %vm468_vm1, %v455_v40 }
  0x28   : > { %4058 = vmatprep.mubr.msk.f32.mxu0 %vm468_vm1, %v456_v41 }
  0x2a   : > { %4202 = vset.pattern.permute.xlu1 %v4705_v43  ;;  %4338 = vset.pattern.permute.xlu0 %v4706_v44 }
  0x2b   : > { %4204 = vperm.xlu1 %4202, %v4809_v13   ;;  %4340 = vperm.xlu0 %4338, %v4821_v21  }
  0x2c   : > { %4059 = vmatmul.mubr.msk.f32.gmra.mxu0 %vm468_vm1, %v457_v42 }
  0x2d   : > { %4061 = vmatprep.mubr.msk.f32.mxu0 %vm468_vm1, %v458_v45 }
  0x2f   : > { %4208 = vset.pattern.permute.xlu1 %v4704_v30  ;;  %4344 = vset.pattern.permute.xlu0 %v4707_v47 }
  0x30   : > { %4210 = vperm.xlu1 %4208, %v4821_v21   ;;  %4346 = vperm.xlu0 %4344, %v4809_v13  }
  0x31   : > { %4062 = vmatmul.mubr.msk.f32.gmra.mxu0 %vm468_vm1, %v459_v46 }
  0x32   : > { %4098 = vmatprep.mubr.msk.f32.mxu0 %vm468_vm1, %v4798_v3 }
  0x34   : > { %4214 = vset.pattern.permute.xlu1 %v4708_v48  ;;  %4363 = vperm.xlu0 %4344, %v4843_v38  }
  0x35   : > { %4216 = vperm.xlu1 %4214, %v4817_v19  }
  0x38   : > { %4367 = vset.pattern.permute.xlu0 %v4708_v48 }
  0x39   : > { %4226 = vset.pattern.permute.xlu1 %v4701_v1  ;;  %4369 = vperm.xlu0 %4367, %v4809_v13  }
  0x3a   : > { %4228 = vperm.xlu1 %4226, %v4821_v21  }
  0x3d   : > { %4374 = vperm.xlu0 %4367, %v4821_v21  }
  0x3e   : > { %4232 = vset.pattern.permute.xlu1 %v4705_v43 }
  0x3f   : > { %4234 = vperm.xlu1 %4232, %v4817_v19  }
  0x41   : > { %4391 = vperm.xlu0 %4367, %v4840_v37  }
  0x43   : > { %4238 = vset.pattern.permute.xlu1 %v4703_v22 }
  0x44   : > { %4240 = vperm.xlu1 %4238, %v4843_v38  }
  0x45   : > { %4395 = vset.pattern.permute.xlu0 %v4701_v1 }
  0x46   : > { %4397 = vperm.xlu0 %4395, %v4843_v38  }
  0x48   : > { %4244 = vset.pattern.permute.xlu1 %v4704_v30 }
  0x49   : > { %4246 = vperm.xlu1 %4244, %v4843_v38  }
  0x4a   : > { %4414 = vperm.xlu0 %4395, %v4888_v52  }
  0x4d   : > { %4250 = vset.pattern.permute.xlu1 %v4702_v2 }
  0x4e   : > { %4252 = vperm.xlu1 %4250, %v4817_v19   ;;  %4418 = vset.pattern.permute.xlu0 %v4703_v22 }
  0x4f   : > { %4420 = vperm.xlu0 %4418, %v4809_v13  }
  0x52   : > { %4256 = vset.pattern.permute.xlu1 %v4706_v44 }
  0x53   : > { %4258 = vperm.xlu1 %4256, %v4809_v13   ;;  %4425 = vperm.xlu0 %4418, %v4821_v21  }
  0x57   : > { %4262 = vset.pattern.permute.xlu1 %v4705_v43  ;;  %4430 = vperm.xlu0 %4418, %v4846_v39  }
  0x58   : > { %4264 = vperm.xlu1 %4262, %v4821_v21  }
  0x5b   : > { %4447 = vperm.xlu0 %4418, %v4903_v56  }
  0x5c   : > { %4268 = vset.pattern.permute.xlu1 %v4707_v47 }
  0x5d   : > { %4270 = vperm.xlu1 %4268, %v4817_v19  }
  0x5f   : > { %4451 = vset.pattern.permute.xlu0 %v4705_v43 }
  0x60   : > { %4453 = vperm.xlu0 %4451, %v4843_v38  }
  0x61   : > { %4274 = vset.pattern.permute.xlu1 %v4704_v30 }
  0x62   : > { %4276 = vperm.xlu1 %4274, %v4846_v39  }
  0x64   : > { %4482 = vperm.xlu0 %4451, %v4888_v52  }
  0x66   : > { %4280 = vset.pattern.permute.xlu1 %v4708_v48 }
  0x67   : > { %4282 = vperm.xlu1 %4280, %v4843_v38  }
  0x68   : > { %4486 = vset.pattern.permute.xlu0 %v4702_v2 }
  0x69   : > { %4488 = vperm.xlu0 %4486, %v4840_v37  }
  0x6b   : > { %4297 = vset.pattern.permute.xlu1 %v4706_v44 }
  0x6c   : > { %4299 = vperm.xlu1 %4297, %v4817_v19  }
  0x6d   : > { %4505 = vperm.xlu0 %4486, %v4888_v52  }
  0x70   : > { %4303 = vset.pattern.permute.xlu1 %v4701_v1 }
  0x71   : > { %4305 = vperm.xlu1 %4303, %v4846_v39   ;;  %4521 = vset.pattern.permute.xlu0 %v4707_v47 }
  0x72   : > { %4523 = vperm.xlu0 %4521, %v4888_v52  }
  0x75   : > { %4309 = vset.pattern.permute.xlu1 %v4707_v47 }
  0x76   : > { %4311 = vperm.xlu1 %4309, %v4821_v21   ;;  %4540 = vperm.xlu0 %4521, %v4903_v56   ;;  %v746_v21 = vlaneseq }
  0x78   : > { %v747_v23 = vshrl.u32 %v746_v21, 7 }
  0x7a   : > { %4315 = vset.pattern.permute.xlu1 %v4703_v22  ;;  %4549 = vset.pattern.permute.xlu0 %v4706_v44  ;;  %v5029_v26 = vsub.s32 0, %v747_v23  ;;  %v5033_v28 = vsub.s32 1, %v747_v23  ;;  %v5035_v29 = vsub.s32 2, %v747_v23  ;;  %v5039_v31 = vsub.s32 3, %v747_v23 }
  0x7b   : > { %4317 = vperm.xlu1 %4315, %v4840_v37   ;;  %v5041_v32 = vsub.s32 5, %v747_v23  ;;  %v5043_v33 = vsub.s32 6, %v747_v23 }
  0x7f   : > { %4326 = vset.pattern.permute.xlu1 %v4708_v48 }
  0x80   : > { %4328 = vperm.xlu1 %4326, %v4846_v39  }
  0x84   : > { %4332 = vset.pattern.permute.xlu1 %v4702_v2 }
  0x85   : > { %4334 = vperm.xlu1 %4332, %v4843_v38  }
  0x89   : > { %4350 = vset.pattern.permute.xlu1 %v4701_v1 }
  0x8a   : > { %4352 = vperm.xlu1 %4350, %v4840_v37  }
  0x8e   : > { %4356 = vset.pattern.permute.xlu1 %v4705_v43 }
  0x8f   : > { %4358 = vperm.xlu1 %4356, %v4846_v39  }
  0x92   : > { %v4951_v61 = vpop.permute.xlu1 %4180 }
  0x93   : > { %6808 = vst [vmem:[#allocation2_spill] sm:$0xff] %v4951_v61  ;;  %4378 = vset.pattern.permute.xlu1 %v4703_v22  ;;  %v4955_v62 = vpop.permute.xlu0 %4222  ;;  %v6690_v34 = vunpack.i.h.bf16 %v4951_v61 }
  0x94   : > { %4380 = vperm.xlu1 %4378, %v4888_v52  }
  0x97   : > { %v4957_v63 = vpop.permute.xlu1 %4186 }
  0x98   : > { %6809 = vst [vmem:[#allocation3_spill] sm:$0xff] %v4957_v63  ;;  %4384 = vset.pattern.permute.xlu1 %v4704_v30  ;;  %v4961_v0 = vpop.permute.xlu0 %4287  ;;  %v6682_v40 = vunpack.i.h.bf16 %v4957_v63 }
  0x99   : > { %4386 = vperm.xlu1 %4384, %v4888_v52   ;;  %6810 = vst [vmem:[#allocation4_spill] sm:$0xff] %v4961_v0 }
  0x9c   : > { %v4963_v3 = vpop.permute.xlu1 %4192 }
  0x9d   : > { %6811 = vst [vmem:[#allocation5_spill] sm:$0xff] %v4963_v3  ;;  %4401 = vset.pattern.permute.xlu1 %v4702_v2  ;;  %v4967_v4 = vpop.permute.xlu0 %4293  ;;  %v6681_v45 = vunpack.i.h.bf16 %v4963_v3 }
  0x9e   : > { %4403 = vperm.xlu1 %4401, %v4846_v39   ;;  %6812 = vst [vmem:[#allocation6_spill] sm:$0xff] %v4967_v4  ;;  %v6678_v50 = vunpack.i.h.bf16 %v4967_v4  ;;  %v6680_v51 = vunpack.i.l.bf16 %v4967_v4 }
  0xa1   : > { %v4969_v5 = vpop.permute.xlu1 %4198  ;;  %v4975_v7 = vpop.permute.xlu0 %4322 }
  0xa2   : > { %6813 = vst [vmem:[#allocation7_spill] sm:$0xff] %v4969_v5  ;;  %4407 = vset.pattern.permute.xlu1 %v4706_v44  ;;  %6814 = vst [vmem:[#allocation8_spill] sm:$0xff] %v4975_v7 }
  0xa3   : > { %4409 = vperm.xlu1 %4407, %v4843_v38  }
  0xa6   : > { %v4973_v6 = vpop.permute.xlu1 %4204  ;;  %v4982_v9 = vpop.permute.xlu0 %4340 }
  0xa7   : > { %4434 = vset.pattern.permute.xlu1 %v4705_v43  ;;  %6815 = vst [vmem:[#allocation9_spill] sm:$0xff] %v4982_v9 }
  0xa8   : > { %4436 = vperm.xlu1 %4434, %v4840_v37  }
  0xab   : > { %v4979_v8 = vpop.permute.xlu1 %4210  ;;  %v4989_v11 = vpop.permute.xlu0 %4346 }
  0xac   : > { %4440 = vset.pattern.permute.xlu1 %v4707_v47 }
  0xad   : > { %4442 = vperm.xlu1 %4440, %v4846_v39  }
  0xaf   : > { %v4995_v13 = vpop.permute.xlu0 %4363 }
  0xb0   : > { %v4985_v10 = vpop.permute.xlu1 %4216  ;;  %6816 = vst [vmem:[#allocation10_spill] sm:$0xff] %v4995_v13 }
  0xb1   : > { %4457 = vset.pattern.permute.xlu1 %v4704_v30  ;;  %v5037_v30 = vsub.s32 4, %v747_v23 }
  0xb2   : > { %4459 = vperm.xlu1 %4457, %v4903_v56  }
  0xb4   : > { %v5001_v15 = vpop.permute.xlu0 %4369 }
  0xb5   : > { %v4991_v12 = vpop.permute.xlu1 %4228  ;;  %6818 = vst [vmem:[#allocation12_spill] sm:$0xff] %v5001_v15 }
  0xb6   : > { %4463 = vset.pattern.permute.xlu1 %v4708_v48 }
  0xb7   : > { %4465 = vperm.xlu1 %4463, %v4888_v52  }
  0xb8   : > { %v5009_v18 = vpop.permute.xlu0 %4374 }
  0xb9   : > { %6821 = vst [vmem:[#allocation15_spill] sm:$0xff] %v5009_v18 }
  0xba   : > { %v4997_v14 = vpop.permute.xlu1 %4234 }
  0xbb   : > { %6817 = vst [vmem:[#allocation11_spill] sm:$0xff] %v4997_v14  ;;  %4469 = vset.pattern.permute.xlu1 %v4706_v44 }
  0xbc   : > { %4471 = vperm.xlu1 %4469, %v4846_v39   ;;  %v5015_v20 = vpop.permute.xlu0 %4391  ;;  %v5054_v39 = vsub.s32 7, %v747_v23 }
  0xbd   : > { %6823 = vst [vmem:[#allocation17_spill] sm:$0xff] %v5015_v20 }
  0xbf   : > { %v5003_v16 = vpop.permute.xlu1 %4240 }
  0xc0   : > { %6819 = vst [vmem:[#allocation13_spill] sm:$0xff] %v5003_v16  ;;  %4475 = vset.pattern.permute.xlu1 %v4701_v1 }
  0xc1   : > { %4477 = vperm.xlu1 %4475, %v4903_v56   ;;  %v5022_v22 = vpop.permute.xlu0 %4397 }
  0xc2   : > { %6824 = vst [vmem:[#allocation18_spill] sm:$0xff] %v5022_v22 }
  0xc4   : > { %v5007_v17 = vpop.permute.xlu1 %4246 }
  0xc5   : > { %6820 = vst [vmem:[#allocation14_spill] sm:$0xff] %v5007_v17  ;;  %4492 = vset.pattern.permute.xlu1 %v4707_v47  ;;  %v5031_v27 = vpop.permute.xlu0 %4414 }
  0xc6   : > { %4494 = vperm.xlu1 %4492, %v4840_v37   ;;  %6826 = vst [vmem:[#allocation20_spill] sm:$0xff] %v5031_v27  ;;  %v6832_v27 = vunpack.i.l.bf16 %v4951_v61 }
  0xc9   : > { %v5013_v19 = vpop.permute.xlu1 %4252 }
  0xca   : > { %6822 = vst [vmem:[#allocation16_spill] sm:$0xff] %v5013_v19  ;;  %4498 = vset.pattern.permute.xlu1 %v4708_v48  ;;  %v5076_v58 = vpop.permute.xlu0 %4420 }
  0xcb   : > { %4500 = vperm.xlu1 %4498, %v4903_v56   ;;  %6828 = vst [vmem:[#allocation22_spill] sm:$0xff] %v5076_v58  ;;  %v6679_v60 = vunpack.i.l.bf16 %v5076_v58 }
  0xce   : > { %v5019_v1 = vpop.permute.xlu1 %4258 }
  0xcf   : > { %4509 = vset.pattern.permute.xlu1 %v4706_v44 }
  0xd0   : > { %4511 = vperm.xlu1 %4509, %v4840_v37  }
  0xd3   : > { %v5025_v24 = vpop.permute.xlu1 %4264  ;;  %v4042_v25 = vpop.f32.mrf.mxu0 }
  0xd4   : > { %6825 = vst [vmem:[#allocation19_spill] sm:$0xff] %v5025_v24  ;;  %4515 = vset.pattern.permute.xlu1 %v4705_v43  ;;  %v5070_v53 = vadd.f32 %v4042_v25, %v5050_v36 }
  0xd5   : > { %4517 = vperm.xlu1 %4515, %v4903_v56   ;;  %v587_v37 = vpop.f32.mrf.mxu0 }
  0xd6   : > { %v5082_v25 = vadd.f32 %v5050_v36, %v587_v37  ;;  %v753_v21 = vrot.slane %v5070_v53, %v5029_v26  ;;  %v897_v23 = vrot.slane %v5070_v53, %v5033_v28  ;;  %v6677_v37 = vunpack.i.h.bf16 %v5076_v58 }
  0xd7   : > { %v4045_v59 = vpop.f32.mrf.mxu0  ;;  %v1217_v35 = vrot.slane %v5070_v53, %v5039_v31 }
  0xd8   : > { %v5052_v38 = vpop.permute.xlu1 %4270  ;;  %v5097_v55 = vadd.f32 %v4045_v59, %v5050_v36  ;;  %v749_v41 = vrot.slane %v5082_v25, %v5029_v26  ;;  %v893_v59 = vrot.slane %v5082_v25, %v5033_v28  ;;  %v811_v46 = vmul.f32 %v6677_v37, %v753_v21 }
  0xd9   : > { %6827 = vst [vmem:[#allocation21_spill] sm:$0xff] %v5052_v38  ;;  %4527 = vset.pattern.permute.xlu1 %v4702_v2  ;;  %v597_v47 = vpop.f32.mrf.mxu0  ;;  %v955_v54 = vmul.f32 %v6678_v50, %v897_v23  ;;  %v1057_v23 = vrot.slane %v5070_v53, %v5035_v29  ;;  %v1053_v42 = vrot.slane %v5082_v25, %v5035_v29 }
  0xda   : > { %4529 = vperm.xlu1 %4527, %v4903_v56   ;;  %v761_v2 = vrot.slane %v5097_v55, %v5029_v26  ;;  %v810_v50 = vmul.f32 %v6679_v60, %v749_v41  ;;  %v1213_v57 = vrot.slane %v5082_v25, %v5039_v31 }
  0xdb   : > { %v4048_v21 = vpop.f32.mrf.mxu0  ;;  %v971_v37 = vadd.f32 %v955_v54, %v811_v46  ;;  %v5157_v46 = vadd.f32 %v5050_v36, %v597_v47  ;;  %v6831_v47 = vunpack.i.h.bf16 %v5001_v15  ;;  %v1114_v20 = vmul.f32 %v6832_v27, %v1053_v42 }
  0xdc   : > { %v813_v43 = vmul.f32 %v6682_v40, %v761_v2  ;;  %v5147_v60 = vadd.f32 %v4048_v21, %v5050_v36  ;;  %v1065_v40 = vrot.slane %v5097_v55, %v5035_v29  ;;  %v6835_v42 = vunpack.i.h.bf16 %v4973_v6 }
  0xdd   : > { %v5084_v48 = vpop.permute.xlu1 %4276  ;;  %v607_v54 = vpop.f32.mrf.mxu0  ;;  %v1275_v58 = vmul.f32 %v6831_v47, %v1217_v35  ;;  %v757_v35 = vrot.slane %v5157_v46, %v5029_v26  ;;  %v901_v47 = vrot.slane %v5157_v46, %v5033_v28  ;;  %v1061_v61 = vrot.slane %v5157_v46, %v5035_v29 }
  0xde   : > { %6829 = vst [vmem:[#allocation23_spill] sm:$0xff] %v5084_v48  ;;  %4533 = vset.pattern.permute.xlu1 %v4706_v44  ;;  %v913_v49 = vrot.slane %v5147_v60, %v5033_v28  ;;  %v1541_v22 = vrot.slane %v5157_v46, %v5041_v32 }
  0xdf   : > { %4535 = vperm.xlu1 %4533, %v4888_v52   ;;  %v905_v52 = vrot.slane %v5097_v55, %v5033_v28  ;;  %v4051_v4 = vpop.f32.mrf.mxu0 }
  0xe1   : > { %v957_v41 = vmul.f32 %v6681_v45, %v905_v52  ;;  %v1377_v52 = vrot.slane %v5070_v53, %v5037_v30  ;;  %v1115_v45 = vmul.f32 %v6690_v34, %v1057_v23  ;;  %v769_v23 = vrot.slane %v5147_v60, %v5029_v26  ;;  %v617_v7 = vpop.f32.mrf.mxu0 }
  0xe2   : > { %v5114_v44 = vpop.permute.xlu1 %4282 }
  0xe3   : > { %6830 = vst [vmem:[#allocation24_spill] sm:$0xff] %v5114_v44  ;;  %4545 = vperm.xlu1 %4533, %v4903_v56   ;;  %v954_v56 = vmul.f32 %v6680_v51, %v893_v59  ;;  %v5149_v59 = vpop.permute.xlu0 %4425  ;;  %v1131_v48 = vadd.f32 %v1115_v45, %v971_v37  ;;  %v1225_v45 = vrot.slane %v5097_v55, %v5039_v31  ;;  %v6840_v44 = vunpack.i.l.bf16 %v4963_v3 }
  0xe5   : > { %v970_v21 = vadd.f32 %v954_v56, %v810_v50  ;;  %v973_v50 = vadd.f32 %v957_v41, %v813_v43  ;;  %v6833_v56 = vunpack.i.l.bf16 %v5001_v15  ;;  %v1435_v43 = vmul.f32 %v6835_v42, %v1377_v52 }
  0xe6   : > { %v1385_v41 = vrot.slane %v5097_v55, %v5037_v30  ;;  %v1545_v52 = vrot.slane %v5097_v55, %v5041_v32  ;;  %v6837_v42 = vunpack.i.h.bf16 %v5149_v59  ;;  %v6839_v15 = vunpack.i.l.bf16 %v4957_v63 }
  0xe7   : > { %v5151_v51 = vpop.permute.xlu1 %4299  ;;  %v1274_v34 = vmul.f32 %v6833_v56, %v1213_v57  ;;  %v1130_v27 = vadd.f32 %v1114_v20, %v970_v21  ;;  %v6836_v57 = vunpack.i.h.bf16 %v4969_v5  ;;  %v1291_v20 = vadd.f32 %v1275_v58, %v1131_v48 }
  0xe8   : > { %v1221_v56 = vrot.slane %v5157_v46, %v5039_v31  ;;  %v812_v13 = vmul.f32 %v6839_v15, %v757_v35  ;;  %v956_v48 = vmul.f32 %v6840_v44, %v901_v47  ;;  %v1381_v15 = vrot.slane %v5157_v46, %v5037_v30 }
  0xe9   : > { %v1117_v37 = vmul.f32 %v6836_v57, %v1065_v40  ;;  %v6838_v40 = vunpack.i.h.bf16 %v4979_v8  ;;  %v1290_v58 = vadd.f32 %v1274_v34, %v1130_v27  ;;  %v6843_v34 = vunpack.i.l.bf16 %v4969_v5 }
  0xea   : > { %v972_v35 = vadd.f32 %v956_v48, %v812_v13  ;;  %v6844_v27 = vunpack.i.h.bf16 %v4997_v14  ;;  %v6845_v13 = vunpack.i.l.bf16 %v4985_v10  ;;  %v1451_v5 = vadd.f32 %v1435_v43, %v1291_v20 }
  0xeb   : > { %v1133_v21 = vadd.f32 %v1117_v37, %v973_v50  ;;  %v959_v57 = vmul.f32 %v6838_v40, %v913_v49  ;;  %v1705_v50 = vrot.slane %v5097_v55, %v5043_v33  ;;  %v6841_v37 = vunpack.i.h.bf16 %v4985_v10 }
  0xec   : > { %v5183_v2 = vpop.permute.xlu1 %4305  ;;  %v1073_v49 = vrot.slane %v5147_v60, %v5035_v29  ;;  %v1233_v40 = vrot.slane %v5147_v60, %v5039_v31  ;;  %v1116_v44 = vmul.f32 %v6843_v34, %v1061_v61  ;;  %v1437_v3 = vmul.f32 %v6844_v27, %v1385_v41 }
  0xed   : > { %6834 = vst [vmem:[#allocation25_spill] sm:$0xff] %v5183_v2  ;;  %v815_v2 = vmul.f32 %v6837_v42, %v769_v23  ;;  %v1277_v23 = vmul.f32 %v6841_v37, %v1225_v45  ;;  %v5226_v45 = vadd.f32 %v4051_v4, %v5050_v36  ;;  %v5229_v37 = vadd.f32 %v5050_v36, %v617_v7 }
  0xee   : > { %v1132_v9 = vadd.f32 %v1116_v44, %v972_v35  ;;  %v1276_v48 = vmul.f32 %v6845_v13, %v1221_v56  ;;  %v6846_v61 = vunpack.i.h.bf16 %v5052_v38  ;;  %v6847_v41 = vunpack.i.h.bf16 %v5013_v19 }
  0xef   : > { %v1293_v47 = vadd.f32 %v1277_v23, %v1133_v21  ;;  %v975_v63 = vadd.f32 %v959_v57, %v815_v2  ;;  %v5240_v4 = vadd.f32 %v5050_v36, %v607_v54  ;;  %v6848_v7 = vunpack.i.h.bf16 %v4991_v12 }
  0xf0   : > { %v1757_v21 = vmul.f32 %v6846_v61, %v1705_v50  ;;  %v1597_v23 = vmul.f32 %v6847_v41, %v1545_v52  ;;  %v6849_v57 = vunpack.i.h.bf16 %v5009_v18  ;;  %v1292_v35 = vadd.f32 %v1276_v48, %v1132_v9 }
  0xf1   : > { %v5215_v42 = vpop.permute.xlu1 %4311  ;;  %v1119_v2 = vmul.f32 %v6848_v7, %v1073_v49  ;;  %v6850_v44 = vunpack.i.l.bf16 %v4997_v14  ;;  %v1453_v20 = vadd.f32 %v1437_v3, %v1293_v47  ;;  %v773_v50 = vrot.slane %v5229_v37, %v5029_v26 }
  0xf2   : > { %6842 = vst [vmem:[#allocation26_spill] sm:$0xff] %v5215_v42  ;;  %v1279_v34 = vmul.f32 %v6849_v57, %v1233_v40  ;;  %v777_v54 = vrot.slane %v5226_v45, %v5029_v26  ;;  %v1701_v40 = vrot.slane %v5157_v46, %v5043_v33  ;;  %v6852_v27 = vunpack.i.l.bf16 %v5013_v19 }
  0xf3   : > { %v1436_v56 = vmul.f32 %v6850_v44, %v1381_v15  ;;  %v1135_v49 = vadd.f32 %v1119_v2, %v975_v63  ;;  %v1373_v13 = vrot.slane %v5082_v25, %v5037_v30  ;;  %v1533_v48 = vrot.slane %v5082_v25, %v5041_v32 }
  0xf4   : > { %v1596_v15 = vmul.f32 %v6852_v27, %v1541_v22  ;;  %v1861_v63 = vrot.slane %v5157_v46, %v5054_v39  ;;  %v1693_v22 = vrot.slane %v5082_v25, %v5043_v33  ;;  %v1613_v7 = vadd.f32 %v1597_v23, %v1453_v20 }
  0xf5   : > { %v1452_v9 = vadd.f32 %v1436_v56, %v1292_v35  ;;  %v6853_v2 = vunpack.i.l.bf16 %v4973_v6  ;;  %v6854_v35 = vunpack.i.l.bf16 %v4955_v62  ;;  %v1537_v56 = vrot.slane %v5070_v53, %v5041_v32 }
  0xf6   : > { %v5248_v43 = vpop.permute.xlu1 %4317  ;;  %v1865_v47 = vrot.slane %v5097_v55, %v5054_v39  ;;  %v1853_v23 = vrot.slane %v5082_v25, %v5054_v39  ;;  %v1697_v52 = vrot.slane %v5070_v53, %v5043_v33  ;;  %v6861_v19 = vunpack.i.l.bf16 %v5003_v16 }
  0xf7   : > { %6851 = vst [vmem:[#allocation27_spill] sm:$0xff] %v5248_v43  ;;  %v1612_v41 = vadd.f32 %v1596_v15, %v1452_v9  ;;  %v1434_v57 = vmul.f32 %v6853_v2, %v1373_v13  ;;  %v1594_v44 = vmul.f32 %v6854_v35, %v1533_v48  ;;  %v6856_v15 = vunpack.i.l.bf16 %v5052_v38 }
  0xf8   : > { %v6857_v13 = vunpack.i.l.bf16 %v4989_v11  ;;  %v6858_v2 = vunpack.i.h.bf16 %v4955_v62  ;;  %v1857_v38 = vrot.slane %v5070_v53, %v5054_v39  ;;  %v816_v14 = vmul.f32 %v6861_v19, %v773_v50 }
  0xf9   : > { %v1756_v3 = vmul.f32 %v6856_v15, %v1701_v40  ;;  %v1450_v20 = vadd.f32 %v1434_v57, %v1290_v58  ;;  %v6859_v40 = vunpack.i.l.bf16 %v5151_v51  ;;  %v1069_v19 = vrot.slane %v5240_v4, %v5035_v29 }
  0xfa   : > { %v1754_v48 = vmul.f32 %v6857_v13, %v1693_v22  ;;  %v1595_v35 = vmul.f32 %v6858_v2, %v1537_v56  ;;  %v6860_v22 = vunpack.i.h.bf16 %v4989_v11  ;;  %v765_v56 = vrot.slane %v5240_v4, %v5029_v26 }
  0xfb   : > { %v5279_v27 = vpop.permute.xlu1 %4328  ;;  %v1772_v61 = vadd.f32 %v1756_v3, %v1612_v41  ;;  %v1916_v15 = vmul.f32 %v6859_v40, %v1861_v63  ;;  %v1610_v58 = vadd.f32 %v1594_v44, %v1450_v20  ;;  %v1773_v2 = vadd.f32 %v1757_v21, %v1613_v7  ;;  %v5322_v7 = vpop.permute.xlu0 %4430 }
  0xfc   : > { %6855 = vst [vmem:[#allocation28_spill] sm:$0xff] %v5279_v27  ;;  %v1611_v57 = vadd.f32 %v1595_v35, %v1451_v5  ;;  %v1755_v13 = vmul.f32 %v6860_v22, %v1697_v52  ;;  %v6862_v3 = vunpack.i.h.bf16 %v5151_v51  ;;  %v6863_v63 = vunpack.i.l.bf16 %v5019_v1  ;;  %6866 = vst [vmem:[#allocation30_spill] sm:$0xff] %v5322_v7 }
  0xfd   : > { %v1770_v44 = vadd.f32 %v1754_v48, %v1610_v58  ;;  %v6865_v20 = vunpack.i.h.bf16 %v5019_v1  ;;  %v909_v35 = vrot.slane %v5240_v4, %v5033_v28  ;;  %v1932_v21 = vadd.f32 %v1916_v15, %v1772_v61 }
  0xfe   : > { %v1917_v41 = vmul.f32 %v6862_v3, %v1865_v47  ;;  %v1914_v40 = vmul.f32 %v6863_v63, %v1853_v23  ;;  %v1771_v5 = vadd.f32 %v1755_v13, %v1611_v57  ;;  %v1229_v50 = vrot.slane %v5240_v4, %v5039_v31 }
  0xff   : > { %v1915_v52 = vmul.f32 %v6865_v20, %v1857_v38  ;;  %v1553_v47 = vrot.slane %v5147_v60, %v5041_v32  ;;  %v6867_v58 = vunpack.i.l.bf16 %v5149_v59  ;;  %v1393_v57 = vrot.slane %v5147_v60, %v5037_v30 }
 0x100   : > { %v5310_v9 = vpop.permute.xlu1 %4334  ;;  %v1930_v23 = vadd.f32 %v1914_v40, %v1770_v44  ;;  %v1295_v61 = vadd.f32 %v1279_v34, %v1135_v49  ;;  %v6868_v15 = vunpack.i.h.bf16 %v5003_v16  ;;  %v1933_v13 = vadd.f32 %v1917_v41, %v1773_v2  ;;  %v6901_v16 = vld [vmem:[#allocation25_spill] sm:$0xff] }
 0x101   : > { %6864 = vst [vmem:[#allocation29_spill] sm:$0xff] %v5310_v9  ;;  %v1931_v48 = vadd.f32 %v1915_v52, %v1771_v5  ;;  %v814_v38 = vmul.f32 %v6867_v58, %v765_v56  ;;  %v1389_v3 = vrot.slane %v5240_v4, %v5037_v30  ;;  %v1713_v40 = vrot.slane %v5147_v60, %v5043_v33 }
 0x102   : > { %v817_v22 = vmul.f32 %v6868_v15, %v777_v54  ;;  %v1946_v63 = vadd.f32 %v1930_v23, %v5082_v25  ;;  %v6717_v44 = vunpack.i.h.bf16 %v5215_v42  ;;  %v6869_v56 = vunpack.i.l.bf16 %v4979_v8 }
 0x103   : > { %v1947_v34 = vadd.f32 %v1931_v48, %v5070_v53  ;;  %v6871_v54 = vunpack.i.l.bf16 %v5009_v18  ;;  %v1549_v2 = vrot.slane %v5240_v4, %v5041_v32  ;;  %v6872_v25 = vunpack.i.h.bf16 %v4961_v0 }
 0x104   : > { %v958_v5 = vmul.f32 %v6869_v56, %v909_v35  ;;  %4072 = vmatprep.mubr.msk.f32.mxu1 %vm1973_vm2, %v1946_v63  ;;  %v6873_v23 = vunpack.i.l.bf16 %v4991_v12  ;;  %v6874_v35 = vunpack.i.h.bf16 %v5025_v24  ;;  %v1948_v53 = vadd.f32 %v1932_v21, %v5157_v46  ;;  %v5368_v21 = vpop.permute.xlu0 %4447 }
 0x105   : > { %v5338_v20 = vpop.permute.xlu1 %4352  ;;  %v1278_v49 = vmul.f32 %v6871_v54, %v1229_v50  ;;  %v1599_v41 = vmul.f32 %v6872_v25, %v1553_v47  ;;  %v6875_v50 = vrot.slane %v5229_v37, %v5033_v28  ;;  %v6876_v48 = vunpack.i.l.bf16 %v5007_v17  ;;  %4073 = vmatmul.mubr.msk.f32.vlgmr.msra.gmra.mxu1 %vm1973_vm2, %v1947_v34  ;;  %6879 = vst [vmem:[#allocation32_spill] sm:$0xff] %v5368_v21 }
 0x106   : > { %6870 = vst [vmem:[#allocation31_spill] sm:$0xff] %v5338_v20  ;;  %v974_v52 = vadd.f32 %v958_v5, %v814_v38  ;;  %v1118_v58 = vmul.f32 %v6873_v23, %v1069_v19  ;;  %v1439_v15 = vmul.f32 %v6874_v35, %v1393_v57  ;;  %v6877_v47 = vrot.slane %v5226_v45, %v5033_v28  ;;  %v6880_v23 = vld [vmem:[#allocation9_spill] sm:$0xff] }
 0x107   : > { %v960_v56 = vmul.f32 %v6876_v48, %v6875_v50  ;;  %v6878_v63 = vunpack.i.h.bf16 %v5007_v17  ;;  %v1709_v19 = vrot.slane %v5240_v4, %v5043_v33  ;;  %v1873_v46 = vrot.slane %v5147_v60, %v5054_v39  ;;  %4075 = vmatprep.mubr.msk.f32.mxu1 %vm1973_vm2, %v1948_v53 }
 0x108   : > { %v1759_v57 = vmul.f32 %v6717_v44, %v1713_v40  ;;  %v6718_v5 = vunpack.i.l.bf16 %v5215_v42  ;;  %v1134_v54 = vadd.f32 %v1118_v58, %v974_v52  ;;  %v1455_v25 = vadd.f32 %v1439_v15, %v1295_v61  ;;  %v6885_v58 = vld [vmem:[#allocation18_spill] sm:$0xff] }
 0x109   : > { %v961_v38 = vmul.f32 %v6878_v63, %v6877_v47  ;;  %v6881_v34 = vunpack.i.l.bf16 %v4961_v0  ;;  %v1949_v48 = vadd.f32 %v1933_v13, %v5097_v55  ;;  %v1869_v63 = vrot.slane %v5240_v4, %v5054_v39 }
 0x10a   : > { %v5378_v47 = vpop.permute.xlu1 %4358  ;;  %v1294_v17 = vadd.f32 %v1278_v49, %v1134_v54  ;;  %v6883_v40 = vunpack.i.l.bf16 %v5025_v24  ;;  %v1615_v52 = vadd.f32 %v1599_v41, %v1455_v25  ;;  %v6884_v61 = vrot.slane %v5229_v37, %v5035_v29 }
 0x10b   : > { %v1598_v50 = vmul.f32 %v6881_v34, %v1549_v2  ;;  %6882 = vst [vmem:[#allocation33_spill] sm:$0xff] %v5378_v47  ;;  %v6886_v15 = vunpack.i.l.bf16 %v6885_v58  ;;  %v6887_v2 = vrot.slane %v5226_v45, %v5035_v29  ;;  %v6888_v55 = vunpack.i.h.bf16 %v6885_v58  ;;  %4076 = vmatmul.mubr.msk.f32.gmra.mxu1 %vm1973_vm2, %v1949_v48 }
 0x10c   : > { %v1438_v44 = vmul.f32 %v6883_v40, %v1389_v3  ;;  %v976_v34 = vadd.f32 %v960_v56, %v816_v14  ;;  %v6889_v35 = vunpack.i.h.bf16 %v6880_v23  ;;  %v977_v3 = vadd.f32 %v961_v38, %v817_v22  ;;  %v6890_v40 = vld [vmem:[#allocation24_spill] sm:$0xff]  ;;  %v5404_v14 = vpop.permute.xlu0 %4453 }
 0x10d   : > { %v1120_v53 = vmul.f32 %v6886_v15, %v6884_v61  ;;  %v1121_v13 = vmul.f32 %v6888_v55, %v6887_v2  ;;  %v1758_v54 = vmul.f32 %v6718_v5, %v1709_v19  ;;  %v1775_v25 = vadd.f32 %v1759_v57, %v1615_v52  ;;  %6891 = vst [vmem:[#allocation34_spill] sm:$0xff] %v5404_v14  ;;  %v4054_v57 = vpop.f32.mrf.mxu0 }
 0x10e   : > { %v1919_v49 = vmul.f32 %v6889_v35, %v1873_v46  ;;  %v1454_v41 = vadd.f32 %v1438_v44, %v1294_v17  ;;  %v6721_v61 = vunpack.i.h.bf16 %v6890_v40  ;;  %v1237_v15 = vrot.slane %v5229_v37, %v5039_v31 }
 0x10f   : > { %v1241_v2 = vrot.slane %v5226_v45, %v5039_v31  ;;  %v6892_v56 = vunpack.i.l.bf16 %v6880_v23  ;;  %v5408_v22 = vpop.permute.xlu1 %4380  ;;  %v6724_v44 = vunpack.i.l.bf16 %v6890_v40  ;;  %v1136_v38 = vadd.f32 %v1120_v53, %v976_v34 }
 0x110   : > { %v1614_v35 = vadd.f32 %v1598_v50, %v1454_v41  ;;  %6893 = vst [vmem:[#allocation35_spill] sm:$0xff] %v5408_v22  ;;  %v1935_v17 = vadd.f32 %v1919_v49, %v1775_v25  ;;  %v1137_v19 = vadd.f32 %v1121_v13, %v977_v3  ;;  %v1397_v52 = vrot.slane %v5229_v37, %v5037_v30 }
 0x111   : > { %v1918_v46 = vmul.f32 %v6892_v56, %v1869_v63  ;;  %v1401_v55 = vrot.slane %v5226_v45, %v5037_v30  ;;  %v6719_v5 = vunpack.i.h.bf16 %v5404_v14  ;;  %v6723_v63 = vunpack.i.l.bf16 %v5404_v14  ;;  %v627_v56 = vpop.f32.mrf.mxu0 }
 0x112   : > { %v1774_v48 = vadd.f32 %v1758_v54, %v1614_v35  ;;  %v1281_v50 = vmul.f32 %v6721_v61, %v1241_v2  ;;  %v1280_v49 = vmul.f32 %v6724_v44, %v1237_v15  ;;  %v1557_v13 = vrot.slane %v5229_v37, %v5041_v32  ;;  %v6898_v44 = vld [vmem:[#allocation23_spill] sm:$0xff] }
 0x113   : > { %v1951_v34 = vadd.f32 %v1935_v17, %v5147_v60  ;;  %v1561_v3 = vrot.slane %v5226_v45, %v5041_v32  ;;  %v6720_v41 = vunpack.i.h.bf16 %v5310_v9  ;;  %v6722_v54 = vunpack.i.l.bf16 %v5310_v9 }
 0x114   : > { %v1934_v53 = vadd.f32 %v1918_v46, %v1774_v48  ;;  %v5428_v25 = vpop.permute.xlu1 %4386  ;;  %v1296_v35 = vadd.f32 %v1280_v49, %v1136_v38  ;;  %v1297_v15 = vadd.f32 %v1281_v50, %v1137_v19  ;;  %v1441_v46 = vmul.f32 %v6719_v5, %v1401_v55  ;;  %v6895_v38 = vld [vmem:[#allocation10_spill] sm:$0xff]  ;;  %v4057_v50 = vpop.f32.mrf.mxu0 }
 0x115   : > { %6894 = vst [vmem:[#allocation36_spill] sm:$0xff] %v5428_v25  ;;  %v1440_v60 = vmul.f32 %v6723_v63, %v1397_v52  ;;  %v5437_v17 = vadd.f32 %v5050_v36, %v627_v56  ;;  %v1601_v48 = vmul.f32 %v6720_v41, %v1561_v3  ;;  %v6725_v19 = vunpack.i.h.bf16 %v6895_v38 }
 0x116   : > { %v1950_v2 = vadd.f32 %v1934_v53, %v5240_v4  ;;  %v1600_v4 = vmul.f32 %v6722_v54, %v1557_v13  ;;  %v6726_v55 = vunpack.i.l.bf16 %v6895_v38  ;;  %v5449_v52 = vadd.f32 %v4054_v57, %v5050_v36  ;;  %v637_v63 = vpop.f32.mrf.mxu0 }
 0x117   : > { %v1456_v53 = vadd.f32 %v1440_v60, %v1296_v35  ;;  %v1457_v56 = vadd.f32 %v1441_v46, %v1297_v15  ;;  %v1717_v3 = vrot.slane %v5229_v37, %v5043_v33  ;;  %v1721_v13 = vrot.slane %v5226_v45, %v5043_v33 }
 0x118   : > { %4078 = vmatprep.mubr.msk.f32.mxu1 %vm1973_vm2, %v1950_v2  ;;  %v6897_v2 = vld [vmem:[#allocation8_spill] sm:$0xff]  ;;  %v6734_v41 = vunpack.i.l.bf16 %v5322_v7  ;;  %v781_v61 = vrot.slane %v5437_v17, %v5029_v26  ;;  %v1877_v46 = vrot.slane %v5229_v37, %v5054_v39  ;;  %v1881_v60 = vrot.slane %v5226_v45, %v5054_v39 }
 0x119   : > { %4079 = vmatmul.mubr.msk.f32.gmra.mxu1 %vm1973_vm2, %v1951_v34  ;;  %v5446_v49 = vpop.permute.xlu1 %4403  ;;  %v1616_v54 = vadd.f32 %v1600_v4, %v1456_v53  ;;  %v1617_v57 = vadd.f32 %v1601_v48, %v1457_v56  ;;  %v1760_v35 = vmul.f32 %v6726_v55, %v1717_v3  ;;  %v1761_v15 = vmul.f32 %v6725_v19, %v1721_v13 }
 0x11a   : > { %6896 = vst [vmem:[#allocation37_spill] sm:$0xff] %v5446_v49  ;;  %v785_v48 = vrot.slane %v5449_v52, %v5029_v26  ;;  %v925_v56 = vrot.slane %v5437_v17, %v5033_v28  ;;  %v929_v3 = vrot.slane %v5449_v52, %v5033_v28  ;;  %v818_v55 = vmul.f32 %v6734_v41, %v781_v61 }
 0x11b   : > { %v1085_v34 = vrot.slane %v5437_v17, %v5035_v29  ;;  %v5486_v5 = vadd.f32 %v4057_v50, %v5050_v36  ;;  %v5489_v4 = vadd.f32 %v5050_v36, %v637_v63  ;;  %v1776_v9 = vadd.f32 %v1760_v35, %v1616_v54 }
 0x11c   : > { %v1777_v14 = vadd.f32 %v1761_v15, %v1617_v57  ;;  %v6900_v58 = vunpack.i.h.bf16 %v5322_v7  ;;  %v1089_v41 = vrot.slane %v5449_v52, %v5035_v29  ;;  %v6902_v63 = vunpack.i.l.bf16 %v6898_v44 }
 0x11d   : > { %v1097_v23 = vrot.slane %v5486_v5, %v5035_v29 }
 0x11e   : > { %v5473_v53 = vpop.permute.xlu1 %4409  ;;  %v819_v61 = vmul.f32 %v6900_v58, %v785_v48  ;;  %v962_v42 = vmul.f32 %v6902_v63, %v925_v56  ;;  %v789_v58 = vrot.slane %v5489_v4, %v5029_v26  ;;  %v793_v56 = vrot.slane %v5486_v5, %v5029_v26 }
 0x11f   : > { %6899 = vst [vmem:[#allocation38_spill] sm:$0xff] %v5473_v53  ;;  %v6740_v13 = vunpack.i.h.bf16 %v5473_v53  ;;  %v6741_v19 = vunpack.i.l.bf16 %v5473_v53  ;;  %v6906_v63 = vunpack.i.l.bf16 %v6901_v16 }
 0x121   : > { %v1921_v38 = vmul.f32 %v6740_v13, %v1881_v60  ;;  %v1920_v40 = vmul.f32 %v6741_v19, %v1877_v46  ;;  %v6903_v60 = vunpack.i.h.bf16 %v6898_v44  ;;  %v1245_v13 = vrot.slane %v5437_v17, %v5039_v31  ;;  %v6904_v19 = vld [vmem:[#allocation17_spill] sm:$0xff] }
 0x122   : > { %v978_v44 = vadd.f32 %v962_v42, %v818_v55  ;;  %v1122_v7 = vmul.f32 %v6906_v63, %v1085_v34  ;;  %v6909_v46 = vunpack.i.h.bf16 %v6897_v2  ;;  %v4060_v55 = vpop.f32.mrf.mxu0 }
 0x123   : > { %v963_v54 = vmul.f32 %v6903_v60, %v929_v3  ;;  %v1936_v57 = vadd.f32 %v1920_v40, %v1776_v9  ;;  %v1937_v35 = vadd.f32 %v1921_v38, %v1777_v14  ;;  %v5505_v15 = vpop.permute.xlu1 %4436  ;;  %v933_v3 = vrot.slane %v5489_v4, %v5033_v28 }
 0x124   : > { %v937_v9 = vrot.slane %v5486_v5, %v5033_v28  ;;  %v1249_v14 = vrot.slane %v5449_v52, %v5039_v31  ;;  %v6930_v24 = vunpack.i.l.bf16 %v5505_v15 }
 0x125   : > { %v1952_v40 = vadd.f32 %v1936_v57, %v5229_v37  ;;  %v1953_v60 = vadd.f32 %v1937_v35, %v5226_v45  ;;  %v6905_v37 = vunpack.i.h.bf16 %v6901_v16  ;;  %v979_v38 = vadd.f32 %v963_v54, %v819_v61 }
 0x126   : > { %v6908_v35 = vunpack.i.l.bf16 %v6897_v2  ;;  %v965_v50 = vmul.f32 %v6909_v46, %v937_v9  ;;  %v6912_v61 = vunpack.i.h.bf16 %v5279_v27  ;;  %v6913_v54 = vunpack.i.l.bf16 %v5279_v27 }
 0x127   : > { %4081 = vmatprep.mubr.msk.f32.mxu1 %vm1973_vm2, %v1952_v40  ;;  %v1123_v57 = vmul.f32 %v6905_v37, %v1089_v41  ;;  %v6910_v40 = vunpack.i.h.bf16 %v5248_v43  ;;  %v6911_v41 = vunpack.i.l.bf16 %v5248_v43  ;;  %v6914_v37 = vld [vmem:[#allocation20_spill] sm:$0xff]  ;;  %v6915_v9 = vunpack.i.h.bf16 %v5338_v20 }
 0x128   : > { %v5535_v45 = vpop.permute.xlu1 %4442  ;;  %4082 = vmatmul.mubr.msk.f32.gmra.mxu1 %vm1973_vm2, %v1953_v60  ;;  %v964_v48 = vmul.f32 %v6908_v35, %v933_v3  ;;  %v1283_v34 = vmul.f32 %v6912_v61, %v1249_v14  ;;  %v1282_v63 = vmul.f32 %v6913_v54, %v1245_v13  ;;  %v1093_v60 = vrot.slane %v5489_v4, %v5035_v29 }
 0x129   : > { %6907 = vst [vmem:[#allocation17_spill] sm:$0xff] %v5535_v45  ;;  %v821_v53 = vmul.f32 %v6910_v40, %v793_v56  ;;  %v820_v42 = vmul.f32 %v6911_v41, %v789_v58  ;;  %v1125_v56 = vmul.f32 %v6915_v9, %v1097_v23  ;;  %v1409_v58 = vrot.slane %v5449_v52, %v5037_v30  ;;  %v647_v23 = vpop.f32.mrf.mxu0 }
 0x12a   : > { %v1138_v40 = vadd.f32 %v1122_v7, %v978_v44  ;;  %v1139_v14 = vadd.f32 %v1123_v57, %v979_v38  ;;  %v1405_v13 = vrot.slane %v5437_v17, %v5037_v30  ;;  %v5565_v3 = vadd.f32 %v4060_v55, %v5050_v36 }
 0x12b   : > { %v981_v46 = vadd.f32 %v965_v50, %v821_v53  ;;  %v980_v2 = vadd.f32 %v964_v48, %v820_v42  ;;  %v6917_v44 = vunpack.i.l.bf16 %v5338_v20  ;;  %v6918_v41 = vunpack.i.h.bf16 %v5378_v47 }
 0x12c   : > { %v1298_v35 = vadd.f32 %v1282_v63, %v1138_v40  ;;  %v1299_v7 = vadd.f32 %v1283_v34, %v1139_v14  ;;  %v1565_v53 = vrot.slane %v5437_v17, %v5041_v32  ;;  %v6757_v50 = vunpack.i.l.bf16 %v5446_v49 }
 0x12d   : > { %v5567_v9 = vpop.permute.xlu1 %4459  ;;  %v1124_v38 = vmul.f32 %v6917_v44, %v1093_v60  ;;  %v5571_v57 = vadd.f32 %v1125_v56, %v981_v46  ;;  %v1443_v61 = vmul.f32 %v6918_v41, %v1409_v58  ;;  %v6919_v55 = vunpack.i.l.bf16 %v5378_v47  ;;  %v5592_v58 = vpop.permute.xlu0 %4482 }
 0x12e   : > { %6916 = vst [vmem:[#allocation39_spill] sm:$0xff] %v5567_v9  ;;  %v5581_v48 = vadd.f32 %v5050_v36, %v647_v23  ;;  %v1569_v42 = vrot.slane %v5449_v52, %v5041_v32  ;;  %v801_v63 = vrot.slane %v5565_v3, %v5029_v26  ;;  %v945_v46 = vrot.slane %v5565_v3, %v5033_v28 }
 0x12f   : > { %v1442_v54 = vmul.f32 %v6919_v55, %v1405_v13  ;;  %6920 = vst [vmem:[#allocation40_spill] sm:$0xff] %v5592_v58  ;;  %v1725_v40 = vrot.slane %v5437_v17, %v5043_v33  ;;  %v1729_v14 = vrot.slane %v5449_v52, %v5043_v33  ;;  %v1140_v44 = vadd.f32 %v1124_v38, %v980_v2 }
 0x130   : > { %v941_v55 = vrot.slane %v5581_v48, %v5033_v28  ;;  %v1602_v60 = vmul.f32 %v6757_v50, %v1565_v53  ;;  %v1459_v20 = vadd.f32 %v1443_v61, %v1299_v7  ;;  %v6922_v47 = vunpack.i.h.bf16 %v5446_v49  ;;  %v4063_v50 = vpop.f32.mrf.mxu0 }
 0x131   : > { %v1458_v34 = vadd.f32 %v1442_v54, %v1298_v35  ;;  %v797_v41 = vrot.slane %v5581_v48, %v5029_v26  ;;  %v6923_v2 = vunpack.i.h.bf16 %v5408_v22  ;;  %v6924_v27 = vunpack.i.h.bf16 %v5428_v25 }
 0x132   : > { %v5600_v23 = vpop.permute.xlu1 %4465  ;;  %v1603_v13 = vmul.f32 %v6922_v47, %v1569_v42  ;;  %v1253_v56 = vrot.slane %v5489_v4, %v5039_v31  ;;  %v6925_v35 = vunpack.i.h.bf16 %v5535_v45  ;;  %v6926_v54 = vunpack.i.l.bf16 %v5535_v45 }
 0x133   : > { %6921 = vst [vmem:[#allocation41_spill] sm:$0xff] %v5600_v23  ;;  %v823_v38 = vmul.f32 %v6923_v2, %v801_v63  ;;  %v967_v16 = vmul.f32 %v6924_v27, %v945_v46  ;;  %v1885_v47 = vrot.slane %v5437_v17, %v5054_v39  ;;  %v1889_v53 = vrot.slane %v5449_v52, %v5054_v39 }
 0x134   : > { %v1763_v61 = vmul.f32 %v6925_v35, %v1729_v14  ;;  %v1762_v7 = vmul.f32 %v6926_v54, %v1725_v40  ;;  %v6927_v42 = vunpack.i.l.bf16 %v5428_v25  ;;  %v1618_v2 = vadd.f32 %v1602_v60, %v1458_v34  ;;  %v5635_v54 = vpop.permute.xlu0 %4488 }
 0x135   : > { %v1413_v27 = vrot.slane %v5489_v4, %v5037_v30  ;;  %v1619_v35 = vadd.f32 %v1603_v13, %v1459_v20  ;;  %v1257_v40 = vrot.slane %v5486_v5, %v5039_v31  ;;  %v1421_v34 = vrot.slane %v5581_v48, %v5037_v30  ;;  %v657_v20 = vpop.f32.mrf.mxu0 }
 0x136   : > { %v966_v63 = vmul.f32 %v6927_v42, %v941_v55  ;;  %v6929_v60 = vunpack.i.l.bf16 %v6904_v19  ;;  %v1417_v42 = vrot.slane %v5486_v5, %v5037_v30  ;;  %v1778_v13 = vadd.f32 %v1762_v7, %v1618_v2 }
 0x137   : > { %v5631_v14 = vpop.permute.xlu1 %4471  ;;  %v1779_v46 = vadd.f32 %v1763_v61, %v1619_v35  ;;  %v1425_v0 = vrot.slane %v5565_v3, %v5037_v30  ;;  %v1444_v18 = vmul.f32 %v6930_v24, %v1413_v27  ;;  %v6931_v7 = vunpack.i.h.bf16 %v6904_v19 }
 0x138   : > { %6928 = vst [vmem:[#allocation42_spill] sm:$0xff] %v5631_v14  ;;  %v6770_v43 = vunpack.i.h.bf16 %v5631_v14  ;;  %v6771_v25 = vunpack.i.l.bf16 %v5631_v14  ;;  %v1284_v55 = vmul.f32 %v6929_v60, %v1253_v56  ;;  %v1573_v56 = vrot.slane %v5489_v4, %v5041_v32 }
 0x139   : > { %v1577_v24 = vrot.slane %v5486_v5, %v5041_v32  ;;  %v6932_v60 = vunpack.i.h.bf16 %v5505_v15  ;;  %v5669_v61 = vadd.f32 %v5050_v36, %v657_v20  ;;  %v6778_v27 = vunpack.i.l.bf16 %v5368_v21 }
 0x13a   : > { %v1923_v45 = vmul.f32 %v6770_v43, %v1889_v53  ;;  %v1922_v49 = vmul.f32 %v6771_v25, %v1885_v47  ;;  %v1285_v53 = vmul.f32 %v6931_v7, %v1257_v40  ;;  %v6774_v43 = vunpack.i.l.bf16 %v5592_v58 }
 0x13b   : > { %v1300_v25 = vadd.f32 %v1284_v55, %v1140_v44  ;;  %v1445_v14 = vmul.f32 %v6932_v60, %v1417_v42  ;;  %v6934_v44 = vunpack.i.l.bf16 %v5635_v54  ;;  %v5678_v7 = vadd.f32 %v4063_v50, %v5050_v36 }
 0x13c   : > { %v1938_v2 = vadd.f32 %v1922_v49, %v1778_v13  ;;  %v1939_v35 = vadd.f32 %v1923_v45, %v1779_v46  ;;  %v5660_v47 = vpop.permute.xlu1 %4477  ;;  %v6933_v45 = vunpack.i.l.bf16 %v5408_v22  ;;  %v1301_v42 = vadd.f32 %v1285_v53, %v5571_v57 }
 0x13d   : > { %v1460_v13 = vadd.f32 %v1444_v18, %v1300_v25  ;;  %v1604_v55 = vmul.f32 %v6934_v44, %v1573_v56  ;;  %v1101_v20 = vrot.slane %v5581_v48, %v5035_v29  ;;  %v983_v18 = vadd.f32 %v967_v16, %v823_v38 }
 0x13e   : > { %v1954_v40 = vadd.f32 %v1938_v2, %v5437_v17  ;;  %v1955_v49 = vadd.f32 %v1939_v35, %v5449_v52  ;;  %v822_v46 = vmul.f32 %v6933_v45, %v797_v41  ;;  %v1105_v17 = vrot.slane %v5565_v3, %v5035_v29 }
 0x13f   : > { %v6935_v25 = vunpack.i.h.bf16 %v5592_v58  ;;  %v5693_v36 = vmul.f32 %v6774_v43, %v1421_v34  ;;  %v1461_v57 = vadd.f32 %v1445_v14, %v1301_v42  ;;  %v6936_v56 = vunpack.i.h.bf16 %v5635_v54 }
 0x140   : > { %4084 = vmatprep.mubr.msk.f32.mxu1 %vm1973_vm2, %v1954_v40  ;;  %v982_v52 = vadd.f32 %v966_v63, %v822_v46  ;;  %v805_v63 = vrot.slane %v5669_v61, %v5029_v26  ;;  %v1261_v16 = vrot.slane %v5581_v48, %v5039_v31  ;;  %v1620_v38 = vadd.f32 %v1604_v55, %v1460_v13 }
 0x141   : > { %v5689_v41 = vmul.f32 %v6935_v25, %v1425_v0  ;;  %v5695_v50 = vpop.permute.xlu1 %4494  ;;  %4085 = vmatmul.mubr.msk.f32.gmra.mxu1 %vm1973_vm2, %v1955_v49  ;;  %v1605_v60 = vmul.f32 %v6936_v56, %v1577_v24  ;;  %v5704_v0 = vpop.permute.xlu0 %4505  ;;  %v809_v34 = vrot.slane %v5678_v7, %v5029_v26  ;;  %v949_v53 = vrot.slane %v5669_v61, %v5033_v28 }
 0x142   : > { %6937 = vst [vmem:[#allocation43_spill] sm:$0xff] %v5704_v0  ;;  %v953_v14 = vrot.slane %v5678_v7, %v5033_v28  ;;  %v6938_v2 = vunpack.i.l.bf16 %v6914_v37  ;;  %v6939_v24 = vunpack.i.h.bf16 %v6914_v37  ;;  %v1585_v49 = vrot.slane %v5565_v3, %v5041_v32 }
 0x143   : > { %v1581_v44 = vrot.slane %v5581_v48, %v5041_v32  ;;  %v1733_v42 = vrot.slane %v5489_v4, %v5043_v33  ;;  %v6940_v43 = vunpack.i.h.bf16 %v5368_v21  ;;  %v6779_v55 = vunpack.i.l.bf16 %v5600_v23 }
 0x144   : > { %v1126_v35 = vmul.f32 %v6938_v2, %v1101_v20  ;;  %v1127_v40 = vmul.f32 %v6939_v24, %v1105_v17  ;;  %v1737_v20 = vrot.slane %v5486_v5, %v5043_v33  ;;  %v1621_v2 = vadd.f32 %v1605_v60, %v1461_v57 }
 0x145   : > { %v824_v24 = vmul.f32 %v6778_v27, %v805_v63  ;;  %v825_v13 = vmul.f32 %v6940_v43, %v809_v34  ;;  %v1265_v46 = vrot.slane %v5565_v3, %v5039_v31  ;;  %v6941_v17 = vunpack.i.h.bf16 %v5704_v0  ;;  %v5743_v25 = vpop.permute.xlu0 %4523 }
 0x146   : > { %v5730_v56 = vpop.permute.xlu1 %4500  ;;  %v1142_v45 = vadd.f32 %v1126_v35, %v982_v52  ;;  %v1143_v58 = vadd.f32 %v1127_v40, %v983_v18  ;;  %v6942_v57 = vunpack.i.h.bf16 %v5567_v9  ;;  %v6943_v63 = vunpack.i.l.bf16 %v5567_v9 }
 0x147   : > { %v5741_v37 = vmul.f32 %v6941_v17, %v1585_v49  ;;  %v1741_v34 = vrot.slane %v5581_v48, %v5043_v33  ;;  %v6944_v52 = vunpack.i.l.bf16 %v5704_v0  ;;  %v6945_v40 = vunpack.i.h.bf16 %v5695_v50 }
 0x148   : > { %v969_v60 = vmul.f32 %v6942_v57, %v953_v14  ;;  %v968_v27 = vmul.f32 %v6943_v63, %v949_v53  ;;  %v6946_v17 = vunpack.i.l.bf16 %v5695_v50  ;;  %v1286_v53 = vmul.f32 %v6779_v55, %v1261_v16 }
 0x149   : > { %v1606_v18 = vmul.f32 %v6944_v52, %v1581_v44  ;;  %v1765_v49 = vmul.f32 %v6945_v40, %v1737_v20  ;;  %v1109_v43 = vrot.slane %v5669_v61, %v5035_v29  ;;  %v1893_v52 = vrot.slane %v5489_v4, %v5054_v39 }
 0x14a   : > { %v1764_v14 = vmul.f32 %v6946_v17, %v1733_v42  ;;  %v1897_v20 = vrot.slane %v5486_v5, %v5054_v39  ;;  %v6947_v16 = vunpack.i.h.bf16 %v5600_v23  ;;  %v1113_v55 = vrot.slane %v5678_v7, %v5035_v29 }
 0x14b   : > { %v5766_v44 = vpop.permute.xlu1 %4511  ;;  %v6792_v57 = vunpack.i.h.bf16 %v5660_v47  ;;  %v1781_v9 = vadd.f32 %v1765_v49, %v1621_v2  ;;  %v1302_v22 = vadd.f32 %v1286_v53, %v1142_v45  ;;  %v1269_v23 = vrot.slane %v5669_v61, %v5039_v31 }
 0x14c   : > { %v6790_v42 = vunpack.i.h.bf16 %v5766_v44  ;;  %v6791_v40 = vunpack.i.l.bf16 %v5766_v44  ;;  %v1287_v17 = vmul.f32 %v6947_v16, %v1265_v46  ;;  %v1780_v63 = vadd.f32 %v1764_v14, %v1620_v38 }
 0x14d   : > { %v1273_v46 = vrot.slane %v5678_v7, %v5039_v31  ;;  %v1429_v16 = vrot.slane %v5669_v61, %v5037_v30  ;;  %v1129_v45 = vmul.f32 %v6792_v57, %v1113_v55  ;;  %v6948_v53 = vunpack.i.l.bf16 %v5660_v47 }
 0x14e   : > { %v1925_v21 = vmul.f32 %v6790_v42, %v1897_v20  ;;  %v1924_v0 = vmul.f32 %v6791_v40, %v1893_v52  ;;  %v1303_v20 = vadd.f32 %v1287_v17, %v1143_v58  ;;  %v1433_v42 = vrot.slane %v5678_v7, %v5037_v30  ;;  %v5800_v40 = vpop.permute.xlu0 %4540 }
 0x14f   : > { %v1128_v52 = vmul.f32 %v6948_v53, %v1109_v43  ;;  %6949 = vst [vmem:[#allocation44_spill] sm:$0xff] %v5800_v40  ;;  %v985_v58 = vadd.f32 %v969_v60, %v825_v13  ;;  %v1462_v55 = vadd.f32 %v5693_v36, %v1302_v22  ;;  %v1753_v43 = vrot.slane %v5678_v7, %v5043_v33 }
 0x150   : > { %v1940_v2 = vadd.f32 %v1924_v0, %v1780_v63  ;;  %v1941_v49 = vadd.f32 %v1925_v21, %v1781_v9  ;;  %v5792_v14 = vpop.permute.xlu1 %4517  ;;  %v984_v0 = vadd.f32 %v968_v27, %v824_v24  ;;  %v6950_v63 = vunpack.i.h.bf16 %v5730_v56 }
 0x151   : > { %v6799_v38 = vunpack.i.l.bf16 %v5792_v14  ;;  %v6951_v53 = vunpack.i.l.bf16 %v5730_v56  ;;  %v6794_v35 = vunpack.i.h.bf16 %v5800_v40  ;;  %v1145_v22 = vadd.f32 %v1129_v45, %v985_v58 }
 0x152   : > { %v1956_v21 = vadd.f32 %v1940_v2, %v5489_v4  ;;  %v1957_v9 = vadd.f32 %v1941_v49, %v5486_v5  ;;  %v1289_v17 = vmul.f32 %v6950_v63, %v1273_v46  ;;  %v1589_v5 = vrot.slane %v5669_v61, %v5041_v32 }
 0x153   : > { %v1288_v57 = vmul.f32 %v6951_v53, %v1269_v23  ;;  %v1463_v4 = vadd.f32 %v5689_v41, %v1303_v20  ;;  %v1144_v27 = vadd.f32 %v1128_v52, %v984_v0  ;;  %v1593_v36 = vrot.slane %v5678_v7, %v5041_v32 }
 0x154   : > { %4087 = vmatprep.mubr.msk.f32.mxu1 %vm1973_vm2, %v1956_v21  ;;  %v6953_v23 = vunpack.i.h.bf16 %v5792_v14  ;;  %v1448_v60 = vmul.f32 %v6799_v38, %v1429_v16  ;;  %v1622_v41 = vadd.f32 %v1606_v18, %v1462_v55  ;;  %v6954_v49 = vunpack.i.l.bf16 %v5743_v25 }
 0x155   : > { %v5820_v13 = vpop.permute.xlu1 %4529  ;;  %4088 = vmatmul.mubr.msk.f32.gmra.mxu1 %vm1973_vm2, %v1957_v9  ;;  %v1304_v45 = vadd.f32 %v1288_v57, %v1144_v27  ;;  %v1305_v52 = vadd.f32 %v1289_v17, %v1145_v22  ;;  %v6955_v16 = vrot.slane %v5565_v3, %v5043_v33  ;;  %v6956_v58 = vunpack.i.h.bf16 %v5743_v25  ;;  %v2936_v27 = vld [vmem:[%s6671_s6 + $0x8] sm:$0xff]  ;;  %v2935_v22 = vld [vmem:[%s6671_s6] sm:$0xff] }
 0x156   : > { %6952 = vst [vmem:[#allocation45_spill] sm:$0xff] %v5820_v13  ;;  %v1449_v24 = vmul.f32 %v6953_v23, %v1433_v42  ;;  %v6795_v46 = vunpack.i.h.bf16 %v5820_v13  ;;  %v6798_v2 = vunpack.i.l.bf16 %v5820_v13  ;;  %v1766_v20 = vmul.f32 %v6954_v49, %v1741_v34  ;;  %4122 = vmatprep.subr.mxu1 %v2936_v27 }
 0x157   : > { %v1623_v42 = vadd.f32 %v5741_v37, %v1463_v4  ;;  %v1767_v0 = vmul.f32 %v6956_v58, %v6955_v16  ;;  %v1749_v18 = vrot.slane %v5669_v61, %v5043_v33  ;;  %v1464_v34 = vadd.f32 %v1448_v60, %v1304_v45  ;;  %4123 = vmatpush3.msra.mxu1 %v2936_v27 }
 0x158   : > { %v1609_v21 = vmul.f32 %v6795_v46, %v1593_v36  ;;  %v1608_v9 = vmul.f32 %v6798_v2, %v1589_v5  ;;  %v1465_v57 = vadd.f32 %v1449_v24, %v1305_v52  ;;  %v1769_v55 = vmul.f32 %v6794_v35, %v1753_v43  ;;  %v2937_v43 = vld [vmem:[%s6672_s7] sm:$0xf]  ;;  %4124 = vmatprep.subr.mxu1 %v2935_v22 }
 0x159   : > { %v6797_v63 = vunpack.i.l.bf16 %v5800_v40  ;;  %v1901_v37 = vrot.slane %v5581_v48, %v5054_v39  ;;  %v1905_v53 = vrot.slane %v5565_v3, %v5054_v39  ;;  %v1782_v36 = vadd.f32 %v1766_v20, %v1622_v41  ;;  %4096 = vmatprep.subr.msk.mxu0 %vm517_vm0, %v2937_v43  ;;  %4125 = vmatpush3.msra.mxu1 %v2935_v22 }
 0x15a   : > { %v5846_v17 = vpop.permute.xlu1 %4535  ;;  %v1624_v23 = vadd.f32 %v1608_v9, %v1464_v34  ;;  %v1625_v24 = vadd.f32 %v1609_v21, %v1465_v57  ;;  %v1783_v60 = vadd.f32 %v1767_v0, %v1623_v42  ;;  %4097 = vmatpush3.msk.msra.mxu0 %vm517_vm0, %v2937_v43  ;;  %v1909_v41 = vrot.slane %v5669_v61, %v5054_v39  ;;  %v4678_v9 = vld [vmem:[%s4790_s26 + $0x8] sm:$0xff] }
 0x15b   : > { %v6800_v5 = vunpack.i.h.bf16 %v5846_v17  ;;  %v6801_v4 = vunpack.i.l.bf16 %v5846_v17  ;;  %v1768_v52 = vmul.f32 %v6797_v63, %v1749_v18  ;;  %v1913_v20 = vrot.slane %v5678_v7, %v5054_v39  ;;  %4099 = vmatmul.mubr.msk.f32.vlgmr.msra.gmra.mxu0 %vm468_vm1, %v4678_v9  ;;  %v4679_v18 = vld [vmem:[%s4790_s26 + $0x10] sm:$0xff] }
 0x15c   : > { %4101 = vmatprep.mubr.msk.f32.mxu0 %vm468_vm1, %v4679_v18  ;;  %v1785_v57 = vadd.f32 %v1769_v55, %v1625_v24  ;;  %v4681_v55 = vld [vmem:[%s4790_s26 + $0x20] sm:$0xff]  ;;  %v4682_v24 = vld [vmem:[%s4790_s26 + $0x28] sm:$0xff]  ;;  %v4691_v9 = vld [vmem:[%s4790_s26 + $0x70] sm:$0xff] }
 0x15d   : > { %v1927_v49 = vmul.f32 %v6800_v5, %v1905_v53  ;;  %v1926_v45 = vmul.f32 %v6801_v4, %v1901_v37  ;;  %v1784_v34 = vadd.f32 %v1768_v52, %v1624_v23  ;;  %v4688_v52 = vld [vmem:[%s4790_s26 + $0x58] sm:$0xff]  ;;  %v6966_v63 = vld [vmem:[#allocation12_spill] sm:$0xff]  ;;  %v6968_v5 = vunpack.i.l.bf16 %v4973_v6 }
 0x15e   : > { %v5875_v21 = vpop.permute.xlu1 %4545  ;;  %v6967_v2 = vunpack.i.l.bf16 %v6966_v63 }
 0x15f   : > { %6957 = vst [vmem:[#allocation46_spill] sm:$0xff] %v5875_v21  ;;  %v1942_v42 = vadd.f32 %v1926_v45, %v1782_v36  ;;  %v1943_v16 = vadd.f32 %v1927_v49, %v1783_v60  ;;  %v6793_v58 = vunpack.i.h.bf16 %v5875_v21  ;;  %v6796_v0 = vunpack.i.l.bf16 %v5875_v21  ;;  %v4680_v36 = vld [vmem:[%s4790_s26 + $0x18] sm:$0xff]  ;;  %v4683_v60 = vld [vmem:[%s4790_s26 + $0x30] sm:$0xff] }
 0x160   : > { %4102 = vmatmul.mubr.msk.f32.gmra.mxu0 %vm468_vm1, %v4680_v36  ;;  %v4684_v49 = vld [vmem:[%s4790_s26 + $0x38] sm:$0xff]  ;;  %v4687_v45 = vld [vmem:[%s4790_s26 + $0x50] sm:$0xff] }
 0x161   : > { %v1929_v37 = vmul.f32 %v6793_v58, %v1913_v20  ;;  %v1928_v53 = vmul.f32 %v6796_v0, %v1909_v41  ;;  %v1958_v27 = vadd.f32 %v1942_v42, %v5581_v48  ;;  %v1959_v43 = vadd.f32 %v1943_v16, %v5565_v3  ;;  %4104 = vmatprep.mubr.msk.f32.mxu0 %vm468_vm1, %v4681_v55  ;;  %v4689_v41 = vld [vmem:[%s4790_s26 + $0x60] sm:$0xff]  ;;  %v4690_v20 = vld [vmem:[%s4790_s26 + $0x68] sm:$0xff]  ;;  %v4692_v42 = vld [vmem:[%s4790_s26 + $0x78] sm:$0xff] }
 0x162   : > { %v5924_v16 = vld [vmem:[%s6670_s5] ss:$0 sm:$0xff] }
 0x163   : > { %v1944_v22 = vadd.f32 %v1928_v53, %v1784_v34  ;;  %v1945_v23 = vadd.f32 %v1929_v37, %v1785_v57  ;;  %4090 = vmatprep.mubr.msk.f32.mxu1 %vm1973_vm2, %v1958_v27 }
 0x164   : > { %4091 = vmatmul.mubr.msk.f32.gmra.mxu1 %vm1973_vm2, %v1959_v43  ;;  %4105 = vmatmul.mubr.msk.f32.gmra.mxu0 %vm468_vm1, %v4682_v24 }
 0x165   : > { %v1960_v48 = vadd.f32 %v1944_v22, %v5669_v61  ;;  %v1961_v3 = vadd.f32 %v1945_v23, %v5678_v7  ;;  %4107 = vmatprep.mubr.msk.f32.mxu0 %vm468_vm1, %v4683_v60  ;;  %v4685_v61 = vld [vmem:[%s4790_s26 + $0x40] sm:$0xff]  ;;  %v4686_v7 = vld [vmem:[%s4790_s26 + $0x48] sm:$0xff]  ;;  %s410_s26 = scalar_lea.vmem %s6676_s11, %s3830_s27 }
 0x166   : > { %v6958_v60 = vld [vmem:[#allocation22_spill] sm:$0xff] }
 0x167   : > { %4093 = vmatprep.mubr.msk.f32.mxu1 %vm1973_vm2, %v1960_v48  ;;  %v6964_v58 = vunpack.i.h.bf16 %v6958_v60 }
 0x168   : > { %4094 = vmatmul.mubr.msk.f32.gmra.mxu1 %vm1973_vm2, %v1961_v3  ;;  %4108 = vmatmul.mubr.msk.f32.gmra.mxu0 %vm468_vm1, %v4684_v49  ;;  %v6959_v49 = vunpack.i.l.bf16 %v6958_v60 }
 0x169   : > { %4110 = vmatprep.mubr.msk.f32.mxu0 %vm468_vm1, %v4685_v61 }
 0x16c   : > { %4111 = vmatmul.mubr.msk.f32.gmra.mxu0 %vm468_vm1, %v4686_v7  ;;  %v6960_v7 = vld [vmem:[#allocation6_spill] sm:$0xff] }
 0x16d   : > { %4113 = vmatprep.mubr.msk.f32.mxu0 %vm468_vm1, %v4687_v45  ;;  %v6961_v45 = vunpack.i.l.bf16 %v6960_v7  ;;  %v6965_v46 = vunpack.i.h.bf16 %v6960_v7 }
 0x170   : > { %4114 = vmatmul.mubr.msk.f32.gmra.mxu0 %vm468_vm1, %v4688_v52 }
 0x171   : > { %4116 = vmatprep.mubr.msk.f32.mxu0 %vm468_vm1, %v4689_v41 }
 0x174   : > { %4117 = vmatmul.mubr.msk.f32.gmra.mxu0 %vm468_vm1, %v4690_v20 }
 0x175   : > { %4119 = vmatprep.mubr.msk.f32.mxu0 %vm468_vm1, %v4691_v9 }
 0x178   : > { %4120 = vmatmul.mubr.msk.f32.gmra.mxu0 %vm468_vm1, %v4692_v42 }
 0x1c5   : > { %v4074_v18 = vpop.f32.mrf.mxu1 }
 0x1c6   : > { %v5927_v34 = vadd.f32 %v4074_v18, %v5924_v16 }
 0x1c7   : > { %v2088_v57 = vpop.f32.mrf.mxu1 }
 0x1c8   : > { %v5930_v37 = vadd.f32 %v5924_v16, %v2088_v57  ;;  %v2174_v27 = vrot.slane %v5927_v34, %v5029_v26  ;;  %v2254_v23 = vrot.slane %v5927_v34, %v5033_v28  ;;  %v2350_v24 = vrot.slane %v5927_v34, %v5035_v29 }
 0x1c9   : > { %v2446_v20 = vrot.slane %v5927_v34, %v5039_v31  ;;  %v2542_v18 = vrot.slane %v5927_v34, %v5037_v30  ;;  %v2638_v57 = vrot.slane %v5927_v34, %v5041_v32 }
 0x1ca   : > { %v2170_v43 = vrot.slane %v5930_v37, %v5029_v26  ;;  %v2250_v36 = vrot.slane %v5930_v37, %v5033_v28  ;;  %v2346_v22 = vrot.slane %v5930_v37, %v5035_v29  ;;  %v2442_v48 = vrot.slane %v5930_v37, %v5039_v31 }
 0x1cb   : > { %v4077_v53 = vpop.f32.mrf.mxu1  ;;  %v2538_v3 = vrot.slane %v5930_v37, %v5037_v30  ;;  %v2634_v41 = vrot.slane %v5930_v37, %v5041_v32  ;;  %v2730_v42 = vrot.slane %v5930_v37, %v5043_v33  ;;  %v2232_v35 = vmul.f32 %v6964_v58, %v2174_v27 }
 0x1cc   : > { %v2231_v61 = vmul.f32 %v6959_v49, %v2170_v43  ;;  %v2311_v52 = vmul.f32 %v6961_v45, %v2250_v36  ;;  %v6962_v36 = vld [vmem:[#allocation2_spill] sm:$0xff]  ;;  %v5972_v0 = vadd.f32 %v4077_v53, %v5924_v16  ;;  %v2503_v38 = vmul.f32 %v6967_v2, %v2442_v48 }
 0x1cd   : > { %v2098_v55 = vpop.f32.mrf.mxu1  ;;  %v6963_v49 = vunpack.i.l.bf16 %v6962_v36  ;;  %v2599_v4 = vmul.f32 %v6968_v5, %v2538_v3  ;;  %v6970_v27 = vunpack.i.h.bf16 %v6962_v36  ;;  %v2826_v53 = vrot.slane %v5930_v37, %v5054_v39  ;;  %v6973_v36 = vld [vmem:[#allocation3_spill] sm:$0xff] }
 0x1ce   : > { %v5957_v9 = vadd.f32 %v5924_v16, %v2098_v55  ;;  %v2327_v43 = vadd.f32 %v2311_v52, %v2231_v61  ;;  %v2312_v55 = vmul.f32 %v6965_v46, %v2254_v23  ;;  %v2734_v61 = vrot.slane %v5927_v34, %v5043_v33 }
 0x1cf   : > { %v2407_v45 = vmul.f32 %v6963_v49, %v2346_v22  ;;  %v6969_v22 = vunpack.i.l.bf16 %v4955_v62  ;;  %v2408_v46 = vmul.f32 %v6970_v27, %v2350_v24  ;;  %v6971_v3 = vunpack.i.l.bf16 %v4989_v11 }
 0x1d0   : > { %v2328_v58 = vadd.f32 %v2312_v55, %v2232_v35  ;;  %v2178_v2 = vrot.slane %v5957_v9, %v5029_v26  ;;  %v2258_v5 = vrot.slane %v5957_v9, %v5033_v28  ;;  %v2354_v23 = vrot.slane %v5957_v9, %v5035_v29  ;;  %v6975_v55 = vld [vmem:[#allocation5_spill] sm:$0xff] }
 0x1d1   : > { %v2423_v52 = vadd.f32 %v2407_v45, %v2327_v43  ;;  %v2695_v60 = vmul.f32 %v6969_v22, %v2634_v41  ;;  %v2791_v7 = vmul.f32 %v6971_v3, %v2730_v42  ;;  %v6972_v41 = vunpack.i.h.bf16 %v6966_v63 }
 0x1d2   : > { %v2424_v35 = vadd.f32 %v2408_v46, %v2328_v58  ;;  %v2830_v43 = vrot.slane %v5927_v34, %v5054_v39  ;;  %v6974_v49 = vunpack.i.l.bf16 %v6973_v36  ;;  %v6976_v22 = vunpack.i.l.bf16 %v6975_v55 }
 0x1d3   : > { %v2519_v48 = vadd.f32 %v2503_v38, %v2423_v52  ;;  %v2504_v24 = vmul.f32 %v6972_v41, %v2446_v20  ;;  %v2450_v38 = vrot.slane %v5957_v9, %v5039_v31  ;;  %v6977_v42 = vunpack.i.h.bf16 %v4973_v6 }
 0x1d4   : > { %v2233_v45 = vmul.f32 %v6974_v49, %v2178_v2  ;;  %v2313_v27 = vmul.f32 %v6976_v22, %v2258_v5  ;;  %v2546_v63 = vrot.slane %v5957_v9, %v5037_v30  ;;  %v6978_v46 = vunpack.i.l.bf16 %v5019_v1  ;;  %v6980_v5 = vld [vmem:[#allocation7_spill] sm:$0xff] }
 0x1d5   : > { %v2615_v52 = vadd.f32 %v2599_v4, %v2519_v48  ;;  %v2520_v21 = vadd.f32 %v2504_v24, %v2424_v35  ;;  %v2600_v58 = vmul.f32 %v6977_v42, %v2542_v18  ;;  %v6979_v2 = vunpack.i.h.bf16 %v4955_v62 }
 0x1d6   : > { %v2887_v3 = vmul.f32 %v6978_v46, %v2826_v53  ;;  %v2329_v49 = vadd.f32 %v2313_v27, %v2233_v45  ;;  %v6981_v22 = vunpack.i.l.bf16 %v6980_v5  ;;  %v6982_v48 = vunpack.i.h.bf16 %v4989_v11 }
 0x1d7   : > { %v2696_v41 = vmul.f32 %v6979_v2, %v2638_v57  ;;  %v2711_v13 = vadd.f32 %v2695_v60, %v2615_v52  ;;  %v2616_v4 = vadd.f32 %v2600_v58, %v2520_v21  ;;  %v2182_v18 = vrot.slane %v5972_v0, %v5029_v26  ;;  %v6985_v21 = vld [vmem:[#allocation11_spill] sm:$0xff]  ;;  %v6988_v2 = vld [vmem:[#allocation16_spill] sm:$0xff] }
 0x1d8   : > { %v2409_v40 = vmul.f32 %v6981_v22, %v2354_v23  ;;  %v2792_v6 = vmul.f32 %v6982_v48, %v2734_v61  ;;  %v6983_v24 = vunpack.i.h.bf16 %v5019_v1  ;;  %v6984_v62 = vunpack.i.l.bf16 %v4985_v10 }
 0x1d9   : > { %v4080_v20 = vpop.f32.mrf.mxu1  ;;  %v2642_v45 = vrot.slane %v5957_v9, %v5041_v32  ;;  %v2807_v23 = vadd.f32 %v2791_v7, %v2711_v13  ;;  %v2712_v60 = vadd.f32 %v2696_v41, %v2616_v4  ;;  %v6986_v27 = vunpack.i.l.bf16 %v6985_v21 }
 0x1da   : > { %v2888_v42 = vmul.f32 %v6983_v24, %v2830_v43  ;;  %v2425_v53 = vadd.f32 %v2409_v40, %v2329_v49  ;;  %v2505_v57 = vmul.f32 %v6984_v62, %v2450_v38  ;;  %v2738_v61 = vrot.slane %v5957_v9, %v5043_v33 }
 0x1db   : > { %v2108_v35 = vpop.f32.mrf.mxu1  ;;  %v2601_v11 = vmul.f32 %v6986_v27, %v2546_v63  ;;  %v6987_v58 = vunpack.i.h.bf16 %v6973_v36  ;;  %v2262_v40 = vrot.slane %v5972_v0, %v5033_v28  ;;  %v2358_v43 = vrot.slane %v5972_v0, %v5035_v29 }
 0x1dc   : > { %v2521_v52 = vadd.f32 %v2505_v57, %v2425_v53  ;;  %v6035_v38 = vadd.f32 %v5924_v16, %v2108_v35  ;;  %v2903_v13 = vadd.f32 %v2887_v3, %v2807_v23  ;;  %v2808_v7 = vadd.f32 %v2792_v6, %v2712_v60  ;;  %v6991_v35 = vld [vmem:[#allocation21_spill] sm:$0xff] }
 0x1dd   : > { %v2234_v1 = vmul.f32 %v6987_v58, %v2182_v18  ;;  %v2834_v63 = vrot.slane %v5957_v9, %v5054_v39  ;;  %v6989_v41 = vunpack.i.l.bf16 %v6988_v2  ;;  %v6990_v36 = vunpack.i.h.bf16 %v6975_v55 }
 0x1de   : > { %v2617_v46 = vadd.f32 %v2601_v11, %v2521_v52  ;;  %v2454_v4 = vrot.slane %v5972_v0, %v5039_v31  ;;  %v2919_v48 = vadd.f32 %v2903_v13, %v5930_v37  ;;  %v2904_v18 = vadd.f32 %v2888_v42, %v2808_v7 }
 0x1df   : > { %v2697_v49 = vmul.f32 %v6989_v41, %v2642_v45  ;;  %v2314_v22 = vmul.f32 %v6990_v36, %v2262_v40  ;;  %v6992_v24 = vunpack.i.l.bf16 %v6991_v35  ;;  %v2550_v6 = vrot.slane %v5972_v0, %v5037_v30 }
 0x1e0   : > { %v6993_v57 = vunpack.i.h.bf16 %v6980_v5  ;;  %v2646_v55 = vrot.slane %v5972_v0, %v5041_v32  ;;  %4126 = vmatprep.mubr.msk.f32.mxu1 %vm3086_vm3, %v2919_v48  ;;  %v2920_v23 = vadd.f32 %v2904_v18, %v5927_v34  ;;  %v2186_v37 = vrot.slane %v6035_v38, %v5029_v26 }
 0x1e1   : > { %v2793_v3 = vmul.f32 %v6992_v24, %v2738_v61  ;;  %v2713_v53 = vadd.f32 %v2697_v49, %v2617_v46  ;;  %v2330_v62 = vadd.f32 %v2314_v22, %v2234_v1  ;;  %v2266_v42 = vrot.slane %v6035_v38, %v5033_v28 }
 0x1e2   : > { %v2410_v45 = vmul.f32 %v6993_v57, %v2358_v43  ;;  %v2362_v60 = vrot.slane %v6035_v38, %v5035_v29  ;;  %v6994_v5 = vunpack.i.l.bf16 %v5151_v51  ;;  %v6995_v52 = vunpack.i.h.bf16 %v4985_v10  ;;  %4127 = vmatmul.mubr.msk.f32.vlgmr.msra.gmra.mxu1 %vm3086_vm3, %v2920_v23 }
 0x1e3   : > { %v2809_v27 = vadd.f32 %v2793_v3, %v2713_v53  ;;  %v6067_v1 = vadd.f32 %v4080_v20, %v5924_v16  ;;  %v6996_v34 = vunpack.i.l.bf16 %v5149_v59  ;;  %v6997_v43 = vunpack.i.l.bf16 %v4979_v8 }
 0x1e4   : > { %v2889_v11 = vmul.f32 %v6994_v5, %v2834_v63  ;;  %v2426_v61 = vadd.f32 %v2410_v45, %v2330_v62  ;;  %v2506_v58 = vmul.f32 %v6995_v52, %v2454_v4  ;;  %v2458_v7 = vrot.slane %v6035_v38, %v5039_v31  ;;  %v7001_v62 = vld [vmem:[#allocation15_spill] sm:$0xff] }
 0x1e5   : > { %v2235_v40 = vmul.f32 %v6996_v34, %v2186_v37  ;;  %v2315_v13 = vmul.f32 %v6997_v43, %v2266_v42  ;;  %v6998_v41 = vunpack.i.h.bf16 %v6985_v21  ;;  %v2742_v20 = vrot.slane %v5972_v0, %v5043_v33 }
 0x1e6   : > { %v2905_v46 = vadd.f32 %v2889_v11, %v2809_v27  ;;  %v2522_v63 = vadd.f32 %v2506_v58, %v2426_v61  ;;  %v6999_v49 = vunpack.i.h.bf16 %v6988_v2  ;;  %v7000_v4 = vunpack.i.l.bf16 %v4991_v12  ;;  %v7004_v11 = vld [vmem:[#allocation19_spill] sm:$0xff] }
 0x1e7   : > { %v2602_v10 = vmul.f32 %v6998_v41, %v2550_v6  ;;  %v2331_v22 = vadd.f32 %v2315_v13, %v2235_v40  ;;  %v2554_v18 = vrot.slane %v6035_v38, %v5037_v30  ;;  %v2838_v21 = vrot.slane %v5972_v0, %v5054_v39 }
 0x1e8   : > { %v2698_v36 = vmul.f32 %v6999_v49, %v2646_v55  ;;  %v2411_v48 = vmul.f32 %v7000_v4, %v2362_v60  ;;  %v2921_v24 = vadd.f32 %v2905_v46, %v5957_v9  ;;  %v2650_v6 = vrot.slane %v6035_v38, %v5041_v32  ;;  %v4083_v27 = vpop.f32.mrf.mxu1 }
 0x1e9   : > { %v2618_v3 = vadd.f32 %v2602_v10, %v2522_v63  ;;  %v7002_v2 = vunpack.i.l.bf16 %v7001_v62  ;;  %v2746_v45 = vrot.slane %v6035_v38, %v5043_v33  ;;  %v2190_v55 = vrot.slane %v6067_v1, %v5029_v26 }
 0x1ea   : > { %v2427_v53 = vadd.f32 %v2411_v48, %v2331_v22  ;;  %4129 = vmatprep.mubr.msk.f32.mxu1 %vm3086_vm3, %v2921_v24  ;;  %v7003_v23 = vunpack.i.h.bf16 %v6991_v35  ;;  %v2270_v42 = vrot.slane %v6067_v1, %v5033_v28  ;;  %v2366_v60 = vrot.slane %v6067_v1, %v5035_v29  ;;  %v2118_v41 = vpop.f32.mrf.mxu1  ;;  %v7011_v22 = vld [vmem:[#allocation26_spill] sm:$0xff] }
 0x1eb   : > { %v2507_v57 = vmul.f32 %v7002_v2, %v2458_v7  ;;  %v2714_v9 = vadd.f32 %v2698_v36, %v2618_v3  ;;  %v7005_v61 = vunpack.i.l.bf16 %v7004_v11  ;;  %v2842_v58 = vrot.slane %v6035_v38, %v5054_v39 }
 0x1ec   : > { %v2794_v37 = vmul.f32 %v7003_v23, %v2742_v20  ;;  %v7006_v34 = vunpack.i.h.bf16 %v5149_v59  ;;  %v7007_v35 = vunpack.i.h.bf16 %v5151_v51  ;;  %v7008_v7 = vunpack.i.h.bf16 %v4979_v8  ;;  %v7009_v20 = vld [vmem:[#allocation4_spill] sm:$0xff] }
 0x1ed   : > { %v2523_v5 = vadd.f32 %v2507_v57, %v2427_v53  ;;  %v2603_v52 = vmul.f32 %v7005_v61, %v2554_v18  ;;  %v2462_v63 = vrot.slane %v6067_v1, %v5039_v31  ;;  %v7010_v49 = vunpack.i.l.bf16 %v7009_v20  ;;  %v7014_v53 = vld [vmem:[#allocation9_spill] sm:$0xff] }
 0x1ee   : > { %v2236_v40 = vmul.f32 %v7006_v34, %v2190_v55  ;;  %v2810_v43 = vadd.f32 %v2794_v37, %v2714_v9  ;;  %v2890_v13 = vmul.f32 %v7007_v35, %v2838_v21  ;;  %v2316_v46 = vmul.f32 %v7008_v7, %v2270_v42  ;;  %v7018_v34 = vld [vmem:[#allocation13_spill] sm:$0xff]  ;;  %v7020_v35 = vld [vmem:[#allocation14_spill] sm:$0xff] }
 0x1ef   : > { %v2619_v10 = vadd.f32 %v2603_v52, %v2523_v5  ;;  %v2699_v36 = vmul.f32 %v7010_v49, %v2650_v6  ;;  %v7012_v4 = vunpack.i.l.bf16 %v7011_v22  ;;  %v2558_v59 = vrot.slane %v6067_v1, %v5037_v30 }
 0x1f0   : > { %v2906_v18 = vadd.f32 %v2890_v13, %v2810_v43  ;;  %v2332_v51 = vadd.f32 %v2316_v46, %v2236_v40  ;;  %v7013_v24 = vunpack.i.h.bf16 %v4991_v12  ;;  %v6125_v3 = vadd.f32 %v4083_v27, %v5924_v16 }
 0x1f1   : > { %v2795_v48 = vmul.f32 %v7012_v4, %v2746_v45  ;;  %v2715_v21 = vadd.f32 %v2699_v36, %v2619_v10  ;;  %v7015_v2 = vunpack.i.l.bf16 %v7014_v53  ;;  %v2654_v6 = vrot.slane %v6067_v1, %v5041_v32 }
 0x1f2   : > { %v2412_v8 = vmul.f32 %v7013_v24, %v2366_v60  ;;  %v6132_v45 = vadd.f32 %v5924_v16, %v2118_v41  ;;  %v2922_v55 = vadd.f32 %v2906_v18, %v5972_v0  ;;  %v7016_v23 = vunpack.i.h.bf16 %v7001_v62 }
 0x1f3   : > { %v2891_v57 = vmul.f32 %v7015_v2, %v2842_v58  ;;  %v2750_v37 = vrot.slane %v6067_v1, %v5043_v33  ;;  %v2811_v42 = vadd.f32 %v2795_v48, %v2715_v21  ;;  %v7017_v61 = vunpack.i.h.bf16 %v7004_v11 }
 0x1f4   : > { %v2428_v9 = vadd.f32 %v2412_v8, %v2332_v51  ;;  %v2508_v12 = vmul.f32 %v7016_v23, %v2462_v63  ;;  %v2194_v60 = vrot.slane %v6132_v45, %v5029_v26  ;;  %v2274_v27 = vrot.slane %v6132_v45, %v5033_v28  ;;  %4130 = vmatmul.mubr.msk.f32.gmra.mxu1 %vm3086_vm3, %v2922_v55 }
 0x1f5   : > { %v2370_v5 = vrot.slane %v6132_v45, %v5035_v29  ;;  %v2604_v62 = vmul.f32 %v7017_v61, %v2558_v59  ;;  %v2198_v52 = vrot.slane %v6125_v3, %v5029_v26  ;;  %v2907_v58 = vadd.f32 %v2891_v57, %v2811_v42  ;;  %v7024_v59 = vld [vmem:[#allocation18_spill] sm:$0xff]  ;;  %v7027_v57 = vld [vmem:[#allocation24_spill] sm:$0xff] }
 0x1f6   : > { %v2524_v0 = vadd.f32 %v2508_v12, %v2428_v9  ;;  %v7019_v40 = vunpack.i.l.bf16 %v7018_v34  ;;  %v7021_v13 = vunpack.i.l.bf16 %v7020_v35  ;;  %v2466_v46 = vrot.slane %v6132_v45, %v5039_v31 }
 0x1f7   : > { %v7022_v41 = vunpack.i.h.bf16 %v7009_v20  ;;  %v7023_v11 = vunpack.i.h.bf16 %v7011_v22  ;;  %v2846_v36 = vrot.slane %v6067_v1, %v5054_v39  ;;  %v2923_v4 = vadd.f32 %v2907_v58, %v6035_v38 }
 0x1f8   : > { %v2237_v43 = vmul.f32 %v7019_v40, %v2194_v60  ;;  %v2317_v7 = vmul.f32 %v7021_v13, %v2274_v27  ;;  %v2620_v63 = vadd.f32 %v2604_v62, %v2524_v0  ;;  %v7025_v18 = vunpack.i.l.bf16 %v7024_v59  ;;  %v7031_v0 = vld [vmem:[#allocation34_spill] sm:$0xff]  ;;  %v7034_v13 = vld [vmem:[#allocation29_spill] sm:$0xff] }
 0x1f9   : > { %v2700_v10 = vmul.f32 %v7022_v41, %v2654_v6  ;;  %v2796_v49 = vmul.f32 %v7023_v11, %v2750_v37  ;;  %v2562_v24 = vrot.slane %v6132_v45, %v5037_v30  ;;  %v7026_v21 = vunpack.i.h.bf16 %v7018_v34  ;;  %4132 = vmatprep.mubr.msk.f32.mxu1 %vm3086_vm3, %v2923_v4 }
 0x1fa   : > { %v2333_v48 = vadd.f32 %v2317_v7, %v2237_v43  ;;  %v2413_v51 = vmul.f32 %v7025_v18, %v2370_v5  ;;  %v2278_v22 = vrot.slane %v6125_v3, %v5033_v28  ;;  %v2374_v2 = vrot.slane %v6125_v3, %v5035_v29 }
 0x1fb   : > { %v2716_v8 = vadd.f32 %v2700_v10, %v2620_v63  ;;  %v2238_v20 = vmul.f32 %v7026_v21, %v2198_v52  ;;  %v7028_v6 = vunpack.i.l.bf16 %v7027_v57  ;;  %v2658_v9 = vrot.slane %v6132_v45, %v5041_v32 }
 0x1fc   : > { %v2429_v38 = vadd.f32 %v2413_v51, %v2333_v48  ;;  %v7029_v12 = vunpack.i.h.bf16 %v7014_v53  ;;  %v7030_v42 = vunpack.i.h.bf16 %v7020_v35  ;;  %v2470_v27 = vrot.slane %v6125_v3, %v5039_v31  ;;  %v7037_v48 = vld [vmem:[#allocation10_spill] sm:$0xff] }
 0x1fd   : > { %v2509_v55 = vmul.f32 %v7028_v6, %v2466_v46  ;;  %v2812_v23 = vadd.f32 %v2796_v49, %v2716_v8  ;;  %v7032_v61 = vunpack.i.l.bf16 %v7031_v0  ;;  %v2754_v52 = vrot.slane %v6132_v45, %v5043_v33 }
 0x1fe   : > { %v2892_v37 = vmul.f32 %v7029_v12, %v2846_v36  ;;  %v2318_v60 = vmul.f32 %v7030_v42, %v2278_v22  ;;  %v7033_v40 = vunpack.i.h.bf16 %v7024_v59  ;;  %v2566_v53 = vrot.slane %v6125_v3, %v5037_v30 }
 0x1ff   : > { %v2525_v5 = vadd.f32 %v2509_v55, %v2429_v38  ;;  %v2605_v62 = vmul.f32 %v7032_v61, %v2562_v24  ;;  %v7035_v7 = vunpack.i.l.bf16 %v7034_v13  ;;  %v2850_v63 = vrot.slane %v6132_v45, %v5054_v39 }
 0x200   : > { %v2908_v58 = vadd.f32 %v2892_v37, %v2812_v23  ;;  %v2334_v34 = vadd.f32 %v2318_v60, %v2238_v20  ;;  %v2414_v43 = vmul.f32 %v7033_v40, %v2374_v2  ;;  %v7036_v11 = vunpack.i.h.bf16 %v7027_v57  ;;  %v7040_v20 = vld [vmem:[#allocation38_spill] sm:$0xff] }
 0x201   : > { %v2621_v35 = vadd.f32 %v2605_v62, %v2525_v5  ;;  %v2701_v46 = vmul.f32 %v7035_v7, %v2658_v9  ;;  %v2662_v36 = vrot.slane %v6125_v3, %v5041_v32  ;;  %v7038_v59 = vunpack.i.l.bf16 %v7037_v48  ;;  %v4086_v42 = vpop.f32.mrf.mxu1 }
 0x202   : > { %v2924_v41 = vadd.f32 %v2908_v58, %v6067_v1  ;;  %v2430_v10 = vadd.f32 %v2414_v43, %v2334_v34  ;;  %v2510_v49 = vmul.f32 %v7036_v11, %v2470_v27  ;;  %v7039_v24 = vunpack.i.h.bf16 %v7031_v0 }
 0x203   : > { %v2717_v4 = vadd.f32 %v2701_v46, %v2621_v35  ;;  %v2797_v18 = vmul.f32 %v7038_v59, %v2754_v52  ;;  %v2758_v1 = vrot.slane %v6125_v3, %v5043_v33  ;;  %v7041_v22 = vunpack.i.l.bf16 %v7040_v20  ;;  %v2128_v62 = vpop.f32.mrf.mxu1 }
 0x204   : > { %4133 = vmatmul.mubr.msk.f32.gmra.mxu1 %vm3086_vm3, %v2924_v41  ;;  %v2526_v51 = vadd.f32 %v2510_v49, %v2430_v10  ;;  %v2606_v8 = vmul.f32 %v7039_v24, %v2566_v53  ;;  %v7042_v57 = vunpack.i.h.bf16 %v7034_v13  ;;  %v2854_v55 = vrot.slane %v6125_v3, %v5054_v39  ;;  %v7045_v13 = vld [vmem:[#allocation30_spill] sm:$0xff] }
 0x205   : > { %v2813_v21 = vadd.f32 %v2797_v18, %v2717_v4  ;;  %v2893_v2 = vmul.f32 %v7041_v22, %v2850_v63  ;;  %v7043_v12 = vunpack.i.h.bf16 %v7037_v48  ;;  %v6218_v27 = vadd.f32 %v4086_v42, %v5924_v16  ;;  %v7047_v63 = vld [vmem:[#allocation23_spill] sm:$0xff]  ;;  %v7049_v48 = vld [vmem:[#allocation25_spill] sm:$0xff] }
 0x206   : > { %v2622_v38 = vadd.f32 %v2606_v8, %v2526_v51  ;;  %v2702_v6 = vmul.f32 %v7042_v57, %v2662_v36  ;;  %v7044_v0 = vunpack.i.h.bf16 %v7040_v20  ;;  %v2129_v58 = vadd.f32 %v5924_v16, %v2128_v62  ;;  %v7056_v42 = vld [vmem:[#allocation33_spill] sm:$0xff] }
 0x207   : > { %v2909_v9 = vadd.f32 %v2893_v2, %v2813_v21  ;;  %v2798_v37 = vmul.f32 %v7043_v12, %v2758_v1  ;;  %v2206_v34 = vrot.slane %v6218_v27, %v5029_v26  ;;  %v2286_v40 = vrot.slane %v6218_v27, %v5033_v28  ;;  %v7053_v2 = vld [vmem:[#allocation28_spill] sm:$0xff] }
 0x208   : > { %v2718_v23 = vadd.f32 %v2702_v6, %v2622_v38  ;;  %v2894_v61 = vmul.f32 %v7044_v0, %v2854_v55  ;;  %v2202_v43 = vrot.slane %v2129_v58, %v5029_v26  ;;  %v2282_v53 = vrot.slane %v2129_v58, %v5033_v28 }
 0x209   : > { %v2925_v60 = vadd.f32 %v2909_v9, %v6132_v45  ;;  %v2378_v35 = vrot.slane %v2129_v58, %v5035_v29  ;;  %v7046_v7 = vunpack.i.l.bf16 %v7045_v13  ;;  %v7048_v41 = vunpack.i.l.bf16 %v7047_v63 }
 0x20a   : > { %v2814_v5 = vadd.f32 %v2798_v37, %v2718_v23  ;;  %v2474_v11 = vrot.slane %v2129_v58, %v5039_v31  ;;  %v2382_v49 = vrot.slane %v6218_v27, %v5035_v29  ;;  %v2478_v36 = vrot.slane %v6218_v27, %v5039_v31 }
 0x20b   : > { %4135 = vmatprep.mubr.msk.f32.mxu1 %vm3086_vm3, %v2925_v60  ;;  %v2239_v46 = vmul.f32 %v7046_v7, %v2202_v43  ;;  %v2319_v10 = vmul.f32 %v7048_v41, %v2282_v53  ;;  %v7050_v59 = vunpack.i.l.bf16 %v7049_v48  ;;  %v7051_v51 = vunpack.i.h.bf16 %v7045_v13 }
 0x20c   : > { %v2910_v52 = vadd.f32 %v2894_v61, %v2814_v5  ;;  %v7052_v8 = vunpack.i.h.bf16 %v7047_v63  ;;  %v2666_v21 = vrot.slane %v2129_v58, %v5041_v32  ;;  %v2574_v20 = vrot.slane %v6218_v27, %v5037_v30 }
 0x20d   : > { %v2335_v4 = vadd.f32 %v2319_v10, %v2239_v46  ;;  %v2415_v18 = vmul.f32 %v7050_v59, %v2378_v35  ;;  %v2240_v24 = vmul.f32 %v7051_v51, %v2206_v34  ;;  %v7054_v38 = vunpack.i.l.bf16 %v7053_v2  ;;  %v7062_v46 = vld [vmem:[#allocation17_spill] sm:$0xff] }
 0x20e   : > { %v2926_v45 = vadd.f32 %v2910_v52, %v6125_v3  ;;  %v2570_v3 = vrot.slane %v2129_v58, %v5037_v30  ;;  %v2320_v1 = vmul.f32 %v7052_v8, %v2286_v40  ;;  %v7055_v55 = vunpack.i.h.bf16 %v7049_v48  ;;  %v7059_v52 = vld [vmem:[#allocation37_spill] sm:$0xff]  ;;  %v7065_v48 = vld [vmem:[#allocation42_spill] sm:$0xff] }
 0x20f   : > { %v2431_v22 = vadd.f32 %v2415_v18, %v2335_v4  ;;  %v2511_v57 = vmul.f32 %v7054_v38, %v2474_v11  ;;  %v2762_v23 = vrot.slane %v2129_v58, %v5043_v33  ;;  %v2670_v12 = vrot.slane %v6218_v27, %v5041_v32 }
 0x210   : > { %4136 = vmatmul.mubr.msk.f32.gmra.mxu1 %vm3086_vm3, %v2926_v45  ;;  %v2336_v6 = vadd.f32 %v2320_v1, %v2240_v24  ;;  %v2416_v9 = vmul.f32 %v7055_v55, %v2382_v49  ;;  %v7057_v60 = vunpack.i.l.bf16 %v7056_v42  ;;  %v7058_v61 = vunpack.i.h.bf16 %v7053_v2 }
 0x211   : > { %v2527_v37 = vadd.f32 %v2511_v57, %v2431_v22  ;;  %v7060_v34 = vunpack.i.l.bf16 %v7059_v52  ;;  %v2858_v45 = vrot.slane %v2129_v58, %v5054_v39  ;;  %v7061_v35 = vunpack.i.h.bf16 %v7056_v42 }
 0x212   : > { %v2607_v5 = vmul.f32 %v7057_v60, %v2570_v3  ;;  %v2432_v0 = vadd.f32 %v2416_v9, %v2336_v6  ;;  %v2512_v62 = vmul.f32 %v7058_v61, %v2478_v36  ;;  %v2766_v7 = vrot.slane %v6218_v27, %v5043_v33 }
 0x213   : > { %v2703_v40 = vmul.f32 %v7060_v34, %v2666_v21  ;;  %v2608_v13 = vmul.f32 %v7061_v35, %v2574_v20  ;;  %v7063_v63 = vunpack.i.l.bf16 %v7062_v46  ;;  %v7064_v49 = vunpack.i.h.bf16 %v7059_v52  ;;  %v7073_v35 = vld [vmem:[#allocation31_spill] sm:$0xff] }
 0x214   : > { %v2623_v43 = vadd.f32 %v2607_v5, %v2527_v37  ;;  %v2528_v53 = vadd.f32 %v2512_v62, %v2432_v0  ;;  %v2862_v36 = vrot.slane %v6218_v27, %v5054_v39  ;;  %v7066_v59 = vunpack.i.l.bf16 %v7065_v48  ;;  %v7069_v5 = vld [vmem:[#allocation27_spill] sm:$0xff]  ;;  %v7071_v62 = vld [vmem:[#allocation8_spill] sm:$0xff] }
 0x215   : > { %v2799_v41 = vmul.f32 %v7063_v63, %v2762_v23  ;;  %v2704_v3 = vmul.f32 %v7064_v49, %v2670_v12  ;;  %v7067_v24 = vunpack.i.h.bf16 %v7062_v46  ;;  %v4089_v1 = vpop.f32.mrf.mxu1  ;;  %v7068_v2 = vunpack.i.h.bf16 %v7065_v48 }
 0x216   : > { %v2719_v10 = vadd.f32 %v2703_v40, %v2623_v43  ;;  %v2624_v11 = vadd.f32 %v2608_v13, %v2528_v53  ;;  %v2895_v18 = vmul.f32 %v7066_v59, %v2858_v45  ;;  %v6281_v21 = vadd.f32 %v4089_v1, %v5924_v16 }
 0x217   : > { %v2800_v8 = vmul.f32 %v7067_v24, %v2766_v7  ;;  %v2896_v38 = vmul.f32 %v7068_v2, %v2862_v36  ;;  %v2138_v57 = vpop.f32.mrf.mxu1  ;;  %v7070_v0 = vunpack.i.l.bf16 %v7069_v5  ;;  %v7072_v52 = vunpack.i.l.bf16 %v7071_v62 }
 0x218   : > { %v2815_v4 = vadd.f32 %v2799_v41, %v2719_v10  ;;  %v2720_v51 = vadd.f32 %v2704_v3, %v2624_v11  ;;  %v6286_v6 = vadd.f32 %v5924_v16, %v2138_v57  ;;  %v2214_v23 = vrot.slane %v6281_v21, %v5029_v26 }
 0x219   : > { %v2294_v12 = vrot.slane %v6281_v21, %v5033_v28  ;;  %v2390_v40 = vrot.slane %v6281_v21, %v5035_v29  ;;  %v2486_v43 = vrot.slane %v6281_v21, %v5039_v31  ;;  %v7074_v13 = vunpack.i.l.bf16 %v7073_v35 }
 0x21a   : > { %v2911_v20 = vadd.f32 %v2895_v18, %v2815_v4  ;;  %v2816_v22 = vadd.f32 %v2800_v8, %v2720_v51  ;;  %v2210_v42 = vrot.slane %v6286_v6, %v5029_v26  ;;  %v2290_v60 = vrot.slane %v6286_v6, %v5033_v28 }
 0x21b   : > { %v2578_v45 = vrot.slane %v6286_v6, %v5037_v30  ;;  %v7075_v46 = vunpack.i.h.bf16 %v7069_v5  ;;  %v7076_v41 = vunpack.i.h.bf16 %v7071_v62  ;;  %v2674_v11 = vrot.slane %v6286_v6, %v5041_v32 }
 0x21c   : > { %v2927_v55 = vadd.f32 %v2911_v20, %v2129_v58  ;;  %v2912_v9 = vadd.f32 %v2896_v38, %v2816_v22  ;;  %v2386_v58 = vrot.slane %v6286_v6, %v5035_v29  ;;  %v2241_v61 = vmul.f32 %v7070_v0, %v2210_v42 }
 0x21d   : > { %v2321_v34 = vmul.f32 %v7072_v52, %v2290_v60  ;;  %v2242_v63 = vmul.f32 %v7075_v46, %v2214_v23  ;;  %v2322_v10 = vmul.f32 %v7076_v41, %v2294_v12  ;;  %v2582_v49 = vrot.slane %v6281_v21, %v5037_v30 }
 0x21e   : > { %4138 = vmatprep.mubr.msk.f32.mxu1 %vm3086_vm3, %v2927_v55  ;;  %v2928_v37 = vadd.f32 %v2912_v9, %v6218_v27  ;;  %v2482_v27 = vrot.slane %v6286_v6, %v5039_v31  ;;  %v2417_v7 = vmul.f32 %v7074_v13, %v2386_v58  ;;  %v7077_v36 = vunpack.i.l.bf16 %v6904_v19 }
 0x21f   : > { %v2337_v53 = vadd.f32 %v2321_v34, %v2241_v61  ;;  %v2338_v48 = vadd.f32 %v2322_v10, %v2242_v63  ;;  %v7078_v59 = vunpack.i.h.bf16 %v7073_v35  ;;  %v7079_v51 = vunpack.i.l.bf16 %v5505_v15 }
 0x220   : > { %4139 = vmatmul.mubr.msk.f32.gmra.mxu1 %vm3086_vm3, %v2928_v37  ;;  %v2513_v4 = vmul.f32 %v7077_v36, %v2482_v27  ;;  %v2770_v8 = vrot.slane %v6286_v6, %v5043_v33  ;;  %v7080_v22 = vunpack.i.h.bf16 %v6904_v19  ;;  %v2678_v38 = vrot.slane %v6281_v21, %v5041_v32 }
 0x221   : > { %v2433_v3 = vadd.f32 %v2417_v7, %v2337_v53  ;;  %v2418_v18 = vmul.f32 %v7078_v59, %v2390_v40  ;;  %v2609_v24 = vmul.f32 %v7079_v51, %v2578_v45  ;;  %v7081_v57 = vunpack.i.l.bf16 %v5635_v54 }
 0x222   : > { %v2514_v2 = vmul.f32 %v7080_v22, %v2486_v43  ;;  %v2866_v9 = vrot.slane %v6286_v6, %v5054_v39  ;;  %v7082_v42 = vunpack.i.h.bf16 %v5505_v15  ;;  %v2774_v58 = vrot.slane %v6281_v21, %v5043_v33 }
 0x223   : > { %v2529_v1 = vadd.f32 %v2513_v4, %v2433_v3  ;;  %v2434_v20 = vadd.f32 %v2418_v18, %v2338_v48  ;;  %v2705_v55 = vmul.f32 %v7081_v57, %v2674_v11  ;;  %v7083_v19 = vunpack.i.l.bf16 %v5695_v50  ;;  %v7090_v18 = vld [vmem:[#allocation36_spill] sm:$0xff] }
 0x224   : > { %v4092_v23 = vpop.f32.mrf.mxu1  ;;  %v2610_v60 = vmul.f32 %v7082_v42, %v2582_v49  ;;  %v2870_v0 = vrot.slane %v6281_v21, %v5054_v39  ;;  %v7084_v27 = vunpack.i.h.bf16 %v5635_v54  ;;  %v7085_v53 = vunpack.i.l.bf16 %v5766_v44 }
 0x225   : > { %v2625_v12 = vadd.f32 %v2609_v24, %v2529_v1  ;;  %v2530_v37 = vadd.f32 %v2514_v2, %v2434_v20  ;;  %v2801_v5 = vmul.f32 %v7083_v19, %v2770_v8  ;;  %v6348_v61 = vadd.f32 %v4092_v23, %v5924_v16 }
 0x226   : > { %v2148_v62 = vpop.f32.mrf.mxu1  ;;  %v2706_v40 = vmul.f32 %v7084_v27, %v2678_v38  ;;  %v2897_v35 = vmul.f32 %v7085_v53, %v2866_v9  ;;  %v7086_v7 = vunpack.i.h.bf16 %v5695_v50  ;;  %v7087_v63 = vunpack.i.h.bf16 %v5766_v44  ;;  %v7088_v44 = vld [vmem:[#allocation35_spill] sm:$0xff]  ;;  %v7092_v9 = vld [vmem:[#allocation20_spill] sm:$0xff] }
 0x227   : > { %v2721_v52 = vadd.f32 %v2705_v55, %v2625_v12  ;;  %v2626_v34 = vadd.f32 %v2610_v60, %v2530_v37  ;;  %v6353_v15 = vadd.f32 %v5924_v16, %v2148_v62  ;;  %v2222_v4 = vrot.slane %v6348_v61, %v5029_v26 }
 0x228   : > { %v4095_v45 = vpop.f32.mrf.mxu1  ;;  %v2802_v46 = vmul.f32 %v7086_v7, %v2774_v58  ;;  %v2898_v41 = vmul.f32 %v7087_v63, %v2870_v0  ;;  %v2302_v50 = vrot.slane %v6348_v61, %v5033_v28  ;;  %v7089_v48 = vunpack.i.l.bf16 %v7088_v44 }
 0x229   : > { %v2817_v43 = vadd.f32 %v2801_v5, %v2721_v52  ;;  %v2722_v13 = vadd.f32 %v2706_v40, %v2626_v34  ;;  %v2218_v10 = vrot.slane %v6353_v15, %v5029_v26  ;;  %v2298_v54 = vrot.slane %v6353_v15, %v5033_v28  ;;  %v7096_v52 = vld [vmem:[#allocation41_spill] sm:$0xff]  ;;  %v7098_v40 = vld [vmem:[#allocation40_spill] sm:$0xff] }
 0x22a   : > { %v2394_v11 = vrot.slane %v6353_v15, %v5035_v29  ;;  %v2158_v49 = vpop.f32.mrf.mxu1  ;;  %v7091_v51 = vunpack.i.l.bf16 %v7090_v18  ;;  %v2490_v8 = vrot.slane %v6353_v15, %v5039_v31  ;;  %v2586_v1 = vrot.slane %v6353_v15, %v5037_v30 }
 0x22b   : > { %v2913_v3 = vadd.f32 %v2897_v35, %v2817_v43  ;;  %v2818_v36 = vadd.f32 %v2802_v46, %v2722_v13  ;;  %v2243_v59 = vmul.f32 %v7089_v48, %v2218_v10  ;;  %v2398_v2 = vrot.slane %v6348_v61, %v5035_v29  ;;  %v7101_v46 = vld [vmem:[#allocation43_spill] sm:$0xff] }
 0x22c   : > { %v2323_v24 = vmul.f32 %v7091_v51, %v2298_v54  ;;  %v2494_v38 = vrot.slane %v6348_v61, %v5039_v31  ;;  %v6385_v57 = vadd.f32 %v5924_v16, %v2158_v49  ;;  %v7093_v23 = vunpack.i.l.bf16 %v7092_v9 }
 0x22d   : > { %v2929_v20 = vadd.f32 %v2913_v3, %v6286_v6  ;;  %v2914_v22 = vadd.f32 %v2898_v41, %v2818_v36  ;;  %v2682_v37 = vrot.slane %v6353_v15, %v5041_v32  ;;  %v7094_v42 = vunpack.i.h.bf16 %v7088_v44 }
 0x22e   : > { %v2339_v55 = vadd.f32 %v2323_v24, %v2243_v59  ;;  %v2419_v12 = vmul.f32 %v7093_v23, %v2394_v11  ;;  %v7095_v58 = vunpack.i.h.bf16 %v7090_v18  ;;  %v2590_v5 = vrot.slane %v6348_v61, %v5037_v30  ;;  %v7104_v59 = vld [vmem:[#allocation32_spill] sm:$0xff] }
 0x22f   : > { %4141 = vmatprep.mubr.msk.f32.mxu1 %vm3086_vm3, %v2929_v20  ;;  %v2930_v6 = vadd.f32 %v2914_v22, %v6281_v21  ;;  %v2244_v60 = vmul.f32 %v7094_v42, %v2222_v4  ;;  %v6400_v0 = vadd.f32 %v4095_v45, %v5924_v16  ;;  %v7097_v34 = vunpack.i.l.bf16 %v7096_v52  ;;  %v7107_v20 = vld [vmem:[#allocation39_spill] sm:$0xff] }
 0x230   : > { %v2324_v19 = vmul.f32 %v7095_v58, %v2302_v50  ;;  %v2435_v62 = vadd.f32 %v2419_v12, %v2339_v55  ;;  %v7099_v43 = vunpack.i.l.bf16 %v7098_v40  ;;  %v2778_v21 = vrot.slane %v6353_v15, %v5043_v33 }
 0x231   : > { %v2515_v27 = vmul.f32 %v7097_v34, %v2490_v8  ;;  %4142 = vmatmul.mubr.msk.f32.gmra.mxu1 %vm3086_vm3, %v2930_v6  ;;  %v2874_v35 = vrot.slane %v6353_v15, %v5054_v39  ;;  %v7100_v7 = vunpack.i.h.bf16 %v7092_v9  ;;  %v7102_v63 = vunpack.i.l.bf16 %v7101_v46 }
 0x232   : > { %v2611_v53 = vmul.f32 %v7099_v43, %v2586_v1  ;;  %v2340_v13 = vadd.f32 %v2324_v19, %v2244_v60  ;;  %v2686_v10 = vrot.slane %v6348_v61, %v5041_v32  ;;  %v2226_v54 = vrot.slane %v6385_v57, %v5029_v26 }
 0x233   : > { %v2420_v16 = vmul.f32 %v7100_v7, %v2398_v2  ;;  %v2531_v45 = vadd.f32 %v2515_v27, %v2435_v62  ;;  %v2707_v41 = vmul.f32 %v7102_v63, %v2682_v37  ;;  %v7103_v49 = vunpack.i.h.bf16 %v7096_v52 }
 0x234   : > { %v2306_v36 = vrot.slane %v6385_v57, %v5033_v28  ;;  %v2402_v4 = vrot.slane %v6385_v57, %v5035_v29  ;;  %v2782_v44 = vrot.slane %v6348_v61, %v5043_v33  ;;  %v2878_v48 = vrot.slane %v6348_v61, %v5054_v39 }
 0x235   : > { %v2436_v11 = vadd.f32 %v2420_v16, %v2340_v13  ;;  %v2516_v3 = vmul.f32 %v7103_v49, %v2494_v38  ;;  %v2627_v50 = vadd.f32 %v2611_v53, %v2531_v45  ;;  %v7105_v18 = vunpack.i.l.bf16 %v7104_v59 }
 0x236   : > { %v7106_v8 = vunpack.i.h.bf16 %v7098_v40  ;;  %v7108_v22 = vunpack.i.l.bf16 %v7107_v20  ;;  %v2498_v38 = vrot.slane %v6385_v57, %v5039_v31  ;;  %v7109_v9 = vunpack.i.l.bf16 %v5743_v25 }
 0x237   : > { %v2245_v51 = vmul.f32 %v7105_v18, %v2226_v54  ;;  %v2532_v24 = vadd.f32 %v2516_v3, %v2436_v11  ;;  %v2723_v55 = vadd.f32 %v2707_v41, %v2627_v50  ;;  %v7110_v12 = vunpack.i.l.bf16 %v5846_v17 }
 0x238   : > { %v2612_v1 = vmul.f32 %v7106_v8, %v2590_v5  ;;  %v2325_v2 = vmul.f32 %v7108_v22, %v2306_v36  ;;  %v2803_v23 = vmul.f32 %v7109_v9, %v2778_v21  ;;  %v7111_v6 = vunpack.i.h.bf16 %v7101_v46 }
 0x239   : > { %v2899_v37 = vmul.f32 %v7110_v12, %v2874_v35  ;;  %v7112_v19 = vunpack.i.l.bf16 %v5660_v47  ;;  %v2594_v62 = vrot.slane %v6385_v57, %v5037_v30  ;;  %v7113_v34 = vunpack.i.h.bf16 %v5743_v25 }
 0x23a   : > { %v2708_v42 = vmul.f32 %v7111_v6, %v2686_v10  ;;  %v2628_v60 = vadd.f32 %v2612_v1, %v2532_v24  ;;  %v2341_v58 = vadd.f32 %v2325_v2, %v2245_v51  ;;  %v2819_v52 = vadd.f32 %v2803_v23, %v2723_v55  ;;  %v7122_v1 = vld [vmem:[#allocation44_spill] sm:$0xff]  ;;  %v7125_v23 = vld [vmem:[#allocation46_spill] sm:$0xff] }
 0x23b   : > { %v2421_v5 = vmul.f32 %v7112_v19, %v2402_v4  ;;  %v2804_v27 = vmul.f32 %v7113_v34, %v2782_v44  ;;  %v7114_v40 = vunpack.i.h.bf16 %v5846_v17  ;;  %v2690_v53 = vrot.slane %v6385_v57, %v5041_v32  ;;  %v7119_v44 = vld [vmem:[#allocation45_spill] sm:$0xff] }
 0x23c   : > { %v2724_v21 = vadd.f32 %v2708_v42, %v2628_v60  ;;  %v7115_v13 = vunpack.i.l.bf16 %v5730_v56  ;;  %v2230_v16 = vrot.slane %v6400_v0, %v5029_v26  ;;  %v2915_v45 = vadd.f32 %v2899_v37, %v2819_v52 }
 0x23d   : > { %v2900_v43 = vmul.f32 %v7114_v40, %v2878_v48  ;;  %v2437_v35 = vadd.f32 %v2421_v5, %v2341_v58  ;;  %v2786_v46 = vrot.slane %v6385_v57, %v5043_v33  ;;  %v2310_v25 = vrot.slane %v6400_v0, %v5033_v28 }
 0x23e   : > { %v2517_v7 = vmul.f32 %v7115_v13, %v2498_v38  ;;  %v2406_v17 = vrot.slane %v6400_v0, %v5035_v29  ;;  %v2820_v63 = vadd.f32 %v2804_v27, %v2724_v21  ;;  %v7116_v10 = vunpack.i.l.bf16 %v5792_v14 }
 0x23f   : > { %v7117_v11 = vunpack.i.h.bf16 %v7104_v59  ;;  %v2931_v26 = vadd.f32 %v2915_v45, %v6353_v15  ;;  %v7118_v3 = vunpack.i.h.bf16 %v7107_v20  ;;  %v2502_v4 = vrot.slane %v6400_v0, %v5039_v31 }
 0x240   : > { %v2533_v41 = vadd.f32 %v2517_v7, %v2437_v35  ;;  %v2613_v54 = vmul.f32 %v7116_v10, %v2594_v62  ;;  %v2916_v28 = vadd.f32 %v2900_v43, %v2820_v63  ;;  %v7120_v29 = vunpack.i.l.bf16 %v7119_v44 }
 0x241   : > { %v2246_v49 = vmul.f32 %v7117_v11, %v2230_v16  ;;  %v2326_v36 = vmul.f32 %v7118_v3, %v2310_v25  ;;  %v2882_v18 = vrot.slane %v6385_v57, %v5054_v39  ;;  %4144 = vmatprep.mubr.msk.f32.mxu1 %vm3086_vm3, %v2931_v26  ;;  %v7121_v51 = vunpack.i.h.bf16 %v5660_v47 }
 0x242   : > { %v2629_v50 = vadd.f32 %v2613_v54, %v2533_v41  ;;  %v2709_v48 = vmul.f32 %v7120_v29, %v2690_v53  ;;  %v2598_v24 = vrot.slane %v6400_v0, %v5037_v30  ;;  %v2932_v8 = vadd.f32 %v2916_v28, %v6348_v61  ;;  %v4100_v53 = vpop.f32.mrf.mxu0 }
 0x243   : > { %v2342_v59 = vadd.f32 %v2326_v36, %v2246_v49  ;;  %v2422_v15 = vmul.f32 %v7121_v51, %v2406_v17  ;;  %v7123_v20 = vunpack.i.l.bf16 %v7122_v1  ;;  %v7124_v38 = vunpack.i.h.bf16 %v5730_v56 }
 0x244   : > { %v2725_v31 = vadd.f32 %v2709_v48, %v2629_v50  ;;  %v2694_v9 = vrot.slane %v6400_v0, %v5041_v32  ;;  %4145 = vmatmul.mubr.msk.f32.gmra.mxu1 %vm3086_vm3, %v2932_v8  ;;  %v7126_v12 = vunpack.i.l.bf16 %v7125_v23  ;;  %v7127_v61 = vunpack.i.h.bf16 %v5792_v14 }
 0x245   : > { %v2805_v22 = vmul.f32 %v7123_v20, %v2786_v46  ;;  %v2438_v2 = vadd.f32 %v2422_v15, %v2342_v59  ;;  %v2518_v55 = vmul.f32 %v7124_v38, %v2502_v4  ;;  %v2790_v42 = vrot.slane %v6400_v0, %v5043_v33 }
 0x246   : > { %v2901_v37 = vmul.f32 %v7126_v12, %v2882_v18  ;;  %v2614_v6 = vmul.f32 %v7127_v61, %v2598_v24  ;;  %v7128_v56 = vunpack.i.h.bf16 %v7119_v44  ;;  %v2886_v32 = vrot.slane %v6400_v0, %v5054_v39  ;;  %v6510_v39 = vld [vmem:[%s6673_s8] ss:$0 sm:$0xff] }
 0x247   : > { %v2821_v47 = vadd.f32 %v2805_v22, %v2725_v31  ;;  %v2534_v30 = vadd.f32 %v2518_v55, %v2438_v2  ;;  %v7129_v52 = vunpack.i.h.bf16 %v7122_v1  ;;  %v7130_v27 = vunpack.i.h.bf16 %v7125_v23 }
 0x248   : > { %v2710_v19 = vmul.f32 %v7128_v56, %v2694_v9 }
 0x249   : > { %v2917_v60 = vadd.f32 %v2901_v37, %v2821_v47  ;;  %v2630_v58 = vadd.f32 %v2614_v6, %v2534_v30  ;;  %v2806_v34 = vmul.f32 %v7129_v52, %v2790_v42  ;;  %v2902_v33 = vmul.f32 %v7130_v27, %v2886_v32 }
 0x24b   : > { %v2933_v5 = vadd.f32 %v2917_v60, %v6385_v57  ;;  %v2726_v62 = vadd.f32 %v2710_v19, %v2630_v58  ;;  %v3007_v57 = vpop.f32.mrf.mxu0 }
 0x24d   : > { %4147 = vmatprep.mubr.msk.f32.mxu1 %vm3086_vm3, %v2933_v5  ;;  %v2822_v14 = vadd.f32 %v2806_v34, %v2726_v62  ;;  %v4103_v45 = vpop.f32.mrf.mxu0 }
 0x24f   : > { %v2918_v40 = vadd.f32 %v2902_v33, %v2822_v14  ;;  %v3017_v25 = vpop.f32.mrf.mxu0 }
 0x251   : > { %v2934_v43 = vadd.f32 %v2918_v40, %v6400_v0  ;;  %v4106_v26 = vpop.f32.mrf.mxu0 }
 0x253   : > { %4148 = vmatmul.mubr.msk.f32.gmra.mxu1 %vm3086_vm3, %v2934_v43  ;;  %v3027_v36 = vpop.f32.mrf.mxu0 }
 0x255   : > { %v4109_v18 = vpop.f32.mrf.mxu0 }
 0x257   : > { %v3037_v15 = vpop.f32.mrf.mxu0 }
 0x259   : > { %v4112_v22 = vpop.f32.mrf.mxu0 }
 0x25b   : > { %v3047_v38 = vpop.f32.mrf.mxu0 }
 0x25d   : > { %v4115_v6 = vpop.f32.mrf.mxu0 }
 0x25f   : > { %v3057_v58 = vpop.f32.mrf.mxu0 }
 0x261   : > { %v4118_v14 = vpop.f32.mrf.mxu0 }
 0x263   : > { %v3067_v40 = vpop.f32.mrf.mxu0 }
 0x2a2   : > { %v4128_v21 = vpop.f32.mrf.mxu1 }
 0x2a3   : > { %v3207_v35 = vadd.f32 %v4128_v21, %v4100_v53 }
 0x2a4   : > { %v3201_v13 = vpop.f32.mrf.mxu1 }
 0x2a5   : > { %v6513_v7 = vadd.f32 %v6510_v39, %v3207_v35  ;;  %v3202_v16 = vadd.f32 %v3201_v13, %v3007_v57 }
 0x2a7   : > { %4550 = vtanh.f32 %v6513_v7  ;;  %v6517_v0 = vadd.f32 %v6510_v39, %v3202_v16  ;;  %v3901_v21 = vmul.f32 -1.442695, %v6513_v7 }
 0x2a9   : > { %4552 = vtanh.f32 %v6517_v0  ;;  %v3900_v13 = vmul.f32 -1.442695, %v6517_v0 }
 0x2b4   : > { %v4131_v46 = vpop.f32.mrf.mxu1  ;;  %v4551_v54 = vpop.eup %4550 }
 0x2b5   : > { %v3217_v17 = vadd.f32 %v4131_v46, %v4103_v45  ;;  %3433 = vrot.lane.b32.xlu1 %v4551_v54, %s4709_s14  ;;  %v4121_v46 = vpop.f32.mrf.mxu0 }
 0x2b6   : > { %v3211_v63 = vpop.f32.mrf.mxu1  ;;  %v4553_v49 = vpop.eup %4552 }
 0x2b7   : > { %v6521_v41 = vadd.f32 %v6510_v39, %v3217_v17  ;;  %v3212_v10 = vadd.f32 %v3211_v63, %v3017_v25  ;;  %3431 = vrot.lane.b32.xlu0 %v4553_v49, %s4709_s14  ;;  %v3077_v25 = vpop.f32.mrf.mxu0 }
 0x2b9   : > { %4554 = vtanh.f32 %v6521_v41  ;;  %v6525_v11 = vadd.f32 %v6510_v39, %v3212_v10  ;;  %v3903_v10 = vmul.f32 -1.442695, %v6521_v41 }
 0x2bb   : > { %4556 = vtanh.f32 %v6525_v11 }
 0x2c4   : > { %v4134_v3 = vpop.f32.mrf.mxu1 }
 0x2c5   : > { %v3227_v4 = vadd.f32 %v4134_v3, %v4106_v26  ;;  %v3902_v3 = vmul.f32 -1.442695, %v6525_v11 }
 0x2c6   : > { %v3221_v28 = vpop.f32.mrf.mxu1  ;;  %v4555_v48 = vpop.eup %4554 }
 0x2c7   : > { %v6531_v50 = vadd.f32 %v6510_v39, %v3227_v4  ;;  %v3222_v44 = vadd.f32 %v3221_v28, %v3027_v36  ;;  %3437 = vrot.lane.b32.xlu1 %v4555_v48, %s4709_s14 }
 0x2c8   : > { %v4557_v59 = vpop.eup %4556 }
 0x2c9   : > { %4558 = vtanh.f32 %v6531_v50  ;;  %v6535_v29 = vadd.f32 %v6510_v39, %v3222_v44  ;;  %3435 = vrot.lane.b32.xlu0 %v4557_v59, %s4709_s14  ;;  %v3905_v48 = vmul.f32 -1.442695, %v6531_v50  ;;  %v3625_v50 = vld [vmem:[%s6674_s9 + $0x10] sm:$0xff] }
 0x2cb   : > { %4560 = vtanh.f32 %v6535_v29  ;;  %v3904_v11 = vmul.f32 -1.442695, %v6535_v29  ;;  %v3624_v29 = vld [vmem:[%s6674_s9 + $0x8] sm:$0xff] }
 0x2d0   : > { %v4137_v51 = vpop.f32.mrf.mxu1 }
 0x2d1   : > { %v3237_v37 = vadd.f32 %v4137_v51, %v4109_v18  ;;  %v3626_v51 = vld [vmem:[%s6674_s9 + $0x18] sm:$0xff] }
 0x2d2   : > { %v3231_v24 = vpop.f32.mrf.mxu1  ;;  %4150 = vmatprep.subr.mxu0 %v3626_v51 }
 0x2d3   : > { %v3232_v8 = vadd.f32 %v3231_v24, %v3037_v15  ;;  %v6555_v61 = vadd.f32 %v6510_v39, %v3237_v37  ;;  %4151 = vmatpush3.msra.mxu0 %v3626_v51 }
 0x2d4   : > { %4152 = vmatprep.subr.mxu0 %v3625_v50 }
 0x2d5   : > { %v6541_v31 = vadd.f32 %v6510_v39, %v3232_v8  ;;  %4153 = vmatpush3.msra.mxu0 %v3625_v50 }
 0x2d6   : > { %v4559_v1 = vpop.eup %4558  ;;  %4154 = vmatprep.subr.mxu0 %v3624_v29 }
 0x2d7   : > { %3441 = vrot.lane.b32.xlu1 %v4559_v1, %s4709_s14  ;;  %4562 = vtanh.f32 %v6541_v31  ;;  %v3623_v1 = vld [vmem:[%s6674_s9] sm:$0xff]  ;;  %4155 = vmatpush3.msra.mxu0 %v3624_v29 }
 0x2d8   : > { %v4561_v20 = vpop.eup %4560  ;;  %4156 = vmatprep.subr.mxu0 %v3623_v1 }
 0x2d9   : > { %4157 = vmatpush3.msra.mxu0 %v3623_v1 }
 0x2db   : > { %3439 = vrot.lane.b32.xlu1 %v4561_v20, %s4709_s14 }
 0x2e0   : > { %v4140_v2 = vpop.f32.mrf.mxu1 }
 0x2e1   : > { %v3247_v9 = vadd.f32 %v4140_v2, %v4112_v22 }
 0x2e2   : > { %v3241_v47 = vpop.f32.mrf.mxu1 }
 0x2e3   : > { %v6548_v23 = vadd.f32 %v6510_v39, %v3247_v9  ;;  %v3242_v12 = vadd.f32 %v3241_v47, %v3047_v38  ;;  %v3906_v38 = vmul.f32 -1.442695, %v6541_v31 }
 0x2e4   : > { %v4563_v55 = vpop.eup %4562 }
 0x2e5   : > { %3443 = vrot.lane.b32.xlu1 %v4563_v55, %s4709_s14  ;;  %v6551_v30 = vadd.f32 %v6510_v39, %v3242_v12  ;;  %4564 = vtanh.f32 %v6548_v23 }
 0x2e7   : > { %4566 = vtanh.f32 %v6551_v30 }
 0x2e8   : > { %4568 = vtanh.f32 %v6555_v61 }
 0x2f1   : > { %v4143_v60 = vpop.f32.mrf.mxu1 }
 0x2f2   : > { %v4565_v42 = vpop.eup %4564  ;;  %v3257_v19 = vadd.f32 %v4143_v60, %v4115_v6 }
 0x2f3   : > { %3449 = vrot.lane.b32.xlu0 %v4565_v42, %s4709_s14  ;;  %v3251_v32 = vpop.f32.mrf.mxu1 }
 0x2f4   : > { %v4567_v56 = vpop.eup %4566  ;;  %v6562_v5 = vadd.f32 %v6510_v39, %v3257_v19  ;;  %v3252_v62 = vadd.f32 %v3251_v32, %v3057_v58 }
 0x2f5   : > { %3447 = vrot.lane.b32.xlu1 %v4567_v56, %s4709_s14  ;;  %v4569_v52 = vpop.eup %4568 }
 0x2f6   : > { %4570 = vtanh.f32 %v6562_v5  ;;  %v6566_v34 = vadd.f32 %v6510_v39, %v3252_v62 }
 0x2f8   : > { %4572 = vtanh.f32 %v6566_v34 }
 0x2f9   : > { %3445 = vrot.lane.b32.xlu1 %v4569_v52, %s4709_s14 }
 0x303   : > { %v4571_v53 = vpop.eup %4570 }
 0x304   : > { %v4146_v27 = vpop.f32.mrf.mxu1  ;;  %3453 = vrot.lane.b32.xlu0 %v4571_v53, %s4709_s14 }
 0x305   : > { %v3267_v33 = vadd.f32 %v4146_v27, %v4118_v14  ;;  %v4573_v16 = vpop.eup %4572 }
 0x306   : > { %v3261_v43 = vpop.f32.mrf.mxu1 }
 0x307   : > { %v6572_v57 = vadd.f32 %v6510_v39, %v3267_v33  ;;  %v3262_v35 = vadd.f32 %v3261_v43, %v3067_v40 }
 0x308   : > { %3451 = vrot.lane.b32.xlu0 %v4573_v16, %s4709_s14 }
 0x309   : > { %4574 = vtanh.f32 %v6572_v57  ;;  %v6578_v45 = vadd.f32 %v6510_v39, %v3262_v35 }
 0x30a   : > { %4576 = vpow2.f32 %v3901_v21 }
 0x30b   : > { %4578 = vpow2.f32 %v3900_v13 }
 0x30c   : > { %4580 = vtanh.f32 %v6578_v45 }
 0x313   : > { %v4149_v7 = vpop.f32.mrf.mxu1 }
 0x314   : > { %v3277_v17 = vadd.f32 %v4149_v7, %v4121_v46 }
 0x315   : > { %v3271_v63 = vpop.f32.mrf.mxu1 }
 0x316   : > { %v6584_v54 = vadd.f32 %v6510_v39, %v3277_v17  ;;  %v3272_v0 = vadd.f32 %v3271_v63, %v3077_v25  ;;  %v4575_v49 = vpop.eup %4574 }
 0x317   : > { %3457 = vrot.lane.b32.xlu0 %v4575_v49, %s4709_s14  ;;  %v4577_v36 = vpop.eup %4576 }
 0x318   : > { %4582 = vtanh.f32 %v6584_v54  ;;  %v6588_v26 = vadd.f32 %v6510_v39, %v3272_v0  ;;  %v4579_v4 = vpop.eup %4578  ;;  %v3352_v41 = vadd.f32 1.0, %v4577_v36 }
 0x319   : > { %4584 = vpow2.f32 %v3903_v10  ;;  %v4581_v28 = vpop.eup %4580  ;;  %v3351_v44 = vadd.f32 1.0, %v4579_v4  ;;  %v3909_v10 = vmul.f32 -1.442695, %v6548_v23  ;;  %v3907_v23 = vmul.f32 -1.442695, %v6555_v61 }
 0x31a   : > { %4586 = vtanh.f32 %v6588_v26 }
 0x31b   : > { %4588 = vpow2.f32 %v3902_v3  ;;  %3455 = vrot.lane.b32.xlu0 %v4581_v28, %s4709_s14  ;;  %v3908_v28 = vmul.f32 -1.442695, %v6551_v30 }
 0x31c   : > { %4590 = vrcp.f32 %v3352_v41 }
 0x31d   : > { %4592 = vrcp.f32 %v3351_v44 }
 0x31e   : > { %4594 = vpow2.f32 %v3905_v48 }
 0x31f   : > { %4596 = vpow2.f32 %v3904_v11 }
 0x325   : > { %v4583_v39 = vpop.eup %4582 }
 0x326   : > { %3461 = vrot.lane.b32.xlu1 %v4583_v39, %s4709_s14  ;;  %v4585_v18 = vpop.eup %4584 }
 0x327   : > { %v4587_v59 = vpop.eup %4586  ;;  %v3354_v24 = vadd.f32 1.0, %v4585_v18  ;;  %v3434_v22 = vpop.permute.xlu1 %3433 }
 0x328   : > { %3459 = vrot.lane.b32.xlu0 %v4587_v59, %s4709_s14  ;;  %v4589_v15 = vpop.eup %4588 }
 0x329   : > { %v3353_v8 = vadd.f32 1.0, %v4589_v15  ;;  %v4591_v20 = vpop.eup %4590  ;;  %4598 = vrcp.f32 %v3354_v24  ;;  %v3432_v47 = vpop.permute.xlu0 %3431 }
 0x32a   : > { %v3480_v2 = vmul.f32 %v4591_v20, %v3434_v22  ;;  %v4593_v55 = vpop.eup %4592 }
 0x32b   : > { %4600 = vrcp.f32 %v3353_v8  ;;  %v3479_v37 = vmul.f32 %v4593_v55, %v3432_v47  ;;  %v4595_v6 = vpop.eup %4594 }
 0x32c   : > { %v3502_v9 = vsel %vm1973_vm2, %v3480_v2, 0.0  ;;  %4602 = vpow2.f32 %v3906_v38  ;;  %v3356_v56 = vadd.f32 1.0, %v4595_v6  ;;  %v4597_v32 = vpop.eup %4596 }
 0x32d   : > { %v3503_v12 = vrot.slane %v3502_v9, 4  ;;  %v3495_v60 = vsel %vm1973_vm2, %v3479_v37, 0.0  ;;  %v3355_v14 = vadd.f32 1.0, %v4597_v32 }
 0x32e   : > { %v3496_v58 = vrot.slane %v3495_v60, 4  ;;  %4604 = vrcp.f32 %v3356_v56 }
 0x32f   : > { %v3504_v42 = vadd.f32 %v3503_v12, %v3502_v9  ;;  %4606 = vrcp.f32 %v3355_v14 }
 0x330   : > { %v3497_v62 = vadd.f32 %v3496_v58, %v3495_v60 }
 0x331   : > { %v3505_v19 = vrot.slane %v3504_v42, 2 }
 0x332   : > { %v3498_v52 = vrot.slane %v3497_v62, 2 }
 0x333   : > { %v3506_v31 = vadd.f32 %v3505_v19, %v3504_v42 }
 0x334   : > { %v3499_v40 = vadd.f32 %v3498_v52, %v3497_v62  ;;  %v3911_v62 = vmul.f32 -1.442695, %v6562_v5 }
 0x335   : > { %v3507_v27 = vrot.slane %v3506_v31, 1 }
 0x336   : > { %v4599_v33 = vpop.eup %4598  ;;  %v3500_v35 = vrot.slane %v3499_v40, 1 }
 0x337   : > { %v3508_v53 = vadd.f32 %v3507_v27, %v3506_v31 }
 0x338   : > { %v4601_v13 = vpop.eup %4600  ;;  %v3501_v7 = vadd.f32 %v3500_v35, %v3499_v40 }
 0x339   : > { %v3438_v43 = vpop.permute.xlu1 %3437  ;;  %4608 = vtanh.f32 %v3508_v53  ;;  %v4603_v63 = vpop.eup %4602 }
 0x33a   : > { %v3482_v21 = vmul.f32 %v4599_v33, %v3438_v43  ;;  %4610 = vtanh.f32 %v3501_v7  ;;  %v3357_v4 = vadd.f32 1.0, %v4603_v63 }
 0x33b   : > { %v3436_v46 = vpop.permute.xlu0 %3435  ;;  %4612 = vpow2.f32 %v3909_v10  ;;  %v4605_v39 = vpop.eup %4604 }
 0x33c   : > { %v3516_v16 = vsel %vm1973_vm2, %v3482_v21, 0.0  ;;  %v3481_v17 = vmul.f32 %v4601_v13, %v3436_v46  ;;  %4614 = vrcp.f32 %v3357_v4  ;;  %v4607_v50 = vpop.eup %4606  ;;  %v3910_v13 = vmul.f32 -1.442695, %v6566_v34 }
 0x33d   : > { %v3517_v25 = vrot.slane %v3516_v16, 4  ;;  %4616 = vpow2.f32 %v3908_v28 }
 0x33e   : > { %v3509_v49 = vsel %vm1973_vm2, %v3481_v17, 0.0  ;;  %4618 = vpow2.f32 %v3907_v23  ;;  %v3912_v23 = vmul.f32 -1.442695, %v6578_v45 }
 0x33f   : > { %v3518_v0 = vadd.f32 %v3517_v25, %v3516_v16  ;;  %v3510_v3 = vrot.slane %v3509_v49, 4 }
 0x341   : > { %v3519_v36 = vrot.slane %v3518_v0, 2  ;;  %v3511_v41 = vadd.f32 %v3510_v3, %v3509_v49  ;;  %v3913_v49 = vmul.f32 -1.442695, %v6572_v57 }
 0x343   : > { %v3520_v44 = vadd.f32 %v3519_v36, %v3518_v0  ;;  %v3512_v48 = vrot.slane %v3511_v41, 2 }
 0x345   : > { %v3521_v11 = vrot.slane %v3520_v44, 1  ;;  %v3513_v59 = vadd.f32 %v3512_v48, %v3511_v41 }
 0x346   : > { %v4609_v22 = vpop.eup %4608 }
 0x347   : > { %v3514_v15 = vrot.slane %v3513_v59, 1  ;;  %v3522_v29 = vadd.f32 %v3521_v11, %v3520_v44  ;;  %v4611_v38 = vpop.eup %4610 }
 0x348   : > { %v3651_v47 = vsel %vm3650_vm4, %v4609_v22, %v4611_v38  ;;  %v4613_v6 = vpop.eup %4612 }
 0x349   : > { %v3442_v18 = vpop.permute.xlu1 %3441  ;;  %v3515_v20 = vadd.f32 %v3514_v15, %v3513_v59  ;;  %v4615_v58 = vpop.eup %4614  ;;  %v3360_v56 = vadd.f32 1.0, %v4613_v6 }
 0x34a   : > { %v3484_v51 = vmul.f32 %v4605_v39, %v3442_v18  ;;  %v4617_v32 = vpop.eup %4616 }
 0x34b   : > { %4620 = vtanh.f32 %v3515_v20  ;;  %v3359_v33 = vadd.f32 1.0, %v4617_v32  ;;  %v4619_v53 = vpop.eup %4618 }
 0x34c   : > { %v3530_v24 = vsel %vm1973_vm2, %v3484_v51, 0.0  ;;  %4622 = vtanh.f32 %v3522_v29  ;;  %v3358_v7 = vadd.f32 1.0, %v4619_v53 }
 0x34d   : > { %v3531_v8 = vrot.slane %v3530_v24, 4  ;;  %v3440_v1 = vpop.permute.xlu1 %3439  ;;  %4624 = vrcp.f32 %v3360_v56 }
 0x34e   : > { %v3483_v30 = vmul.f32 %v4607_v50, %v3440_v1  ;;  %4626 = vpow2.f32 %v3911_v62 }
 0x34f   : > { %v3532_v2 = vadd.f32 %v3531_v8, %v3530_v24 }
 0x350   : > { %v3523_v55 = vsel %vm1973_vm2, %v3483_v30, 0.0 }
 0x351   : > { %v3533_v61 = vrot.slane %v3532_v2, 2  ;;  %v3524_v9 = vrot.slane %v3523_v55, 4 }
 0x353   : > { %v3534_v12 = vadd.f32 %v3533_v61, %v3532_v2  ;;  %v3525_v37 = vadd.f32 %v3524_v9, %v3523_v55 }
 0x355   : > { %v3526_v42 = vrot.slane %v3525_v37, 2  ;;  %v3535_v60 = vrot.slane %v3534_v12, 1 }
 0x357   : > { %v3527_v19 = vadd.f32 %v3526_v42, %v3525_v37  ;;  %v3444_v31 = vpop.permute.xlu1 %3443  ;;  %v3536_v27 = vadd.f32 %v3535_v60, %v3534_v12  ;;  %v3914_v12 = vmul.f32 -1.442695, %v6588_v26 }
 0x358   : > { %v3485_v14 = vmul.f32 %v4615_v58, %v3444_v31  ;;  %v4621_v35 = vpop.eup %4620 }
 0x359   : > { %v3528_v52 = vrot.slane %v3527_v19, 1  ;;  %v4623_v16 = vpop.eup %4622  ;;  %v3653_v46 = vsel %vm3652_vm5, %v4621_v35, %v3651_v47  ;;  %v3915_v47 = vmul.f32 -1.442695, %v6584_v54 }
 0x35a   : > { %v3537_v43 = vsel %vm1973_vm2, %v3485_v14, 0.0  ;;  %v3655_v25 = vsel %vm3654_vm6, %v4623_v16, %v3653_v46  ;;  %v4625_v3 = vpop.eup %4624 }
 0x35b   : > { %v3529_v40 = vadd.f32 %v3528_v52, %v3527_v19  ;;  %v3538_v21 = vrot.slane %v3537_v43, 4  ;;  %v4627_v34 = vpop.eup %4626 }
 0x35c   : > { %v3362_v18 = vadd.f32 1.0, %v4627_v34 }
 0x35d   : > { %4628 = vtanh.f32 %v3529_v40  ;;  %v3539_v5 = vadd.f32 %v3538_v21, %v3537_v43 }
 0x35e   : > { %4630 = vtanh.f32 %v3536_v27 }
 0x35f   : > { %4632 = vrcp.f32 %v3359_v33  ;;  %v3540_v17 = vrot.slane %v3539_v5, 2 }
 0x360   : > { %4634 = vpow2.f32 %v3910_v13 }
 0x361   : > { %v3541_v63 = vadd.f32 %v3540_v17, %v3539_v5  ;;  %4636 = vrcp.f32 %v3358_v7 }
 0x363   : > { %v3542_v10 = vrot.slane %v3541_v63, 1 }
 0x365   : > { %v3543_v0 = vadd.f32 %v3542_v10, %v3541_v63  ;;  %v3450_v4 = vpop.permute.xlu0 %3449 }
 0x366   : > { %v3488_v28 = vmul.f32 %v4625_v3, %v3450_v4 }
 0x367   : > { %4638 = vtanh.f32 %v3543_v0  ;;  %v3448_v39 = vpop.permute.xlu1 %3447 }
 0x368   : > { %4640 = vpow2.f32 %v3913_v49  ;;  %v3558_v59 = vsel %vm1973_vm2, %v3488_v28, 0.0 }
 0x369   : > { %v3559_v15 = vrot.slane %v3558_v59, 4  ;;  %4642 = vrcp.f32 %v3362_v18 }
 0x36a   : > { %v4629_v36 = vpop.eup %4628  ;;  %4644 = vpow2.f32 %v3912_v23 }
 0x36b   : > { %v4631_v41 = vpop.eup %4630  ;;  %v3657_v44 = vsel %vm3656_vm7, %v4629_v36, %v3655_v25  ;;  %v3560_v29 = vadd.f32 %v3559_v15, %v3558_v59  ;;  %v3446_v1 = vpop.permute.xlu1 %3445 }
 0x36c   : > { %v4633_v48 = vpop.eup %4632  ;;  %v3659_v11 = vsel %vm3658_vm8, %v4631_v41, %v3657_v44 }
 0x36d   : > { %v3487_v57 = vmul.f32 %v4633_v48, %v3448_v39  ;;  %v4635_v51 = vpop.eup %4634  ;;  %v3561_v22 = vrot.slane %v3560_v29, 2 }
 0x36e   : > { %v4637_v50 = vpop.eup %4636  ;;  %v3361_v20 = vadd.f32 1.0, %v4635_v51 }
 0x36f   : > { %v3551_v24 = vsel %vm1973_vm2, %v3487_v57, 0.0  ;;  %v3486_v30 = vmul.f32 %v4637_v50, %v3446_v1  ;;  %v3562_v55 = vadd.f32 %v3561_v22, %v3560_v29 }
 0x370   : > { %v3552_v8 = vrot.slane %v3551_v24, 4  ;;  %4646 = vrcp.f32 %v3361_v20 }
 0x371   : > { %v3544_v38 = vsel %vm1973_vm2, %v3486_v30, 0.0  ;;  %v3563_v37 = vrot.slane %v3562_v55, 1  ;;  %4648 = vpow2.f32 %v3915_v47 }
 0x372   : > { %v3553_v2 = vadd.f32 %v3552_v8, %v3551_v24  ;;  %v3545_v9 = vrot.slane %v3544_v38, 4  ;;  %4650 = vpow2.f32 %v3914_v12 }
 0x373   : > { %v3564_v56 = vadd.f32 %v3563_v37, %v3562_v55 }
 0x374   : > { %v3554_v61 = vrot.slane %v3553_v2, 2  ;;  %v4639_v45 = vpop.eup %4638  ;;  %v3546_v42 = vadd.f32 %v3545_v9, %v3544_v38 }
 0x375   : > { %v3661_v60 = vsel %vm3660_vm9, %v4639_v45, %v3659_v11  ;;  %v4641_v58 = vpop.eup %4640  ;;  %4652 = vtanh.f32 %v3564_v56 }
 0x376   : > { %v3555_v6 = vadd.f32 %v3554_v61, %v3553_v2  ;;  %v3547_v32 = vrot.slane %v3546_v42, 2  ;;  %v3364_v52 = vadd.f32 1.0, %v4641_v58  ;;  %v4643_v54 = vpop.eup %4642  ;;  %v3454_v26 = vpop.permute.xlu0 %3453 }
 0x377   : > { %v4645_v33 = vpop.eup %4644  ;;  %v3490_v40 = vmul.f32 %v4643_v54, %v3454_v26 }
 0x378   : > { %v3556_v19 = vrot.slane %v3555_v6, 1  ;;  %v3548_v31 = vadd.f32 %v3547_v32, %v3546_v42  ;;  %v3363_v21 = vadd.f32 1.0, %v4645_v33 }
 0x379   : > { %v3572_v43 = vsel %vm1973_vm2, %v3490_v40, 0.0 }
 0x37a   : > { %v3557_v62 = vadd.f32 %v3556_v19, %v3555_v6  ;;  %v3549_v14 = vrot.slane %v3548_v31, 1  ;;  %v3573_v35 = vrot.slane %v3572_v43, 4  ;;  %v3452_v13 = vpop.permute.xlu0 %3451 }
 0x37c   : > { %4654 = vtanh.f32 %v3557_v62  ;;  %v3550_v27 = vadd.f32 %v3549_v14, %v3548_v31  ;;  %v3574_v5 = vadd.f32 %v3573_v35, %v3572_v43 }
 0x37d   : > { %4656 = vrcp.f32 %v3364_v52  ;;  %v4647_v53 = vpop.eup %4646 }
 0x37e   : > { %4658 = vtanh.f32 %v3550_v27  ;;  %v3489_v16 = vmul.f32 %v4647_v53, %v3452_v13  ;;  %v4649_v7 = vpop.eup %4648  ;;  %v3575_v25 = vrot.slane %v3574_v5, 2 }
 0x37f   : > { %4660 = vrcp.f32 %v3363_v21  ;;  %v4651_v63 = vpop.eup %4650  ;;  %v3366_v34 = vadd.f32 1.0, %v4649_v7 }
 0x380   : > { %v3565_v46 = vsel %vm1973_vm2, %v3489_v16, 0.0  ;;  %v3576_v0 = vadd.f32 %v3575_v25, %v3574_v5  ;;  %v3365_v44 = vadd.f32 1.0, %v4651_v63 }
 0x381   : > { %v3566_v17 = vrot.slane %v3565_v46, 4  ;;  %4662 = vrcp.f32 %v3366_v34  ;;  %v3916_v34 = vld [vmem:[%s6675_s10] ss:$0 sm:$0xff] }
 0x382   : > { %v4653_v10 = vpop.eup %4652  ;;  %v3577_v41 = vrot.slane %v3576_v0, 1  ;;  %4664 = vrcp.f32 %v3365_v44 }
 0x383   : > { %v3567_v49 = vadd.f32 %v3566_v17, %v3565_v46 }
 0x384   : > { %v3578_v51 = vadd.f32 %v3577_v41, %v3576_v0 }
 0x385   : > { %v3568_v36 = vrot.slane %v3567_v49, 2 }
 0x387   : > { %v3569_v48 = vadd.f32 %v3568_v36, %v3567_v49 }
 0x389   : > { %v4655_v3 = vpop.eup %4654  ;;  %v3458_v11 = vpop.permute.xlu0 %3457  ;;  %v3570_v18 = vrot.slane %v3569_v48, 1 }
 0x38a   : > { %v3664_v4 = vsel %vm3650_vm4, %v4653_v10, %v4655_v3  ;;  %v4657_v28 = vpop.eup %4656 }
 0x38b   : > { %v4659_v39 = vpop.eup %4658  ;;  %v3492_v59 = vmul.f32 %v4657_v28, %v3458_v11  ;;  %v3571_v23 = vadd.f32 %v3570_v18, %v3569_v48 }
 0x38c   : > { %v3663_v57 = vsel %vm3662_vm10, %v4659_v39, %v3661_v60  ;;  %v4661_v50 = vpop.eup %4660 }
 0x38d   : > { %4158 = vmatprep.mubr.msk.f32.mxu0 %vm1973_vm2, %v3663_v57  ;;  %v3586_v15 = vsel %vm1973_vm2, %v3492_v59, 0.0  ;;  %4666 = vtanh.f32 %v3571_v23  ;;  %v3456_v8 = vpop.permute.xlu0 %3455 }
 0x38e   : > { %v3587_v24 = vrot.slane %v3586_v15, 4  ;;  %4668 = vtanh.f32 %v3578_v51  ;;  %v3491_v1 = vmul.f32 %v4661_v50, %v3456_v8  ;;  %v4663_v55 = vpop.eup %4662 }
 0x38f   : > { %v4665_v12 = vpop.eup %4664 }
 0x390   : > { %v3588_v29 = vadd.f32 %v3587_v24, %v3586_v15  ;;  %v3579_v30 = vsel %vm1973_vm2, %v3491_v1, 0.0 }
 0x391   : > { %v3580_v22 = vrot.slane %v3579_v30, 4 }
 0x392   : > { %v3589_v20 = vrot.slane %v3588_v29, 2 }
 0x393   : > { %v3581_v38 = vadd.f32 %v3580_v22, %v3579_v30 }
 0x394   : > { %v3590_v2 = vadd.f32 %v3589_v20, %v3588_v29 }
 0x395   : > { %v3582_v45 = vrot.slane %v3581_v38, 2 }
 0x396   : > { %v3591_v47 = vrot.slane %v3590_v2, 1 }
 0x397   : > { %v3583_v6 = vadd.f32 %v3582_v45, %v3581_v38 }
 0x398   : > { %v3462_v61 = vpop.permute.xlu1 %3461  ;;  %v3592_v62 = vadd.f32 %v3591_v47, %v3590_v2 }
 0x399   : > { %v3494_v9 = vmul.f32 %v4663_v55, %v3462_v61  ;;  %v3584_v19 = vrot.slane %v3583_v6, 1 }
 0x39a   : > { %v3460_v42 = vpop.permute.xlu0 %3459  ;;  %v4667_v56 = vpop.eup %4666 }
 0x39b   : > { %v3600_v37 = vsel %vm1973_vm2, %v3494_v9, 0.0  ;;  %v3493_v58 = vmul.f32 %v4665_v12, %v3460_v42  ;;  %v4669_v32 = vpop.eup %4668  ;;  %v3665_v31 = vsel %vm3652_vm5, %v4667_v56, %v3664_v4  ;;  %v3585_v27 = vadd.f32 %v3584_v19, %v3583_v6 }
 0x39c   : > { %v3601_v60 = vrot.slane %v3600_v37, 4  ;;  %v3666_v54 = vsel %vm3654_vm6, %v4669_v32, %v3665_v31 }
 0x39d   : > { %v3593_v14 = vsel %vm1973_vm2, %v3493_v58, 0.0  ;;  %4670 = vtanh.f32 %v3585_v27 }
 0x39e   : > { %v3602_v52 = vadd.f32 %v3601_v60, %v3600_v37  ;;  %v3594_v26 = vrot.slane %v3593_v14, 4  ;;  %4672 = vtanh.f32 %v3592_v62 }
 0x3a0   : > { %v3603_v33 = vrot.slane %v3602_v52, 2  ;;  %v3595_v40 = vadd.f32 %v3594_v26, %v3593_v14 }
 0x3a2   : > { %v3604_v43 = vadd.f32 %v3603_v33, %v3602_v52  ;;  %v3596_v53 = vrot.slane %v3595_v40, 2 }
 0x3a4   : > { %v3605_v21 = vrot.slane %v3604_v43, 1  ;;  %v3597_v35 = vadd.f32 %v3596_v53, %v3595_v40 }
 0x3a6   : > { %v3598_v13 = vrot.slane %v3597_v35, 1  ;;  %v3606_v16 = vadd.f32 %v3605_v21, %v3604_v43 }
 0x3a8   : > { %v3599_v5 = vadd.f32 %v3598_v13, %v3597_v35 }
 0x3aa   : > { %4674 = vtanh.f32 %v3599_v5  ;;  %v4671_v46 = vpop.eup %4670 }
 0x3ab   : > { %4676 = vtanh.f32 %v3606_v16  ;;  %v4673_v7 = vpop.eup %4672  ;;  %v3667_v25 = vsel %vm3656_vm7, %v4671_v46, %v3666_v54 }
 0x3ac   : > { %v3668_v17 = vsel %vm3658_vm8, %v4673_v7, %v3667_v25 }
 0x3b7   : > { %v4675_v63 = vpop.eup %4674 }
 0x3b8   : > { %v4677_v10 = vpop.eup %4676  ;;  %v3669_v0 = vsel %vm3660_vm9, %v4675_v63, %v3668_v17 }
 0x3b9   : > { %v3670_v49 = vsel %vm3662_vm10, %v4677_v10, %v3669_v0 }
 0x3ba   : > { %4159 = vmatmul.mubr.msk.f32.vlgmr.msra.gmra.mxu0 %vm1973_vm2, %v3670_v49 }
 0x47a   : > { %v4160_v3 = vpop.f32.mrf.mxu0 }
 0x47b   : > { %v3747_v41 = vadd.f32 %v4160_v3, %v3916_v34 }
 0x47c   : > { %v3741_v36 = vpop.f32.mrf.mxu0 }
 0x47d   : > { %v3742_v4 = vadd.f32 %v3916_v34, %v3741_v36  ;;  %3751 = vst.msk [vmem:[%s410_s26 + $0x8] sm:$0xff] %vm3086_vm3, %v3747_v41 }
 0x47f   : > { %3750 = vst.msk [vmem:[%s410_s26] sm:$0xff] %vm3086_vm3, %v3742_v4 }
 0x480 PF: > { %s21_s17 = sadd.s32 1, %s4699_s17  }
 0x481   : > { %p18_p5 = scmp.ge.s32.totalorder %s21_s17, 4  }
 0x483   :  { %20 = sbr.rel (!%p18_p5) target bundleno = 1 (0x1), region = 97 }

</bundles_post_ra>
